<compile_context>
chip_gen: v5e
topology: v5e:2x2
jax: 0.10.0
libtpu: 0.0.40
codegen_flags: <defaults>
</compile_context>

<pallas_src>
import functools

import jax
import jax.numpy as jnp
from jax import lax
from jax.experimental import pallas as pl
from jax.experimental.pallas import tpu as pltpu


def _ff_kernel(x_ref, g_ref, bt_ref, w1t_ref, b1_ref, w2t_ref, b2_ref, o_ref,
               acc_ref, *, h_chunk, n_chunks):
    # x_ref block: (C, tT) -- channels on sublanes, time on lanes.
    x = x_ref[...].astype(jnp.float32)

    # LayerNorm over channels (sublane axis), single pass; eps = torch 1e-5.
    mean = jnp.mean(x, axis=0, keepdims=True)                  # (1, tT)
    var = jnp.mean(x * x, axis=0, keepdims=True) - mean * mean
    y = (x - mean) * lax.rsqrt(var + 1e-5) * g_ref[...] + bt_ref[...]
    y_bf = y.astype(jnp.bfloat16)                              # MXU input only

    # Conv2 accumulator lives in VMEM scratch (pins the live set across the
    # unrolled chunk loop); initialized with the hoisted output bias b2.
    acc_ref[...] = jnp.broadcast_to(b2_ref[...], acc_ref.shape).astype(
        jnp.float32)

    # H-chunked: partial (Hc, tT) of Conv1 -> Swish -> accumulate into Conv2.
    # h_chunk is a multiple of 128 (or == H), so these static ref slices are
    # aligned zero-cost views (no lane-tile-crossing copies).
    for k in range(n_chunks):
        lo = k * h_chunk
        hi = lo + h_chunk
        h = jnp.dot(w1t_ref[lo:hi, :], y_bf,
                    preferred_element_type=jnp.float32) + b1_ref[lo:hi, :]
        h = h * jax.nn.sigmoid(h)                              # Swish (f32)
        # TODO(synk): Dropout is identity in eval mode; no RNG applied here.
        acc_ref[...] += jnp.dot(w2t_ref[:, lo:hi], h.astype(jnp.bfloat16),
                                preferred_element_type=jnp.float32)

    o_ref[...] = acc_ref[...].astype(o_ref.dtype)


def _pick_h_chunk(H, requested):
    """Largest multiple of 128 that divides H and is <= requested (>=128)."""
    req = max(128, min(int(requested), H))
    c = (req // 128) * 128
    while c >= 128:
        if H % c == 0:
            return c
        c -= 128
    # No 128-multiple divisor of H (unusual config): single full-H chunk.
    return H


def feed_forward_module(x, gamma, beta, w1t, b1, w2t, b2, *,
                        t_tile=512, h_chunk=512):
    """Conformer FeedForwardModule forward.

    x:     (B, C, T) float32
    gamma: (C,)  beta: (C,)          LayerNorm affine params
    w1t:   (4C, C)  b1: (4C,)        Conv1d(C, 4C, k=1) weight (torch (out,in))
    w2t:   (C, 4C)  b2: (C,)         Conv1d(4C, C, k=1)
    Returns (B, C, T) float32.
    """
    B, C, T = x.shape
    H = w1t.shape[0]

    # Lane-dense time tiles (multiple of 128), capped near T; ragged last
    # tile handled by Pallas partial-block masking -> no pad / slice HBM
    # round trips in the wrapper.
    t_tile = max(128, min((int(t_tile) // 128) * 128, pl.cdiv(T, 128) * 128))
    n_t = pl.cdiv(T, t_tile)

    h_chunk = _pick_h_chunk(H, h_chunk)
    n_chunks = H // h_chunk

    # bf16 weights for the MXU; LN params / biases stay f32 (VPU path).
    w1t_bf = w1t.astype(jnp.bfloat16)
    w2t_bf = w2t.astype(jnp.bfloat16)
    g2 = gamma.reshape(C, 1).astype(jnp.float32)
    bt2 = beta.reshape(C, 1).astype(jnp.float32)
    b1_2 = b1.reshape(H, 1).astype(jnp.float32)
    b2_2 = b2.reshape(C, 1).astype(jnp.float32)

    kernel = functools.partial(_ff_kernel, h_chunk=h_chunk, n_chunks=n_chunks)

    def build(const_bufs):
        # const_bufs == 1: single-buffer the invariant operands.
        const_mode = ({"pipeline_mode": pl.Buffered(1)}
                      if const_bufs == 1 else {})

        # VMEM estimate (bytes): double-buffered x/out tiles, weight/bias
        # residency, scratch accumulator, and the in-kernel f32 temporaries
        # (x, y, per-chunk h).  Clamp at 48 MiB (headroom on v7x's 64 MiB).
        est = (
            2 * 2 * C * t_tile * 4                   # x / out tiles, 2 buffers
            + const_bufs * 2 * H * C * 2             # W1^T + W2^T (bf16)
            + const_bufs * (H + 3 * C) * 128 * 4     # b1/gamma/beta/b2 (padded)
            + C * t_tile * 4                         # acc scratch
            + (3 * C + 2 * h_chunk) * t_tile * 4     # LN / chunk temporaries
        )
        vmem_limit = int(min(max(int(1.5 * est), 32 << 20), 48 << 20))

        return pl.pallas_call(
            kernel,
            out_shape=jax.ShapeDtypeStruct((B, C, T), x.dtype),
            grid_spec=pltpu.PrefetchScalarGridSpec(
                num_scalar_prefetch=0,
                grid=(B, n_t),
                in_specs=[
                    pl.BlockSpec((pl.Squeezed(), C, t_tile),
                                 lambda b, t: (b, 0, t)),                 # x
                    pl.BlockSpec((C, 1), lambda b, t: (0, 0), **const_mode),
                    pl.BlockSpec((C, 1), lambda b, t: (0, 0), **const_mode),
                    pl.BlockSpec((H, C), lambda b, t: (0, 0), **const_mode),
                    pl.BlockSpec((H, 1), lambda b, t: (0, 0), **const_mode),
                    pl.BlockSpec((C, H), lambda b, t: (0, 0), **const_mode),
                    pl.BlockSpec((C, 1), lambda b, t: (0, 0), **const_mode),
                ],
                out_specs=pl.BlockSpec((pl.Squeezed(), C, t_tile),
                                       lambda b, t: (b, 0, t)),
                scratch_shapes=[pltpu.VMEM((C, t_tile), jnp.float32)],
            ),
            compiler_params=pltpu.CompilerParams(
                dimension_semantics=("parallel", "parallel"),
                vmem_limit_bytes=vmem_limit),
        )

    args = (x, g2, bt2, w1t_bf, b1_2, w2t_bf, b2_2)
    try:
        return build(1)(*args)
    except Exception:
        # Fallback if this JAX build rejects pipeline_mode=pl.Buffered(1) on
        # top-level pallas_call BlockSpecs: default double-buffering.
        return build(2)(*args)


def _reference(x, gamma, beta, w1t, b1, w2t, b2):
    # Pure-JAX f32 reference mirroring the torch module (eval mode).
    y = jnp.transpose(x, (0, 2, 1))                            # (B, T, C)
    mean = jnp.mean(y, axis=-1, keepdims=True)
    var = jnp.mean((y - mean) ** 2, axis=-1, keepdims=True)
    yn = (y - mean) * lax.rsqrt(var + 1e-5) * gamma + beta
    h = yn @ w1t.T + b1
    h = h * jax.nn.sigmoid(h)
    o = h @ w2t.T + b2
    return jnp.transpose(o, (0, 2, 1))


if __name__ == "__main__":
    # num_channels = 64, hidden = 4*C = 256.  T = 200 with t_tile = 128
    # exercises the ragged partial time tile; h_chunk = 128 exercises the
    # multi-chunk accumulation path.  Parallel grid = (2, 2).
    B, C, T = 2, 64, 200
    H = 4 * C

    key = jax.random.PRNGKey(0)
    kx, kg, kb, k1, k2, k3, k4 = jax.random.split(key, 7)

    x = jax.random.normal(kx, (B, C, T), dtype=jnp.float32)

    # LayerNorm affine params (perturbed from torch default init).
    gamma = 1.0 + 0.1 * jax.random.normal(kg, (C,), dtype=jnp.float32)
    beta = 0.1 * jax.random.normal(kb, (C,), dtype=jnp.float32)

    # Conv1d(k=1) weights in torch layout (out, in) after squeezing kernel dim.
    w1t = jax.random.normal(k1, (H, C), dtype=jnp.float32) * 0.05
    b1 = jax.random.normal(k2, (H,), dtype=jnp.float32) * 0.05
    w2t = jax.random.normal(k3, (C, H), dtype=jnp.float32) * 0.05
    b2 = jax.random.normal(k4, (C,), dtype=jnp.float32) * 0.05

    out = feed_forward_module(x, gamma, beta, w1t, b1, w2t, b2,
                              t_tile=128, h_chunk=128)
    jax.block_until_ready(out)

    ref = _reference(x, gamma, beta, w1t, b1, w2t, b2)
    assert out.shape == (B, C, T)
    # bf16 MXU inputs (f32 accumulation) -> slightly looser tolerance.
    assert jnp.allclose(out, ref, atol=2e-2, rtol=2e-2), float(
        jnp.max(jnp.abs(out - ref)))
    print("KERNEL_OK")
</pallas_src>

<mosaic_0001>
module attributes {stable_mosaic.version = 11 : i64} {
  func.func @_ff_kernel(%arg0: i32, %arg1: i32, %arg2: memref<1x64x128xf32, #tpu.memory_space<vmem>>, %arg3: memref<64x1xf32, #tpu.memory_space<vmem>>, %arg4: memref<64x1xf32, #tpu.memory_space<vmem>>, %arg5: memref<256x64xbf16, #tpu.memory_space<vmem>>, %arg6: memref<256x1xf32, #tpu.memory_space<vmem>>, %arg7: memref<64x256xbf16, #tpu.memory_space<vmem>>, %arg8: memref<64x1xf32, #tpu.memory_space<vmem>>, %arg9: memref<1x64x128xf32, #tpu.memory_space<vmem>>, %arg10: memref<64x128xf32, #tpu.memory_space<vmem>>) attributes {dimension_semantics = [#tpu.dimension_semantics<parallel>, #tpu.dimension_semantics<parallel>], iteration_bounds = array<i64: 2, 2>, scalar_prefetch = 0 : i64, scratch_operands = 1 : i64, tpu.core_type = #tpu.core_type<tc>, window_params = [{transform_indices = @transform_0, window_bounds = array<i64: 1, 64, 128>}, {pipeline_mode = #tpu.pipeline_mode<synchronous>, transform_indices = @transform_1, window_bounds = array<i64: 64, 1>}, {pipeline_mode = #tpu.pipeline_mode<synchronous>, transform_indices = @transform_2, window_bounds = array<i64: 64, 1>}, {pipeline_mode = #tpu.pipeline_mode<synchronous>, transform_indices = @transform_3, window_bounds = array<i64: 256, 64>}, {pipeline_mode = #tpu.pipeline_mode<synchronous>, transform_indices = @transform_4, window_bounds = array<i64: 256, 1>}, {pipeline_mode = #tpu.pipeline_mode<synchronous>, transform_indices = @transform_5, window_bounds = array<i64: 64, 256>}, {pipeline_mode = #tpu.pipeline_mode<synchronous>, transform_indices = @transform_6, window_bounds = array<i64: 64, 1>}, {transform_indices = @transform_7, window_bounds = array<i64: 1, 64, 128>}]} {
    %c0 = arith.constant 0 : index
    %c0_0 = arith.constant 0 : index
    %c0_1 = arith.constant 0 : index
    %0 = vector.load %arg2[%c0, %c0_0, %c0_1] : memref<1x64x128xf32, #tpu.memory_space<vmem>>, vector<1x64x128xf32>
    %1 = vector.shape_cast %0 : vector<1x64x128xf32> to vector<64x128xf32>
    %cst = arith.constant dense<0.000000e+00> : vector<128xf32>
    %2 = vector.multi_reduction <add>, %1, %cst [0] : vector<64x128xf32> to vector<128xf32>
    %3 = vector.shape_cast %2 : vector<128xf32> to vector<1x128xf32>
    %cst_2 = arith.constant 6.400000e+01 : f32
    %4 = vector.broadcast %cst_2 : f32 to vector<1x128xf32>
    %5 = arith.divf %3, %4 : vector<1x128xf32>
    %6 = arith.mulf %1, %1 : vector<64x128xf32>
    %cst_3 = arith.constant dense<0.000000e+00> : vector<128xf32>
    %7 = vector.multi_reduction <add>, %6, %cst_3 [0] : vector<64x128xf32> to vector<128xf32>
    %8 = vector.shape_cast %7 : vector<128xf32> to vector<1x128xf32>
    %cst_4 = arith.constant 6.400000e+01 : f32
    %9 = vector.broadcast %cst_4 : f32 to vector<1x128xf32>
    %10 = arith.divf %8, %9 : vector<1x128xf32>
    %11 = arith.mulf %5, %5 : vector<1x128xf32>
    %12 = arith.subf %10, %11 : vector<1x128xf32>
    %13 = vector.broadcast %5 : vector<1x128xf32> to vector<64x128xf32>
    %14 = arith.subf %1, %13 : vector<64x128xf32>
    %cst_5 = arith.constant 9.99999974E-6 : f32
    %15 = vector.broadcast %cst_5 : f32 to vector<1x128xf32>
    %16 = arith.addf %12, %15 : vector<1x128xf32>
    %17 = math.rsqrt %16 : vector<1x128xf32>
    %18 = vector.broadcast %17 : vector<1x128xf32> to vector<64x128xf32>
    %19 = arith.mulf %14, %18 : vector<64x128xf32>
    %c0_6 = arith.constant 0 : index
    %c0_7 = arith.constant 0 : index
    %20 = vector.load %arg3[%c0_6, %c0_7] : memref<64x1xf32, #tpu.memory_space<vmem>>, vector<64x1xf32>
    %21 = vector.broadcast %20 : vector<64x1xf32> to vector<64x128xf32>
    %22 = arith.mulf %19, %21 : vector<64x128xf32>
    %c0_8 = arith.constant 0 : index
    %c0_9 = arith.constant 0 : index
    %23 = vector.load %arg4[%c0_8, %c0_9] : memref<64x1xf32, #tpu.memory_space<vmem>>, vector<64x1xf32>
    %24 = vector.broadcast %23 : vector<64x1xf32> to vector<64x128xf32>
    %25 = arith.addf %22, %24 : vector<64x128xf32>
    %26 = arith.truncf %25 : vector<64x128xf32> to vector<64x128xbf16>
    %c0_10 = arith.constant 0 : index
    %c0_11 = arith.constant 0 : index
    %27 = vector.load %arg8[%c0_10, %c0_11] : memref<64x1xf32, #tpu.memory_space<vmem>>, vector<64x1xf32>
    %28 = vector.shape_cast %27 : vector<64x1xf32> to vector<64x1xf32>
    %29 = vector.broadcast %28 : vector<64x1xf32> to vector<64x128xf32>
    %c0_12 = arith.constant 0 : index
    %c0_13 = arith.constant 0 : index
    %30 = vector.load %arg10[%c0_12, %c0_13] : memref<64x128xf32, #tpu.memory_space<vmem>>, vector<64x128xf32>
    tpu.vector_store %arg10[%c0_12, %c0_13], %29 {strides = array<i32>} : memref<64x128xf32, #tpu.memory_space<vmem>>, vector<64x128xf32>,
    %c0_14 = arith.constant 0 : index
    %c0_15 = arith.constant 0 : index
    %31 = vector.load %arg5[%c0_14, %c0_15] : memref<256x64xbf16, #tpu.memory_space<vmem>>, vector<128x64xbf16>
    %cst_16 = arith.constant dense<0.000000e+00> : vector<128x128xf32>
    %32 = tpu.matmul %31, %26, %cst_16 {dimension_numbers = #tpu.dot_dimension_numbers<[1], [0], [0], [1], [0, 0, 1, 1], [], []>} : vector<128x64xbf16>, vector<64x128xbf16>, vector<128x128xf32> -> vector<128x128xf32>
    %c0_17 = arith.constant 0 : index
    %c0_18 = arith.constant 0 : index
    %33 = vector.load %arg6[%c0_17, %c0_18] : memref<256x1xf32, #tpu.memory_space<vmem>>, vector<128x1xf32>
    %34 = vector.broadcast %33 : vector<128x1xf32> to vector<128x128xf32>
    %35 = arith.addf %32, %34 : vector<128x128xf32>
    %36 = arith.negf %35 : vector<128x128xf32>
    %37 = math.exp %36 : vector<128x128xf32>
    %cst_19 = arith.constant 1.000000e+00 : f32
    %38 = vector.broadcast %cst_19 : f32 to vector<128x128xf32>
    %39 = arith.addf %38, %37 : vector<128x128xf32>
    %40 = arith.divf %38, %39 : vector<128x128xf32>
    %41 = arith.mulf %35, %40 : vector<128x128xf32>
    %c0_20 = arith.constant 0 : index
    %c0_21 = arith.constant 0 : index
    %42 = vector.load %arg10[%c0_20, %c0_21] : memref<64x128xf32, #tpu.memory_space<vmem>>, vector<64x128xf32>
    %c0_22 = arith.constant 0 : index
    %c0_23 = arith.constant 0 : index
    %43 = vector.load %arg7[%c0_22, %c0_23] : memref<64x256xbf16, #tpu.memory_space<vmem>>, vector<64x128xbf16>
    %44 = arith.truncf %41 : vector<128x128xf32> to vector<128x128xbf16>
    %cst_24 = arith.constant dense<0.000000e+00> : vector<64x128xf32>
    %45 = tpu.matmul %43, %44, %cst_24 {dimension_numbers = #tpu.dot_dimension_numbers<[1], [0], [0], [1], [0, 0, 1, 1], [], []>} : vector<64x128xbf16>, vector<128x128xbf16>, vector<64x128xf32> -> vector<64x128xf32>
    %46 = arith.addf %42, %45 : vector<64x128xf32>
    %c0_25 = arith.constant 0 : index
    %c0_26 = arith.constant 0 : index
    %47 = vector.load %arg10[%c0_25, %c0_26] : memref<64x128xf32, #tpu.memory_space<vmem>>, vector<64x128xf32>
    tpu.vector_store %arg10[%c0_25, %c0_26], %46 {strides = array<i32>} : memref<64x128xf32, #tpu.memory_space<vmem>>, vector<64x128xf32>,
    %c128 = arith.constant 128 : index
    %c0_27 = arith.constant 0 : index
    %48 = vector.load %arg5[%c128, %c0_27] : memref<256x64xbf16, #tpu.memory_space<vmem>>, vector<128x64xbf16>
    %cst_28 = arith.constant dense<0.000000e+00> : vector<128x128xf32>
    %49 = tpu.matmul %48, %26, %cst_28 {dimension_numbers = #tpu.dot_dimension_numbers<[1], [0], [0], [1], [0, 0, 1, 1], [], []>} : vector<128x64xbf16>, vector<64x128xbf16>, vector<128x128xf32> -> vector<128x128xf32>
    %c128_29 = arith.constant 128 : index
    %c0_30 = arith.constant 0 : index
    %50 = vector.load %arg6[%c128_29, %c0_30] : memref<256x1xf32, #tpu.memory_space<vmem>>, vector<128x1xf32>
    %51 = vector.broadcast %50 : vector<128x1xf32> to vector<128x128xf32>
    %52 = arith.addf %49, %51 : vector<128x128xf32>
    %53 = arith.negf %52 : vector<128x128xf32>
    %54 = math.exp %53 : vector<128x128xf32>
    %cst_31 = arith.constant 1.000000e+00 : f32
    %55 = vector.broadcast %cst_31 : f32 to vector<128x128xf32>
    %56 = arith.addf %55, %54 : vector<128x128xf32>
    %57 = arith.divf %55, %56 : vector<128x128xf32>
    %58 = arith.mulf %52, %57 : vector<128x128xf32>
    %c0_32 = arith.constant 0 : index
    %c0_33 = arith.constant 0 : index
    %59 = vector.load %arg10[%c0_32, %c0_33] : memref<64x128xf32, #tpu.memory_space<vmem>>, vector<64x128xf32>
    %c0_34 = arith.constant 0 : index
    %c128_35 = arith.constant 128 : index
    %60 = vector.load %arg7[%c0_34, %c128_35] : memref<64x256xbf16, #tpu.memory_space<vmem>>, vector<64x128xbf16>
    %61 = arith.truncf %58 : vector<128x128xf32> to vector<128x128xbf16>
    %cst_36 = arith.constant dense<0.000000e+00> : vector<64x128xf32>
    %62 = tpu.matmul %60, %61, %cst_36 {dimension_numbers = #tpu.dot_dimension_numbers<[1], [0], [0], [1], [0, 0, 1, 1], [], []>} : vector<64x128xbf16>, vector<128x128xbf16>, vector<64x128xf32> -> vector<64x128xf32>
    %63 = arith.addf %59, %62 : vector<64x128xf32>
    %c0_37 = arith.constant 0 : index
    %c0_38 = arith.constant 0 : index
    %64 = vector.load %arg10[%c0_37, %c0_38] : memref<64x128xf32, #tpu.memory_space<vmem>>, vector<64x128xf32>
    tpu.vector_store %arg10[%c0_37, %c0_38], %63 {strides = array<i32>} : memref<64x128xf32, #tpu.memory_space<vmem>>, vector<64x128xf32>,
    %c0_39 = arith.constant 0 : index
    %c0_40 = arith.constant 0 : index
    %65 = vector.load %arg10[%c0_39, %c0_40] : memref<64x128xf32, #tpu.memory_space<vmem>>, vector<64x128xf32>
    %c0_41 = arith.constant 0 : index
    %c0_42 = arith.constant 0 : index
    %c0_43 = arith.constant 0 : index
    %66 = vector.load %arg9[%c0_41, %c0_42, %c0_43] : memref<1x64x128xf32, #tpu.memory_space<vmem>>, vector<1x64x128xf32>
    %67 = vector.shape_cast %66 : vector<1x64x128xf32> to vector<64x128xf32>
    %68 = vector.shape_cast %65 : vector<64x128xf32> to vector<1x64x128xf32>
    tpu.vector_store %arg9[%c0_41, %c0_42, %c0_43], %68 {strides = array<i32>} : memref<1x64x128xf32, #tpu.memory_space<vmem>>, vector<1x64x128xf32>,
    return
  }
  func.func @transform_0(%arg0: i32, %arg1: i32) -> (i32, i32, i32) {
    %c0_i32 = arith.constant 0 : i32
    %c0_i32_0 = arith.constant 0 : i32
    return %arg0, %c0_i32, %arg1 : i32, i32, i32
  }
  func.func @transform_1(%arg0: i32, %arg1: i32) -> (i32, i32) {
    %c0_i32 = arith.constant 0 : i32
    %c0_i32_0 = arith.constant 0 : i32
    %c0_i32_1 = arith.constant 0 : i32
    return %c0_i32, %c0_i32_0 : i32, i32
  }
  func.func @transform_2(%arg0: i32, %arg1: i32) -> (i32, i32) {
    %c0_i32 = arith.constant 0 : i32
    %c0_i32_0 = arith.constant 0 : i32
    %c0_i32_1 = arith.constant 0 : i32
    return %c0_i32, %c0_i32_0 : i32, i32
  }
  func.func @transform_3(%arg0: i32, %arg1: i32) -> (i32, i32) {
    %c0_i32 = arith.constant 0 : i32
    %c0_i32_0 = arith.constant 0 : i32
    %c0_i32_1 = arith.constant 0 : i32
    return %c0_i32, %c0_i32_0 : i32, i32
  }
  func.func @transform_4(%arg0: i32, %arg1: i32) -> (i32, i32) {
    %c0_i32 = arith.constant 0 : i32
    %c0_i32_0 = arith.constant 0 : i32
    %c0_i32_1 = arith.constant 0 : i32
    return %c0_i32, %c0_i32_0 : i32, i32
  }
  func.func @transform_5(%arg0: i32, %arg1: i32) -> (i32, i32) {
    %c0_i32 = arith.constant 0 : i32
    %c0_i32_0 = arith.constant 0 : i32
    %c0_i32_1 = arith.constant 0 : i32
    return %c0_i32, %c0_i32_0 : i32, i32
  }
  func.func @transform_6(%arg0: i32, %arg1: i32) -> (i32, i32) {
    %c0_i32 = arith.constant 0 : i32
    %c0_i32_0 = arith.constant 0 : i32
    %c0_i32_1 = arith.constant 0 : i32
    return %c0_i32, %c0_i32_0 : i32, i32
  }
  func.func @transform_7(%arg0: i32, %arg1: i32) -> (i32, i32, i32) {
    %c0_i32 = arith.constant 0 : i32
    %c0_i32_0 = arith.constant 0 : i32
    return %arg0, %c0_i32, %arg1 : i32, i32, i32
  }
}

module attributes {stable_mosaic.version = 11 : i64} {
  func.func @_ff_kernel(%arg0: i32, %arg1: i32, %arg2: memref<1x64x128xf32, #tpu.memory_space<vmem>>, %arg3: memref<64x1xf32, #tpu.memory_space<vmem>>, %arg4: memref<64x1xf32, #tpu.memory_space<vmem>>, %arg5: memref<256x64xbf16, #tpu.memory_space<vmem>>, %arg6: memref<256x1xf32, #tpu.memory_space<vmem>>, %arg7: memref<64x256xbf16, #tpu.memory_space<vmem>>, %arg8: memref<64x1xf32, #tpu.memory_space<vmem>>, %arg9: memref<1x64x128xf32, #tpu.memory_space<vmem>>, %arg10: memref<64x128xf32, #tpu.memory_space<vmem>>) attributes {dimension_semantics = [#tpu.dimension_semantics<parallel>, #tpu.dimension_semantics<parallel>], iteration_bounds = array<i64: 2, 2>, scalar_prefetch = 0 : i64, scratch_operands = 1 : i64, tpu.core_type = #tpu.core_type<tc>, window_params = [{transform_indices = @transform_0, window_bounds = array<i64: 1, 64, 128>}, {pipeline_mode = #tpu.pipeline_mode<synchronous>, transform_indices = @transform_1, window_bounds = array<i64: 64, 1>}, {pipeline_mode = #tpu.pipeline_mode<synchronous>, transform_indices = @transform_2, window_bounds = array<i64: 64, 1>}, {pipeline_mode = #tpu.pipeline_mode<synchronous>, transform_indices = @transform_3, window_bounds = array<i64: 256, 64>}, {pipeline_mode = #tpu.pipeline_mode<synchronous>, transform_indices = @transform_4, window_bounds = array<i64: 256, 1>}, {pipeline_mode = #tpu.pipeline_mode<synchronous>, transform_indices = @transform_5, window_bounds = array<i64: 64, 256>}, {pipeline_mode = #tpu.pipeline_mode<synchronous>, transform_indices = @transform_6, window_bounds = array<i64: 64, 1>}, {transform_indices = @transform_7, window_bounds = array<i64: 1, 64, 128>}]} {
    %c0 = arith.constant 0 : index
    %c0_0 = arith.constant 0 : index
    %c0_1 = arith.constant 0 : index
    %0 = vector.load %arg2[%c0, %c0_0, %c0_1] : memref<1x64x128xf32, #tpu.memory_space<vmem>>, vector<1x64x128xf32>
    %1 = vector.shape_cast %0 : vector<1x64x128xf32> to vector<64x128xf32>
    %cst = arith.constant dense<0.000000e+00> : vector<128xf32>
    %2 = vector.multi_reduction <add>, %1, %cst [0] : vector<64x128xf32> to vector<128xf32>
    %3 = vector.shape_cast %2 : vector<128xf32> to vector<1x128xf32>
    %cst_2 = arith.constant 6.400000e+01 : f32
    %4 = vector.broadcast %cst_2 : f32 to vector<1x128xf32>
    %5 = arith.divf %3, %4 : vector<1x128xf32>
    %6 = arith.mulf %1, %1 : vector<64x128xf32>
    %cst_3 = arith.constant dense<0.000000e+00> : vector<128xf32>
    %7 = vector.multi_reduction <add>, %6, %cst_3 [0] : vector<64x128xf32> to vector<128xf32>
    %8 = vector.shape_cast %7 : vector<128xf32> to vector<1x128xf32>
    %cst_4 = arith.constant 6.400000e+01 : f32
    %9 = vector.broadcast %cst_4 : f32 to vector<1x128xf32>
    %10 = arith.divf %8, %9 : vector<1x128xf32>
    %11 = arith.mulf %5, %5 : vector<1x128xf32>
    %12 = arith.subf %10, %11 : vector<1x128xf32>
    %13 = vector.broadcast %5 : vector<1x128xf32> to vector<64x128xf32>
    %14 = arith.subf %1, %13 : vector<64x128xf32>
    %cst_5 = arith.constant 9.99999974E-6 : f32
    %15 = vector.broadcast %cst_5 : f32 to vector<1x128xf32>
    %16 = arith.addf %12, %15 : vector<1x128xf32>
    %17 = math.rsqrt %16 : vector<1x128xf32>
    %18 = vector.broadcast %17 : vector<1x128xf32> to vector<64x128xf32>
    %19 = arith.mulf %14, %18 : vector<64x128xf32>
    %c0_6 = arith.constant 0 : index
    %c0_7 = arith.constant 0 : index
    %20 = vector.load %arg3[%c0_6, %c0_7] : memref<64x1xf32, #tpu.memory_space<vmem>>, vector<64x1xf32>
    %21 = vector.broadcast %20 : vector<64x1xf32> to vector<64x128xf32>
    %22 = arith.mulf %19, %21 : vector<64x128xf32>
    %c0_8 = arith.constant 0 : index
    %c0_9 = arith.constant 0 : index
    %23 = vector.load %arg4[%c0_8, %c0_9] : memref<64x1xf32, #tpu.memory_space<vmem>>, vector<64x1xf32>
    %24 = vector.broadcast %23 : vector<64x1xf32> to vector<64x128xf32>
    %25 = arith.addf %22, %24 : vector<64x128xf32>
    %26 = arith.truncf %25 : vector<64x128xf32> to vector<64x128xbf16>
    %c0_10 = arith.constant 0 : index
    %c0_11 = arith.constant 0 : index
    %27 = vector.load %arg8[%c0_10, %c0_11] : memref<64x1xf32, #tpu.memory_space<vmem>>, vector<64x1xf32>
    %28 = vector.shape_cast %27 : vector<64x1xf32> to vector<64x1xf32>
    %29 = vector.broadcast %28 : vector<64x1xf32> to vector<64x128xf32>
    %c0_12 = arith.constant 0 : index
    %c0_13 = arith.constant 0 : index
    %30 = vector.load %arg10[%c0_12, %c0_13] : memref<64x128xf32, #tpu.memory_space<vmem>>, vector<64x128xf32>
    tpu.vector_store %arg10[%c0_12, %c0_13], %29 {strides = array<i32>} : memref<64x128xf32, #tpu.memory_space<vmem>>, vector<64x128xf32>,
    %c0_14 = arith.constant 0 : index
    %c0_15 = arith.constant 0 : index
    %31 = vector.load %arg5[%c0_14, %c0_15] : memref<256x64xbf16, #tpu.memory_space<vmem>>, vector<128x64xbf16>
    %cst_16 = arith.constant dense<0.000000e+00> : vector<128x128xf32>
    %32 = tpu.matmul %31, %26, %cst_16 {dimension_numbers = #tpu.dot_dimension_numbers<[1], [0], [0], [1], [0, 0, 1, 1], [], []>} : vector<128x64xbf16>, vector<64x128xbf16>, vector<128x128xf32> -> vector<128x128xf32>
    %c0_17 = arith.constant 0 : index
    %c0_18 = arith.constant 0 : index
    %33 = vector.load %arg6[%c0_17, %c0_18] : memref<256x1xf32, #tpu.memory_space<vmem>>, vector<128x1xf32>
    %34 = vector.broadcast %33 : vector<128x1xf32> to vector<128x128xf32>
    %35 = arith.addf %32, %34 : vector<128x128xf32>
    %36 = arith.negf %35 : vector<128x128xf32>
    %37 = math.exp %36 : vector<128x128xf32>
    %cst_19 = arith.constant 1.000000e+00 : f32
    %38 = vector.broadcast %cst_19 : f32 to vector<128x128xf32>
    %39 = arith.addf %38, %37 : vector<128x128xf32>
    %40 = arith.divf %38, %39 : vector<128x128xf32>
    %41 = arith.mulf %35, %40 : vector<128x128xf32>
    %c0_20 = arith.constant 0 : index
    %c0_21 = arith.constant 0 : index
    %42 = vector.load %arg10[%c0_20, %c0_21] : memref<64x128xf32, #tpu.memory_space<vmem>>, vector<64x128xf32>
    %c0_22 = arith.constant 0 : index
    %c0_23 = arith.constant 0 : index
    %43 = vector.load %arg7[%c0_22, %c0_23] : memref<64x256xbf16, #tpu.memory_space<vmem>>, vector<64x128xbf16>
    %44 = arith.truncf %41 : vector<128x128xf32> to vector<128x128xbf16>
    %cst_24 = arith.constant dense<0.000000e+00> : vector<64x128xf32>
    %45 = tpu.matmul %43, %44, %cst_24 {dimension_numbers = #tpu.dot_dimension_numbers<[1], [0], [0], [1], [0, 0, 1, 1], [], []>} : vector<64x128xbf16>, vector<128x128xbf16>, vector<64x128xf32> -> vector<64x128xf32>
    %46 = arith.addf %42, %45 : vector<64x128xf32>
    %c0_25 = arith.constant 0 : index
    %c0_26 = arith.constant 0 : index
    %47 = vector.load %arg10[%c0_25, %c0_26] : memref<64x128xf32, #tpu.memory_space<vmem>>, vector<64x128xf32>
    tpu.vector_store %arg10[%c0_25, %c0_26], %46 {strides = array<i32>} : memref<64x128xf32, #tpu.memory_space<vmem>>, vector<64x128xf32>,
    %c128 = arith.constant 128 : index
    %c0_27 = arith.constant 0 : index
    %48 = vector.load %arg5[%c128, %c0_27] : memref<256x64xbf16, #tpu.memory_space<vmem>>, vector<128x64xbf16>
    %cst_28 = arith.constant dense<0.000000e+00> : vector<128x128xf32>
    %49 = tpu.matmul %48, %26, %cst_28 {dimension_numbers = #tpu.dot_dimension_numbers<[1], [0], [0], [1], [0, 0, 1, 1], [], []>} : vector<128x64xbf16>, vector<64x128xbf16>, vector<128x128xf32> -> vector<128x128xf32>
    %c128_29 = arith.constant 128 : index
    %c0_30 = arith.constant 0 : index
    %50 = vector.load %arg6[%c128_29, %c0_30] : memref<256x1xf32, #tpu.memory_space<vmem>>, vector<128x1xf32>
    %51 = vector.broadcast %50 : vector<128x1xf32> to vector<128x128xf32>
    %52 = arith.addf %49, %51 : vector<128x128xf32>
    %53 = arith.negf %52 : vector<128x128xf32>
    %54 = math.exp %53 : vector<128x128xf32>
    %cst_31 = arith.constant 1.000000e+00 : f32
    %55 = vector.broadcast %cst_31 : f32 to vector<128x128xf32>
    %56 = arith.addf %55, %54 : vector<128x128xf32>
    %57 = arith.divf %55, %56 : vector<128x128xf32>
    %58 = arith.mulf %52, %57 : vector<128x128xf32>
    %c0_32 = arith.constant 0 : index
    %c0_33 = arith.constant 0 : index
    %59 = vector.load %arg10[%c0_32, %c0_33] : memref<64x128xf32, #tpu.memory_space<vmem>>, vector<64x128xf32>
    %c0_34 = arith.constant 0 : index
    %c128_35 = arith.constant 128 : index
    %60 = vector.load %arg7[%c0_34, %c128_35] : memref<64x256xbf16, #tpu.memory_space<vmem>>, vector<64x128xbf16>
    %61 = arith.truncf %58 : vector<128x128xf32> to vector<128x128xbf16>
    %cst_36 = arith.constant dense<0.000000e+00> : vector<64x128xf32>
    %62 = tpu.matmul %60, %61, %cst_36 {dimension_numbers = #tpu.dot_dimension_numbers<[1], [0], [0], [1], [0, 0, 1, 1], [], []>} : vector<64x128xbf16>, vector<128x128xbf16>, vector<64x128xf32> -> vector<64x128xf32>
    %63 = arith.addf %59, %62 : vector<64x128xf32>
    %c0_37 = arith.constant 0 : index
    %c0_38 = arith.constant 0 : index
    %64 = vector.load %arg10[%c0_37, %c0_38] : memref<64x128xf32, #tpu.memory_space<vmem>>, vector<64x128xf32>
    tpu.vector_store %arg10[%c0_37, %c0_38], %63 {strides = array<i32>} : memref<64x128xf32, #tpu.memory_space<vmem>>, vector<64x128xf32>,
    %c0_39 = arith.constant 0 : index
    %c0_40 = arith.constant 0 : index
    %65 = vector.load %arg10[%c0_39, %c0_40] : memref<64x128xf32, #tpu.memory_space<vmem>>, vector<64x128xf32>
    %c0_41 = arith.constant 0 : index
    %c0_42 = arith.constant 0 : index
    %c0_43 = arith.constant 0 : index
    %66 = vector.load %arg9[%c0_41, %c0_42, %c0_43] : memref<1x64x128xf32, #tpu.memory_space<vmem>>, vector<1x64x128xf32>
    %67 = vector.shape_cast %66 : vector<1x64x128xf32> to vector<64x128xf32>
    %68 = vector.shape_cast %65 : vector<64x128xf32> to vector<1x64x128xf32>
    tpu.vector_store %arg9[%c0_41, %c0_42, %c0_43], %68 {strides = array<i32>} : memref<1x64x128xf32, #tpu.memory_space<vmem>>, vector<1x64x128xf32>,
    return
  }
  func.func @transform_0(%arg0: i32, %arg1: i32) -> (i32, i32, i32) {
    %c0_i32 = arith.constant 0 : i32
    %c0_i32_0 = arith.constant 0 : i32
    return %arg0, %c0_i32, %arg1 : i32, i32, i32
  }
  func.func @transform_1(%arg0: i32, %arg1: i32) -> (i32, i32) {
    %c0_i32 = arith.constant 0 : i32
    %c0_i32_0 = arith.constant 0 : i32
    %c0_i32_1 = arith.constant 0 : i32
    return %c0_i32, %c0_i32_0 : i32, i32
  }
  func.func @transform_2(%arg0: i32, %arg1: i32) -> (i32, i32) {
    %c0_i32 = arith.constant 0 : i32
    %c0_i32_0 = arith.constant 0 : i32
    %c0_i32_1 = arith.constant 0 : i32
    return %c0_i32, %c0_i32_0 : i32, i32
  }
  func.func @transform_3(%arg0: i32, %arg1: i32) -> (i32, i32) {
    %c0_i32 = arith.constant 0 : i32
    %c0_i32_0 = arith.constant 0 : i32
    %c0_i32_1 = arith.constant 0 : i32
    return %c0_i32, %c0_i32_0 : i32, i32
  }
  func.func @transform_4(%arg0: i32, %arg1: i32) -> (i32, i32) {
    %c0_i32 = arith.constant 0 : i32
    %c0_i32_0 = arith.constant 0 : i32
    %c0_i32_1 = arith.constant 0 : i32
    return %c0_i32, %c0_i32_0 : i32, i32
  }
  func.func @transform_5(%arg0: i32, %arg1: i32) -> (i32, i32) {
    %c0_i32 = arith.constant 0 : i32
    %c0_i32_0 = arith.constant 0 : i32
    %c0_i32_1 = arith.constant 0 : i32
    return %c0_i32, %c0_i32_0 : i32, i32
  }
  func.func @transform_6(%arg0: i32, %arg1: i32) -> (i32, i32) {
    %c0_i32 = arith.constant 0 : i32
    %c0_i32_0 = arith.constant 0 : i32
    %c0_i32_1 = arith.constant 0 : i32
    return %c0_i32, %c0_i32_0 : i32, i32
  }
  func.func @transform_7(%arg0: i32, %arg1: i32) -> (i32, i32, i32) {
    %c0_i32 = arith.constant 0 : i32
    %c0_i32_0 = arith.constant 0 : i32
    return %arg0, %c0_i32, %arg1 : i32, i32, i32
  }
}

</mosaic_0001>

<bundles_post_ra>
// kernel: tpu_custom_call.1
= control target key start
LH: loop header
LB: loop body
LE: loop exit
PB: predicated region body
PF: predicated region fallthrough
CT: control target
= control target key end

     0   :  { %12 = vsyncpa [#allocation5], 0  ;;  %s4335_s0 = inlined_call_operand.vmem [shape: f32[2,64,200], index: 0, kind: input, shape index: {}]   ;;  %s4336_s1 = inlined_call_operand.vmem [shape: f32[64,1], index: 1, kind: input, shape index: {}]   ;;  %s4337_s2 = inlined_call_operand.vmem [shape: f32[64,1], index: 2, kind: input, shape index: {}]   ;;  %s4338_s3 = inlined_call_operand.vmem [shape: bf16[256,64], index: 3, kind: input, shape index: {}]   ;;  %s4339_s4 = inlined_call_operand.vmem [shape: f32[256,1], index: 4, kind: input, shape index: {}]   ;;  %s4340_s5 = inlined_call_operand.vmem [shape: bf16[64,256], index: 5, kind: input, shape index: {}]   ;;  %s4341_s6 = inlined_call_operand.vmem [shape: f32[64,1], index: 6, kind: input, shape index: {}]   ;;  %s4342_s7 = inlined_call_operand.hbm [shape: f32[2,64,200], index: 7, kind: output, shape index: {}]  }
   0x1   :  { %14 = vsyncpa [#allocation5 + $0x1], 0  ;;  %s2539_s24 = smov 0   ;;  %s2541_s25 = smov 0  }
   0x2   :  { %s2543_s26 = smov 0   ;;  %s2545_s27 = smov 0  }
   0x3   :  { %s2547_s28 = smov 0   ;;  %s2549_s29 = smov 0  }
   0x4   :  { %s2551_s30 = smov 0   ;;  %s2553_s8 = smov 0  }
   0x5 LB: > { %s2004_s9 = sadd.s32 4294967295, %s2492_s8   ;;  %s2005_s10 = sadd.s32 4294967294, %s2492_s8   ;;  %s2492_s8 = sphi %s2553_s8, %s20_s8   ;;  %s2488_s30 = sphi %s2551_s30, %s4660_s30   ;;  %s2484_s29 = sphi %s2549_s29, %s4659_s29   ;;  %s2480_s28 = sphi %s2547_s28, %s4658_s28   ;;  %s2476_s27 = sphi %s2545_s27, %s4657_s27   ;;  %s2472_s26 = sphi %s2543_s26, %s4656_s26   ;;  %s2468_s25 = sphi %s2541_s25, %s4655_s25   ;;  %s2464_s24 = sphi %s2539_s24, %s4654_s24  }
   0x6   : > { %s29_s11 = sadd.s32 1, %s2484_s29  ;;  %s32_s12 = sadd.s32 1, %s2488_s30 }
   0x7   : > { %p30_p0 = scmp.ge.s32.totalorder %s29_s11, 2  ;;  %p48_p1 = scmp.ne.s32.totalorder %s2472_s26, %s2468_s25 }
   0x8   : > { %p49_p2 = scmp.eq.s32.totalorder %s2492_s8, 0  ;;  %p206_p5 = scmp.eq.s32.totalorder %s2004_s9, 3 }
   0x9   : > { %s4662_s11 = smov (%p30_p0, %s29_s11), 0  ;;  %s4664_s12 = smov (!%p30_p0, %s32_s12), %s2488_s30 }
   0xa   : > { %s37_s13 = ssub.s32 %s2484_s29, %s4662_s11  ;;  %p2591_p3 = por %p49_p2, %p48_p1 }
   0xb   : > { %p34_p4 = scmp.ge.s32.totalorder %s4664_s12, 2  ;;  %p211_p6 = scmp.ne.s32.totalorder %s2468_s25, %s2464_s24 }
   0xc   : > { %p212_p7 = scmp.eq.s32.totalorder %s2005_s10, 3  ;;  %p2599_p8 = por %p206_p5, %p48_p1 }
   0xd   : > { %s4666_s12 = smov (%p34_p4, %s4664_s12), 0  ;;  %s41_s19 = sadd.s32 1, %s2472_s26 }
   0xe   : > { %4388 = sst [smem:[#allocation7_spill]] %s4666_s12  ;;  %p2603_p9 = por %p212_p7, %p211_p6 }
   0xf   : > { %s36_s17 = ssub.s32 %s2488_s30, %s4666_s12  ;;  %p2007_p11 = scmp.ge.s32.totalorder %s2492_s8, 4 }
  0x10   : > { %s38_s18 = sor.u32 %s37_s13, %s36_s17 }
  0x11   : > { %p39_p10 = scmp.eq.s32.totalorder %s38_s18, 0  ;;  %246 = sbr.rel (%p2007_p11) target bundleno = 36 (0x24), region = 40 }
  0x13   : > { %s2611_s20 = scalar_select %p39_p10, %s2472_s26, %s41_s19  }
  0x16   : > { %249 = sbr.rel (!%p2591_p3) target bundleno = 36 (0x24), region = 44  ;;  %s251_s21 = sand.u32 (%p2591_p3), 1, %s2472_s26  }
  0x17   : > { %s2009_s22 = sshll.u32 (%p2591_p3), %s2488_s30, 4  ;;  %s2008_s23 = sshll.u32 (%p2591_p3), %s251_s21, 6 }
  0x18   : > { %s255_s9 = sadd.s32 (%p2591_p3), %s2484_s29, %s2009_s22  ;;  %s253_s18 = scalar_lea.vmem (%p2591_p3), [#allocation3], %s2008_s23 }
  0x19   : > { %s2010_s10 = sshll.u32 (%p2591_p3), %s255_s9, 3 }
  0x1a   : > { %s257_s17 = scalar_lea.vmem (%p2591_p3), %s4335_s0, %s2010_s10 }
  0x1b   : > { %v300_v0 = vld [vmem:[%s257_s17] sm:$0xff]  ;;  %v302_v1 = vld [vmem:[%s257_s17 + $0x10] sm:$0xff] }
  0x1c   : > { %v304_v2 = vld [vmem:[%s257_s17 + $0x20] sm:$0xff]  ;;  %301 = vst [vmem:[%s253_s18] sm:$0xff] %v300_v0  ;;  %v306_v3 = vld [vmem:[%s257_s17 + $0x30] sm:$0xff] }
  0x1d   : > { %303 = vst [vmem:[%s253_s18 + $0x8] sm:$0xff] %v302_v1  ;;  %v308_v4 = vld [vmem:[%s257_s17 + $0x40] sm:$0xff]  ;;  %v310_v5 = vld [vmem:[%s257_s17 + $0x50] sm:$0xff] }
  0x1e   : > { %305 = vst [vmem:[%s253_s18 + $0x10] sm:$0xff] %v304_v2  ;;  %v312_v6 = vld [vmem:[%s257_s17 + $0x60] sm:$0xff]  ;;  %v314_v7 = vld [vmem:[%s257_s17 + $0x70] sm:$0xff] }
  0x1f   : > { %307 = vst [vmem:[%s253_s18 + $0x18] sm:$0xff] %v306_v3 }
  0x20   : > { %309 = vst [vmem:[%s253_s18 + $0x20] sm:$0xff] %v308_v4 }
  0x21   : > { %311 = vst [vmem:[%s253_s18 + $0x28] sm:$0xff] %v310_v5 }
  0x22   : > { %313 = vst [vmem:[%s253_s18 + $0x30] sm:$0xff] %v312_v6 }
  0x23   : > { %315 = vst [vmem:[%s253_s18 + $0x38] sm:$0xff] %v314_v7 }
  0x24 PF: > { %p2011_p12 = scmp.ge.s32.totalorder %s2492_s8, 1  ;;  %p320_p13 = scmp.lt.s32.totalorder %s2492_s8, 5 }
  0x26   : > { %p321_p0 = pnand %p2011_p12, %p320_p13 }
  0x28   : > { %324 = sbr.rel (%p321_p0) target bundleno = 731 (0x2db), region = 82 }
  0x2d   : > { %v501_v8 = vld [vmem:[%s4337_s2 + $0x30] sm:$0xff]  ;;  %v443_v10 = vld [vmem:[%s4336_s1 + $0x20] sm:$0xff]  ;;  %v2494_v11 = vmov 0   ;;  %v502_v12 = vld [vmem:[%s4337_s2 + $0x38] sm:$0xff]  ;;  %s4386_s10 = sand.u32 1, %s2468_s25   ;;  %v2495_v54 = vmov 64.0  }
  0x2e   : > { %v445_v9 = vld [vmem:[%s4336_s1 + $0x30] sm:$0xff]  ;;  %2265 = vset.pattern.permute.xlu2 %v2494_v11  ;;  %2264 = vset.pattern.permute.xlu1 %v2494_v11  ;;  %v446_v13 = vld [vmem:[%s4336_s1 + $0x38] sm:$0xff]  ;;  %v444_v14 = vld [vmem:[%s4336_s1 + $0x28] sm:$0xff]  ;;  %s2663_s21 = sshll.u32 %s4386_s10, 6  ;;  %2266 = vrcp.f32 %v2495_v54  ;;  %vm763_vm4 = vcmask 523264  }
  0x2f   : > { %2263 = vset.pattern.permute.xlu0 %v2494_v11  ;;  %535 = vperm.xlu1 %2264, %v501_v8   ;;  %v500_v15 = vld [vmem:[%s4337_s2 + $0x28] sm:$0xff]  ;;  %v499_v16 = vld [vmem:[%s4337_s2 + $0x20] sm:$0xff]  ;;  %v441_v17 = vld [vmem:[%s4336_s1 + $0x10] sm:$0xff]  ;;  %s2669_s9 = scalar_lea.vmem [#allocation3], %s2663_s21  ;;  %s4279_s19 = scalar_lea.vmem [#allocation4], %s2663_s21 }
  0x30   : > { %479 = vperm.xlu0 %2263, %v445_v9   ;;  %469 = vperm.xlu2 %2265, %v443_v10   ;;  %v497_v18 = vld [vmem:[%s4337_s2 + $0x10] sm:$0xff]  ;;  %v442_v19 = vld [vmem:[%s4336_s1 + $0x18] sm:$0xff]  ;;  %v440_v21 = vld [vmem:[%s4336_s1 + $0x8] sm:$0xff]  ;;  %s2159_s21 = sshll.u32 %s2480_s28, 4  ;;  %s1918_s17 = sshll.u32 %s4279_s19, 4  ;;  %s1919_s17 = int_to_ptr.vmem [resolvable:$true] %s1918_s17 }
  0x31   : > { %v498_v20 = vld [vmem:[%s4337_s2 + $0x18] sm:$0xff]  ;;  %v2672_v22 = vld [vmem:[%s2669_s9] sm:$0xff]  ;;  %v2675_v23 = vld [vmem:[%s2669_s9 + $0x8] sm:$0xff]  ;;  %s1915_s22 = sadd.s32 %s2476_s27, %s2159_s21  ;;  %s4652_s27 = sand.u32 1, %s2468_s25  }
  0x32   : > { %v495_v24 = vld [vmem:[%s4337_s2] sm:$0xff]  ;;  %v367_v26 = vadd.f32 %v2675_v23, %v2672_v22  ;;  %v388_v27 = vmul.f32 %v2672_v22, %v2672_v22  ;;  %v389_v28 = vmul.f32 %v2675_v23, %v2675_v23  ;;  %v2690_v29 = vld [vmem:[%s2669_s9 + $0x10] sm:$0xff]  ;;  %v2696_v33 = vld [vmem:[%s2669_s9 + $0x18] sm:$0xff]  ;;  %s2160_s23 = sshll.u32 %s1915_s22, 3  ;;  %s1905_s28 = scalar_lea.sflag [#allocation5], %s4652_s27 }
  0x33   : > { %v439_v25 = vld [vmem:[%s4336_s1] sm:$0xff]  ;;  %v390_v31 = vmul.f32 %v2690_v29, %v2690_v29  ;;  %v391_v35 = vmul.f32 %v2696_v33, %v2696_v33  ;;  %v1280_v41 = vld [vmem:[%s4339_s4 + $0xf0] sm:$0xff]  ;;  %v2711_v42 = vld [vmem:[%s2669_s9 + $0x28] sm:$0xff]  ;;  %s1917_s13 = scalar_lea.hbm %s4342_s7, %s2160_s23  ;;  %s2418_s23 = scalar_lea.hbm %s4342_s7, 256 }
  0x34   : > { %v368_v30 = vadd.f32 %v367_v26, %v2690_v29  ;;  %v396_v32 = vadd.f32 %v389_v28, %v388_v27  ;;  %v2702_v37 = vld [vmem:[%s2669_s9 + $0x20] sm:$0xff]  ;;  %v1281_v43 = vld [vmem:[%s4339_s4 + $0xf8] sm:$0xff]  ;;  %v496_v44 = vld [vmem:[%s4337_s2 + $0x8] sm:$0xff]  ;;  %v393_v46 = vmul.f32 %v2711_v42, %v2711_v42  ;;  %v2267_v62 = vpop.eup %2266  ;;  %s1920_s18 = sshll.u32 %s1917_s13, 4  ;;  %s1921_s18 = int_to_ptr.hbm [resolvable:$true] %s1920_s18 }
  0x35   : > { %v392_v39 = vmul.f32 %v2702_v37, %v2702_v37  ;;  %v2723_v48 = vld [vmem:[%s2669_s9 + $0x30] sm:$0xff]  ;;  %v2729_v52 = vld [vmem:[%s2669_s9 + $0x38] sm:$0xff]  ;;  %v1278_v58 = vld [vmem:[%s4339_s4 + $0xe0] sm:$0xff]  ;;  %v381_v1 = vmul.f32 64.0, %v2267_v62  ;;  %vm385_vm0 = vweird.f32 %v2267_v62  ;;  %s2412_s12 = sshra.s32 %s1921_s18, 4  ;;  %s2413_s12 = int_to_ptr.hbm [resolvable:$true] %s2412_s12 }
  0x36   : > { %v369_v34 = vadd.f32 %v368_v30, %v2696_v33  ;;  %v397_v36 = vadd.f32 %v396_v32, %v390_v31  ;;  %v394_v50 = vmul.f32 %v2723_v48, %v2723_v48  ;;  %v395_v55 = vmul.f32 %v2729_v52, %v2729_v52  ;;  %v642_v57 = vld [vmem:[%s4339_s4 + $0x78] sm:$0xff]  ;;  %v641_v59 = vld [vmem:[%s4339_s4 + $0x70] sm:$0xff]  ;;  %v639_v2 = vld [vmem:[%s4339_s4 + $0x60] sm:$0xff]  ;;  %s2414_s14 = scalar_lea.hbm %s2413_s12, 64  ;;  %p2419_p4 = scmp.lt.s32.totalorder %s2413_s12, %s4342_s7 }
  0x37   : > { %540 = vperm.xlu1 %2264, %v502_v12   ;;  %v640_v3 = vld [vmem:[%s4339_s4 + $0x68] sm:$0xff]  ;;  %v382_v7 = vsub.f32 1.0, %v381_v1  ;;  %v1277_v11 = vld [vmem:[%s4339_s4 + $0xd8] sm:$0xff]  ;;  %v637_v12 = vld [vmem:[%s4339_s4 + $0x50] sm:$0xff]  ;;  %p2415_p1 = scmp.ne.s32.totalorder %s2413_s12, %s2414_s14  ;;  %p2420_p5 = scmp.lt.s32.totalorder %s2418_s23, %s2414_s14 }
  0x38   : > { %484 = vperm.xlu0 %2263, %v446_v13   ;;  %474 = vperm.xlu2 %2265, %v444_v14   ;;  %v370_v38 = vadd.f32 %v369_v34, %v2702_v37  ;;  %v398_v40 = vadd.f32 %v397_v36, %v391_v35  ;;  %v1279_v4 = vld [vmem:[%s4339_s4 + $0xe8] sm:$0xff]  ;;  %v1276_v13 = vld [vmem:[%s4339_s4 + $0xd0] sm:$0xff]  ;;  %v635_v32 = vld [vmem:[%s4339_s4 + $0x40] sm:$0xff] }
  0x39   : > { %v383_v10 = vmul.f32 %v2267_v62, %v382_v7  ;;  %v636_v30 = vld [vmem:[%s4339_s4 + $0x48] sm:$0xff]  ;;  %v1272_v31 = vld [vmem:[%s4339_s4 + $0xb0] sm:$0xff]  ;;  %v630_v54 = vld [vmem:[%s4339_s4 + $0x18] sm:$0xff]  ;;  %p2416_p2 = pnand %p2415_p1, %p2599_p8  ;;  %p2421_p6 = por %p2420_p5, %p2419_p4 }
  0x3a   : > { %v371_v45 = vadd.f32 %v370_v38, %v2711_v42  ;;  %v399_v47 = vadd.f32 %v398_v40, %v392_v39  ;;  %v633_v36 = vld [vmem:[%s4339_s4 + $0x30] sm:$0xff]  ;;  %v634_v38 = vld [vmem:[%s4339_s4 + $0x38] sm:$0xff] }
  0x3b   : > { %v1273_v39 = vld [vmem:[%s4339_s4 + $0xb8] sm:$0xff]  ;;  %p2417_p3 = pneg %p2416_p2 }
  0x3c   : > { %v372_v49 = vadd.f32 %v371_v45, %v2723_v48  ;;  %v400_v51 = vadd.f32 %v399_v47, %v393_v46  ;;  %v1268_v47 = vld [vmem:[%s4339_s4 + $0x90] sm:$0xff] }
  0x3d   : > { %p2422_p7 = pnand %p2421_p6, %p2417_p3 }
  0x3e   : > { %v373_v53 = vadd.f32 %v372_v49, %v2729_v52  ;;  %v401_v56 = vadd.f32 %v400_v51, %v394_v50  ;;  %v1269_v49 = vld [vmem:[%s4339_s4 + $0x98] sm:$0xff]  ;;  %v632_v50 = vld [vmem:[%s4339_s4 + $0x28] sm:$0xff] }
  0x3f   : > { %530 = vperm.xlu1 %2264, %v500_v15  }
  0x40   : > { %525 = vperm.xlu0 %2263, %v499_v16   ;;  %459 = vperm.xlu2 %2265, %v441_v17   ;;  %v374_v60 = vrot.slane %v373_v53, 4  ;;  %v402_v61 = vadd.f32 %v401_v56, %v395_v55  ;;  %v384_v16 = vadd.f32 %v2267_v62, %v383_v10  ;;  %v1266_v55 = vld [vmem:[%s4339_s4 + $0x80] sm:$0xff]  ;;  %v629_v56 = vld [vmem:[%s4339_s4 + $0x10] sm:$0xff] }
  0x42   : > { %v375_v63 = vadd.f32 %v374_v60, %v373_v53  ;;  %v403_v0 = vrot.slane %v402_v61, 4 }
  0x44   : > { %v376_v5 = vrot.slane %v375_v63, 2  ;;  %v404_v6 = vadd.f32 %v403_v0, %v402_v61  ;;  %v627_v0 = vld [vmem:[%s4339_s4] sm:$0xff] }
  0x46   : > { %v377_v8 = vadd.f32 %v376_v5, %v375_v63  ;;  %v405_v9 = vrot.slane %v404_v6, 2 }
  0x47   : > { %515 = vperm.xlu1 %2264, %v497_v18  }
  0x48   : > { %464 = vperm.xlu0 %2263, %v442_v19   ;;  %520 = vperm.xlu2 %2265, %v498_v20   ;;  %v378_v14 = vrot.slane %v377_v8, 1  ;;  %v406_v15 = vadd.f32 %v405_v9, %v404_v6  ;;  %v386_v19 = vsel %vm385_vm0, %v2267_v62, %v384_v16  ;;  %v1274_v20 = vld [vmem:[%s4339_s4 + $0xc0] sm:$0xff] }
  0x4a   : > { %v379_v17 = vadd.f32 %v378_v14, %v377_v8  ;;  %v407_v18 = vrot.slane %v406_v15, 1 }
  0x4c   : > { %v408_v26 = vadd.f32 %v407_v18, %v406_v15 }
  0x4e   : > { %v409_v27 = vmul.f32 %v408_v26, %v386_v19 }
  0x4f   : > { %454 = vperm.xlu1 %2264, %v440_v21   ;;  %v1275_v21 = vld [vmem:[%s4339_s4 + $0xc8] sm:$0xff] }
  0x50   : > { %505 = vperm.xlu2 %2265, %v495_v24   ;;  %449 = vperm.xlu0 %2263, %v439_v25   ;;  %v638_v24 = vld [vmem:[%s4339_s4 + $0x58] sm:$0xff]  ;;  %v2770_v25 = vmul.f32 %v386_v19, %v379_v17 }
  0x52   : > { %v410_v28 = vmul.f32 %v2770_v25, %v2770_v25  ;;  %v418_v60 = vsub.f32 %v2723_v48, %v2770_v25  ;;  %v419_v63 = vsub.f32 %v2729_v52, %v2770_v25  ;;  %v1267_v48 = vld [vmem:[%s4339_s4 + $0x88] sm:$0xff]  ;;  %v417_v52 = vsub.f32 %v2711_v42, %v2770_v25  ;;  %v557_v42 = vld [vmem:[%s4341_s6 + $0x10] sm:$0xff] }
  0x53   : > { %v416_v5 = vsub.f32 %v2702_v37, %v2770_v25  ;;  %v555_v37 = vld [vmem:[%s4341_s6] sm:$0xff] }
  0x54   : > { %v411_v34 = vsub.f32 %v409_v27, %v410_v28  ;;  %v415_v27 = vsub.f32 %v2696_v33, %v2770_v25 }
  0x56   : > { %v420_v35 = vadd.f32 1e-05, %v411_v34 }
  0x57   : > { %1354 = vperm.xlu1 %2264, %v1280_v41   ;;  %v1271_v41 = vld [vmem:[%s4339_s4 + $0xa8] sm:$0xff] }
  0x58   : > { %1359 = vperm.xlu2 %2265, %v1281_v43   ;;  %510 = vperm.xlu0 %2263, %v496_v44   ;;  %2268 = vrsqrt.f32 %v420_v35  ;;  %v631_v43 = vld [vmem:[%s4339_s4 + $0x20] sm:$0xff]  ;;  %vm427_vm1 = vweird.f32 %v420_v35 }
  0x59   : > { %v1270_v44 = vld [vmem:[%s4339_s4 + $0xa0] sm:$0xff] }
  0x5e   : > { %v2269_v40 = vpop.eup %2268 }
  0x5f   : > { %720 = vperm.xlu1 %2264, %v642_v57   ;;  %v422_v45 = vmul.f32 %v2269_v40, %v420_v35  ;;  %vm428_vm2 = vweird.f32 %v2269_v40 }
  0x60   : > { %1344 = vperm.xlu2 %2265, %v1278_v58   ;;  %715 = vperm.xlu0 %2263, %v641_v59   ;;  %vm429_vm3 = vmor %vm427_vm1, %vm428_vm2 }
  0x61   : > { %v423_v46 = vmul.f32 %v2269_v40, %v422_v45 }
  0x63   : > { %v424_v51 = vmul.f32 0.5, %v423_v46  ;;  %v412_v46 = vsub.f32 %v2672_v22, %v2770_v25 }
  0x65   : > { %v425_v53 = vsub.f32 1.5, %v424_v51 }
  0x67   : > { %705 = vperm.xlu1 %2264, %v639_v2   ;;  %v426_v58 = vmul.f32 %v2269_v40, %v425_v53  ;;  %v628_v2 = vld [vmem:[%s4339_s4 + $0x8] sm:$0xff] }
  0x68   : > { %710 = vperm.xlu2 %2265, %v640_v3   ;;  %1349 = vperm.xlu0 %2263, %v1279_v4  }
  0x69   : > { %v2821_v61 = vsel %vm429_vm3, %v2269_v40, %v426_v58 }
  0x6a   : > { %v437_v1 = vmul.f32 %v2821_v61, %v418_v60  ;;  %v438_v3 = vmul.f32 %v2821_v61, %v419_v63  ;;  %v436_v10 = vmul.f32 %v2821_v61, %v417_v52  ;;  %v2163_v60 = vld [vmem:[%s4338_s3] sm:$0xff]  ;;  %v2177_v63 = vld [vmem:[%s4338_s3 + $0x50] sm:$0xff] }
  0x6f   : > { %1339 = vperm.xlu1 %2264, %v1277_v11   ;;  %v556_v11 = vld [vmem:[%s4341_s6 + $0x8] sm:$0xff] }
  0x70   : > { %695 = vperm.xlu2 %2265, %v637_v12   ;;  %1334 = vperm.xlu0 %2263, %v1276_v13   ;;  %v435_v12 = vmul.f32 %v2821_v61, %v416_v5 }
  0x77   : > { %1324 = vperm.xlu1 %2264, %v1274_v20  }
  0x78   : > { %1329 = vperm.xlu2 %2265, %v1275_v21   ;;  %700 = vperm.xlu0 %2263, %v638_v24   ;;  %v414_v24 = vsub.f32 %v2690_v29, %v2770_v25  ;;  %v434_v29 = vmul.f32 %v2821_v61, %v415_v27 }
  0x7a   : > { %v433_v34 = vmul.f32 %v2821_v61, %v414_v24 }
  0x7f   : > { %690 = vperm.xlu1 %2264, %v636_v30   ;;  %v560_v30 = vld [vmem:[%s4341_s6 + $0x28] sm:$0xff] }
  0x80   : > { %1314 = vperm.xlu2 %2265, %v1272_v31   ;;  %685 = vperm.xlu0 %2263, %v635_v32   ;;  %v559_v31 = vld [vmem:[%s4341_s6 + $0x20] sm:$0xff]  ;;  %v558_v32 = vld [vmem:[%s4341_s6 + $0x18] sm:$0xff] }
  0x87   : > { %675 = vperm.xlu1 %2264, %v633_v36  }
  0x88   : > { %680 = vperm.xlu2 %2265, %v634_v38   ;;  %1319 = vperm.xlu0 %2263, %v1273_v39  }
  0x8a   : > { %v470_v57 = vpop.permute.xlu2 %469 }
  0x8b   : > { %v491_v17 = vmul.f32 %v470_v57, %v435_v12 }
  0x8f   : > { %1309 = vperm.xlu1 %2264, %v1271_v41  }
  0x90   : > { %665 = vperm.xlu2 %2265, %v631_v43   ;;  %1304 = vperm.xlu0 %2263, %v1270_v44   ;;  %v562_v43 = vld [vmem:[%s4341_s6 + $0x38] sm:$0xff]  ;;  %v561_v44 = vld [vmem:[%s4341_s6 + $0x30] sm:$0xff] }
  0x92   : > { %v475_v4 = vpop.permute.xlu2 %474 }
  0x93   : > { %v492_v16 = vmul.f32 %v475_v4, %v436_v10 }
  0x97   : > { %1294 = vperm.xlu1 %2264, %v1268_v47   ;;  %v413_v47 = vsub.f32 %v2675_v23, %v2770_v25  ;;  %v2175_v23 = vld [vmem:[%s4338_s3 + $0x40] sm:$0xff]  ;;  %v2164_v25 = vld [vmem:[%s4338_s3 + $0x8] sm:$0xff] }
  0x98   : > { %1299 = vperm.xlu2 %2265, %v1269_v49   ;;  %670 = vperm.xlu0 %2263, %v632_v50   ;;  %v431_v50 = vmul.f32 %v2821_v61, %v412_v46 }
  0x99   : > { %v432_v51 = vmul.f32 %v2821_v61, %v413_v47  ;;  %v2176_v61 = vld [vmem:[%s4338_s3 + $0x48] sm:$0xff] }
  0x9a   : > { %v460_v19 = vpop.permute.xlu2 %459 }
  0x9b   : > { %v489_v36 = vmul.f32 %v460_v19, %v433_v34  ;;  %v2169_v19 = vld [vmem:[%s4338_s3 + $0x30] sm:$0xff] }
  0x9f   : > { %660 = vperm.xlu1 %2264, %v630_v54  }
  0xa0   : > { %1284 = vperm.xlu2 %2265, %v1266_v55   ;;  %655 = vperm.xlu0 %2263, %v629_v56  }
  0xa1   : > { %v536_v59 = vpop.permute.xlu1 %535 }
  0xa2   : > { %v480_v62 = vpop.permute.xlu0 %479  ;;  %v521_v39 = vpop.permute.xlu2 %520 }
  0xa3   : > { %v493_v6 = vmul.f32 %v480_v62, %v437_v1  ;;  %v2165_v62 = vld [vmem:[%s4338_s3 + $0x10] sm:$0xff] }
  0xa5   : > { %v549_v13 = vadd.f32 %v536_v59, %v493_v6 }
  0xa7   : > { %645 = vperm.xlu1 %2264, %v627_v0  }
  0xa8   : > { %650 = vperm.xlu2 %2265, %v628_v2   ;;  %1289 = vperm.xlu0 %2263, %v1267_v48   ;;  %v2166_v48 = vld [vmem:[%s4338_s3 + $0x18] sm:$0xff] }
  0xa9   : > { %v541_v7 = vpop.permute.xlu1 %540 }
  0xaa   : > { %v485_v8 = vpop.permute.xlu0 %484  ;;  %v506_v56 = vpop.permute.xlu2 %505 }
  0xab   : > { %v494_v9 = vmul.f32 %v485_v8, %v438_v3  ;;  %v2178_v3 = vld [vmem:[%s4338_s3 + $0x58] sm:$0xff]  ;;  %v2179_v8 = vld [vmem:[%s4338_s3 + $0x60] sm:$0xff] }
  0xad   : > { %v550_v14 = vadd.f32 %v541_v7, %v494_v9  ;;  %v2167_v7 = vld [vmem:[%s4338_s3 + $0x20] sm:$0xff] }
  0xaf   : > { %570 = vperm.xlu1 %2264, %v556_v11   ;;  %v554_v15 = vpack.c.bf16 %v550_v14, %v549_v13  ;;  %v2168_v14 = vld [vmem:[%s4338_s3 + $0x28] sm:$0xff] }
  0xb0   : > { %575 = vperm.xlu2 %2265, %v557_v42   ;;  %565 = vperm.xlu0 %2263, %v555_v37   ;;  %v2180_v42 = vld [vmem:[%s4338_s3 + $0x68] sm:$0xff] }
  0xb1   : > { %792 = vmatpush.bf16.msra.mxu0 %v554_v15  ;;  %1430 = vmatpush.bf16.msra.mxu2 %v554_v15  ;;  %v531_v18 = vpop.permute.xlu1 %530 }
  0xb2   : > { %v548_v20 = vadd.f32 %v531_v18, %v492_v16  ;;  %v526_v21 = vpop.permute.xlu0 %525  ;;  %v2904_v1 = vpop.permute.xlu2 %1359 }
  0xb3   : > { %v547_v26 = vadd.f32 %v526_v21, %v491_v17  ;;  %4392 = vst [vmem:[#allocation9_spill] sm:$0xff] %v2904_v1 }
  0xb5   : > { %v553_v28 = vpack.c.bf16 %v548_v20, %v547_v26  ;;  %v2181_v20 = vld [vmem:[%s4338_s3 + $0x70] sm:$0xff] }
  0xb7   : > { %793 = vmatpush.bf16.msra.mxu0 %v553_v28  ;;  %1431 = vmatpush.bf16.msra.mxu2 %v553_v28  ;;  %v2170_v28 = vld [vmem:[%s4338_s3 + $0x38] sm:$0xff] }
  0xb8   : > { %590 = vperm.xlu2 %2265, %v560_v30   ;;  %585 = vperm.xlu1 %2264, %v559_v31   ;;  %v2182_v30 = vld [vmem:[%s4338_s3 + $0x78] sm:$0xff] }
  0xb9   : > { %580 = vperm.xlu0 %2263, %v558_v32   ;;  %v516_v33 = vpop.permute.xlu1 %515 }
  0xba   : > { %v465_v35 = vpop.permute.xlu0 %464  ;;  %v545_v40 = vadd.f32 %v516_v33, %v489_v36  ;;  %v2916_v4 = vpop.permute.xlu2 %1344 }
  0xbb   : > { %v490_v38 = vmul.f32 %v465_v35, %v434_v29 }
  0xbd   : > { %v546_v41 = vadd.f32 %v521_v39, %v490_v38 }
  0xbf   : > { %v552_v45 = vpack.c.bf16 %v546_v41, %v545_v40 }
  0xc0   : > { %600 = vperm.xlu1 %2264, %v562_v43  }
  0xc1   : > { %595 = vperm.xlu0 %2263, %v561_v44   ;;  %794 = vmatpush.bf16.msra.mxu0 %v552_v45  ;;  %v455_v53 = vpop.permute.xlu1 %454 }
  0xc2   : > { %1432 = vmatpush.bf16.msra.mxu2 %v552_v45  ;;  %v450_v49 = vpop.permute.xlu0 %449  ;;  %v488_v55 = vmul.f32 %v455_v53, %v432_v51  ;;  %v2922_v6 = vpop.permute.xlu2 %710 }
  0xc3   : > { %v487_v54 = vmul.f32 %v450_v49, %v431_v50  ;;  %4395 = vst [vmem:[#allocation12_spill] sm:$0xff] %v2922_v6 }
  0xc5   : > { %v543_v58 = vadd.f32 %v506_v56, %v487_v54 }
  0xc9   : > { %v2900_v0 = vpop.permute.xlu1 %1354 }
  0xca   : > { %v511_v57 = vpop.permute.xlu0 %510  ;;  %4391 = vst [vmem:[#allocation8_spill] sm:$0xff] %v2900_v0  ;;  %v2936_v11 = vpop.permute.xlu2 %695 }
  0xcb   : > { %v544_v59 = vadd.f32 %v511_v57, %v488_v55 }
  0xcd   : > { %v551_v22 = vpack.c.bf16 %v544_v59, %v543_v58 }
  0xcf   : > { %795 = vmatpush.bf16.msra.mxu0 %v551_v22  ;;  %1433 = vmatpush.bf16.msra.mxu2 %v551_v22 }
  0xd1   : > { %v2906_v2 = vpop.permute.xlu1 %720 }
  0xd2   : > { %2046 = vmatmul.msk.bf16.vlgmr.msra.gmra.mxu0 %vm763_vm4, %v2163_v60  ;;  %2118 = vmatmul.msk.bf16.vlgmr.msra.gmra.mxu2 %vm763_vm4, %v2175_v23  ;;  %4393 = vst [vmem:[#allocation10_spill] sm:$0xff] %v2906_v2  ;;  %v2920_v5 = vpop.permute.xlu0 %715  ;;  %v2948_v37 = vpop.permute.xlu2 %1329 }
  0xd3   : > { %4394 = vst [vmem:[#allocation11_spill] sm:$0xff] %v2920_v5 }
  0xd9   : > { %v2918_v52 = vpop.permute.xlu1 %705 }
  0xda   : > { %v2934_v10 = vpop.permute.xlu0 %1349  ;;  %v2956_v17 = vpop.permute.xlu2 %1314 }
  0xdb   : > { %4396 = vst [vmem:[#allocation13_spill] sm:$0xff] %v2934_v10 }
  0xe1   : > { %v2930_v9 = vpop.permute.xlu1 %1339 }
  0xe2   : > { %2047 = vmatmul.msk.bf16.gmra.mxu0 %vm763_vm4, %v2164_v25  ;;  %2119 = vmatmul.msk.bf16.gmra.mxu2 %vm763_vm4, %v2176_v61  ;;  %v2940_v13 = vpop.permute.xlu0 %1334  ;;  %v2970_v24 = vpop.permute.xlu2 %680 }
  0xe9   : > { %v2938_v12 = vpop.permute.xlu1 %1324 }
  0xea   : > { %v2954_v16 = vpop.permute.xlu0 %700  ;;  %v666_v31 = vpop.permute.xlu2 %665 }
  0xf1   : > { %v2952_v15 = vpop.permute.xlu1 %690 }
  0xf2   : > { %2048 = vmatmul.msk.bf16.gmra.mxu0 %vm763_vm4, %v2165_v62  ;;  %2120 = vmatmul.msk.bf16.gmra.mxu2 %vm763_vm4, %v2177_v63  ;;  %v2966_v21 = vpop.permute.xlu0 %685  ;;  %v1300_v29 = vpop.permute.xlu2 %1299 }
  0xf9   : > { %v2958_v18 = vpop.permute.xlu1 %675 }
  0xfa   : > { %v2974_v27 = vpop.permute.xlu0 %1319  ;;  %v1285_v38 = vpop.permute.xlu2 %1284 }
 0x101   : > { %v2972_v26 = vpop.permute.xlu1 %1309 }
 0x102   : > { %2049 = vmatmul.msk.bf16.gmra.mxu0 %vm763_vm4, %v2166_v48  ;;  %2121 = vmatmul.msk.bf16.gmra.mxu2 %vm763_vm4, %v2178_v3  ;;  %v2984_v34 = vpop.permute.xlu0 %1304  ;;  %v651_v49 = vpop.permute.xlu2 %650 }
 0x109   : > { %v1295_v32 = vpop.permute.xlu1 %1294 }
 0x10a   : > { %v2986_v35 = vpop.permute.xlu0 %670 }
 0x111   : > { %v661_v33 = vpop.permute.xlu1 %660 }
 0x112   : > { %2050 = vmatmul.msk.bf16.gmra.mxu0 %vm763_vm4, %v2167_v7  ;;  %2122 = vmatmul.msk.bf16.gmra.mxu2 %vm763_vm4, %v2179_v8  ;;  %v656_v44 = vpop.permute.xlu0 %655 }
 0x119   : > { %v646_v39 = vpop.permute.xlu1 %645 }
 0x11a   : > { %v1290_v54 = vpop.permute.xlu0 %1289 }
 0x122   : > { %2051 = vmatmul.msk.bf16.gmra.mxu0 %vm763_vm4, %v2168_v14  ;;  %2123 = vmatmul.msk.bf16.gmra.mxu2 %vm763_vm4, %v2180_v42 }
 0x132   : > { %2052 = vmatmul.msk.bf16.gmra.mxu0 %vm763_vm4, %v2169_v19  ;;  %2124 = vmatmul.msk.bf16.gmra.mxu2 %vm763_vm4, %v2181_v20 }
 0x142   : > { %2053 = vmatmul.msk.bf16.gmra.mxu0 %vm763_vm4, %v2170_v28  ;;  %2125 = vmatmul.msk.bf16.gmra.mxu2 %vm763_vm4, %v2182_v30 }
 0x14f   : > { %v797_v36 = vpop.f32.mrf.mxu0 }
 0x150   : > { %v2988_v41 = vadd.f32 %v797_v36, %v646_v39 }
 0x152   : > { %v2054_v45 = vmul.f32 -1.442695, %v2988_v41 }
 0x154   : > { %2270 = vpow2.f32 %v2054_v45 }
 0x155   : > { %v1435_v40 = vpop.f32.mrf.mxu2 }
 0x156   : > { %v2991_v46 = vadd.f32 %v1435_v40, %v1285_v38 }
 0x157   : > { %v799_v43 = vpop.f32.mrf.mxu0 }
 0x158   : > { %v2126_v50 = vmul.f32 -1.442695, %v2991_v46  ;;  %v2994_v51 = vadd.f32 %v799_v43, %v651_v49 }
 0x15a   : > { %2272 = vpow2.f32 %v2126_v50  ;;  %v2055_v55 = vmul.f32 -1.442695, %v2994_v51  ;;  %v2271_v56 = vpop.eup %2270 }
 0x15b   : > { %v2999_v59 = vadd.f32 1.0, %v2271_v56 }
 0x15c   : > { %2274 = vpow2.f32 %v2055_v55 }
 0x15d   : > { %v1437_v47 = vpop.f32.mrf.mxu2  ;;  %2276 = vrcp.f32 %v2999_v59  ;;  %vm906_vm5 = vweird.f32 %v2999_v59 }
 0x15e   : > { %v2997_v57 = vadd.f32 %v1437_v47, %v1290_v54 }
 0x15f   : > { %v802_v53 = vpop.f32.mrf.mxu0 }
 0x160   : > { %v2127_v60 = vmul.f32 -1.442695, %v2997_v57  ;;  %v2273_v23 = vpop.eup %2272  ;;  %v3002_v25 = vadd.f32 %v802_v53, %v656_v44 }
 0x161   : > { %v3005_v61 = vadd.f32 1.0, %v2273_v23 }
 0x162   : > { %2278 = vpow2.f32 %v2127_v60  ;;  %v2275_v62 = vpop.eup %2274  ;;  %v2056_v63 = vmul.f32 -1.442695, %v3002_v25 }
 0x163   : > { %2280 = vrcp.f32 %v3005_v61  ;;  %v3013_v14 = vadd.f32 1.0, %v2275_v62  ;;  %v3015_v42 = vpop.eup %2276  ;;  %v910_v62 = vand.u32 2147483647, %v2999_v59  ;;  %vm1544_vm9 = vweird.f32 %v3005_v61 }
 0x164   : > { %2282 = vpow2.f32 %v2056_v63  ;;  %v902_v30 = vmul.f32 %v3015_v42, %v2999_v59  ;;  %vm907_vm6 = vweird.f32 %v3015_v42 }
 0x165   : > { %v1440_v58 = vpop.f32.mrf.mxu2  ;;  %2284 = vrcp.f32 %v3013_v14  ;;  %vm3068_vm7 = vmor %vm906_vm5, %vm907_vm6  ;;  %vm3072_vm8 = vcmp.eq.f32.partialorder %v910_v62, 8.507059e+37  ;;  %vm921_vm12 = vweird.f32 %v3013_v14 }
 0x166   : > { %v3008_v48 = vadd.f32 %v1440_v58, %v1295_v32  ;;  %v903_v40 = vsub.f32 1.0, %v902_v30 }
 0x167   : > { %v804_v22 = vpop.f32.mrf.mxu0 }
 0x168   : > { %v3010_v7 = vadd.f32 %v804_v22, %v661_v33  ;;  %v2128_v19 = vmul.f32 -1.442695, %v3008_v48  ;;  %v2279_v20 = vpop.eup %2278  ;;  %v904_v54 = vmul.f32 %v3015_v42, %v903_v40 }
 0x169   : > { %v3022_v32 = vadd.f32 1.0, %v2279_v20  ;;  %v3024_v36 = vpop.eup %2280 }
 0x16a   : > { %v2057_v28 = vmul.f32 -1.442695, %v3010_v7  ;;  %2286 = vpow2.f32 %v2128_v19  ;;  %v2283_v38 = vpop.eup %2282  ;;  %v1540_v47 = vmul.f32 %v3024_v36, %v3005_v61  ;;  %v1548_v19 = vand.u32 2147483647, %v3005_v61 }
 0x16b   : > { %v3031_v45 = vpop.eup %2284  ;;  %v3035_v49 = vadd.f32 1.0, %v2283_v38  ;;  %v1550_v38 = vand.u32 2147483648, %v3005_v61  ;;  %vm1545_vm11 = vweird.f32 %v3024_v36  ;;  %vm1559_vm0 = vweird.f32 %v3022_v32 }
 0x16c   : > { %2288 = vpow2.f32 %v2057_v28  ;;  %v1541_v22 = vsub.f32 1.0, %v1540_v47  ;;  %vm3088_vm10 = vcmp.eq.f32.partialorder %v1548_v19, 8.507059e+37  ;;  %vm3117_vm14 = vmor %vm1544_vm9, %vm1545_vm11  ;;  %vm922_vm15 = vweird.f32 %v3031_v45 }
 0x16d   : > { %v1442_v3 = vpop.f32.mrf.mxu2  ;;  %2290 = vrcp.f32 %v3022_v32  ;;  %vm3141_vm1 = vmor %vm921_vm12, %vm922_vm15  ;;  %vm936_vm4 = vweird.f32 %v3035_v49 }
 0x16e   : > { %v3029_v44 = vadd.f32 %v1442_v3, %v1300_v29  ;;  %2292 = vrcp.f32 %v3035_v49  ;;  %v1542_v30 = vmul.f32 %v3024_v36, %v1541_v22 }
 0x16f   : > { %v807_v8 = vpop.f32.mrf.mxu0 }
 0x170   : > { %v3026_v43 = vadd.f32 %v807_v8, %v666_v31  ;;  %v2287_v50 = vpop.eup %2286  ;;  %v917_v31 = vmul.f32 %v3031_v45, %v3013_v14  ;;  %v2129_v56 = vmul.f32 -1.442695, %v3029_v44  ;;  %v905_v8 = vadd.f32 %v3015_v42, %v904_v54 }
 0x171   : > { %v3048_v60 = vadd.f32 1.0, %v2287_v50 }
 0x172   : > { %v2289_v53 = vpop.eup %2288  ;;  %v2058_v55 = vmul.f32 -1.442695, %v3026_v43  ;;  %v918_v20 = vsub.f32 1.0, %v917_v31  ;;  %v909_v54 = vsel %vm3068_vm7, %v3015_v42, %v905_v8  ;;  %v927_v31 = vand.u32 2147483648, %v3013_v14 }
 0x173   : > { %v3050_v23 = vpop.eup %2290  ;;  %v3054_v63 = vadd.f32 1.0, %v2289_v53  ;;  %v1551_v42 = vor.u32 1.1754944e-38, %v1550_v38 }
 0x174   : > { %2294 = vpow2.f32 %v2058_v55  ;;  %v3080_v53 = vpop.eup %2292  ;;  %v925_v55 = vand.u32 2147483647, %v3013_v14  ;;  %v928_v38 = vor.u32 1.1754944e-38, %v927_v31  ;;  %vm1560_vm2 = vweird.f32 %v3050_v23 }
 0x175   : > { %v1445_v33 = vpop.f32.mrf.mxu2  ;;  %2296 = vpow2.f32 %v2129_v56  ;;  %v932_v19 = vmul.f32 %v3080_v53, %v3035_v49  ;;  %vm3189_vm5 = vmor %vm1559_vm0, %vm1560_vm2  ;;  %vm937_vm6 = vweird.f32 %v3080_v53 }
 0x176   : > { %2298 = vrcp.f32 %v3048_v60  ;;  %v3100_v1 = vadd.f32 %v1445_v33, %v2984_v34  ;;  %vm3106_vm13 = vcmp.eq.f32.partialorder %v925_v55, 8.507059e+37 }
 0x177   : > { %v809_v39 = vpop.f32.mrf.mxu0  ;;  %2300 = vrcp.f32 %v3054_v63  ;;  %v933_v5 = vsub.f32 1.0, %v932_v19 }
 0x178   : > { %v3043_v29 = vadd.f32 %v809_v39, %v2986_v35  ;;  %v912_v35 = vand.u32 2147483648, %v2999_v59  ;;  %v1555_v39 = vmul.f32 %v3050_v23, %v3022_v32  ;;  %v2130_v6 = vmul.f32 -1.442695, %v3100_v1 }
 0x17a   : > { %v2059_v28 = vmul.f32 -1.442695, %v3043_v29  ;;  %v913_v59 = vor.u32 1.1754944e-38, %v912_v35  ;;  %v2295_v62 = vpop.eup %2294  ;;  %v1556_v8 = vsub.f32 1.0, %v1555_v39  ;;  %v1563_v39 = vand.u32 2147483647, %v3022_v32 }
 0x17b   : > { %v2297_v35 = vpop.eup %2296 }
 0x17c   : > { %2302 = vpow2.f32 %v2059_v28  ;;  %v914_v40 = vsel %vm3072_vm8, %v913_v59, %v909_v54  ;;  %v3103_v2 = vpop.eup %2298  ;;  %v1565_v54 = vand.u32 2147483648, %v3022_v32  ;;  %v3125_v59 = vadd.f32 1.0, %v2295_v62 }
 0x17d   : > { %v3045_v58 = vpop.f32.mrf.mxu2  ;;  %v3111_v47 = vpop.eup %2300  ;;  %v3128_v55 = vmul.f32 %v914_v40, %v2988_v41  ;;  %v1557_v31 = vmul.f32 %v3050_v23, %v1556_v8  ;;  %v3134_v0 = vadd.f32 1.0, %v2297_v35  ;;  %v1570_v10 = vmul.f32 %v3103_v2, %v3048_v60 }
 0x17e   : > { %v942_v62 = vand.u32 2147483648, %v3035_v49  ;;  %vm3158_vm3 = vcmp.eq.f32.partialorder %v1563_v39, 8.507059e+37  ;;  %v3169_v56 = vadd.f32 %v3045_v58, %v2972_v26  ;;  %v1566_v34 = vor.u32 1.1754944e-38, %v1565_v54 }
 0x17f   : > { %v812_v3 = vpop.f32.mrf.mxu0  ;;  %4407 = vst [vmem:[#allocation14_spill] sm:$0xff] %v3128_v55  ;;  %vm1574_vm8 = vweird.f32 %v3048_v60  ;;  %vm1575_vm11 = vweird.f32 %v3103_v2  ;;  %vm952_vm12 = vweird.f32 %v3111_v47 }
 0x180   : > { %v3078_v50 = vadd.f32 %v812_v3, %v2958_v18  ;;  %v919_v18 = vmul.f32 %v3031_v45, %v918_v20  ;;  %v1543_v3 = vadd.f32 %v3024_v36, %v1542_v30  ;;  %v2131_v58 = vmul.f32 -1.442695, %v3169_v56 }
 0x182   : > { %v2060_v20 = vmul.f32 -1.442695, %v3078_v50  ;;  %v920_v33 = vadd.f32 %v3031_v45, %v919_v18  ;;  %v1547_v61 = vsel %vm3117_vm14, %v3024_v36, %v1543_v3  ;;  %v2303_v18 = vpop.eup %2302  ;;  %v940_v36 = vand.u32 2147483647, %v3035_v49  ;;  %vm3261_vm14 = vmor %vm1574_vm8, %vm1575_vm11 }
 0x183   : > { %v947_v3 = vmul.f32 %v3111_v47, %v3054_v63  ;;  %v1552_v35 = vsel %vm3088_vm10, %v1551_v42, %v1547_v61  ;;  %v1571_v42 = vsub.f32 1.0, %v1570_v10  ;;  %vm3232_vm10 = vmor %vm936_vm4, %vm937_vm6 }
 0x184   : > { %2304 = vpow2.f32 %v2060_v20  ;;  %v924_v14 = vsel %vm3141_vm1, %v3031_v45, %v920_v33  ;;  %v1558_v20 = vadd.f32 %v3050_v23, %v1557_v31  ;;  %v934_v45 = vmul.f32 %v3080_v53, %v933_v5 }
 0x185   : > { %v1450_v22 = vpop.f32.mrf.mxu2  ;;  %2306 = vrcp.f32 %v3125_v59  ;;  %v943_v33 = vor.u32 1.1754944e-38, %v942_v62  ;;  %v948_v61 = vsub.f32 1.0, %v947_v3  ;;  %v929_v26 = vsel %vm3106_vm13, %v928_v38, %v924_v14 }
 0x186   : > { %2308 = vrcp.f32 %v3134_v0  ;;  %v1578_v5 = vand.u32 2147483647, %v3048_v60  ;;  %vm3194_vm7 = vcmp.eq.f32.partialorder %v940_v36, 8.507059e+37  ;;  %v1562_v32 = vsel %vm3189_vm5, %v3050_v23, %v1558_v20 }
 0x187   : > { %v814_v28 = vpop.f32.mrf.mxu0  ;;  %2310 = vpow2.f32 %v2130_v6  ;;  %v3183_v6 = vadd.f32 %v1450_v22, %v2956_v17  ;;  %v935_v30 = vadd.f32 %v3080_v53, %v934_v45  ;;  %v1572_v38 = vmul.f32 %v3103_v2, %v1571_v42 }
 0x188   : > { %v3150_v8 = vadd.f32 %v814_v28, %v2970_v24  ;;  %v3165_v24 = vadd.f32 1.0, %v2303_v18  ;;  %v3177_v18 = vmul.f32 %v1552_v35, %v2991_v46  ;;  %v3212_v41 = vmul.f32 %v929_v26, %v2994_v51 }
 0x189   : > { %v1580_v36 = vand.u32 2147483648, %v3048_v60  ;;  %v949_v62 = vmul.f32 %v3111_v47, %v948_v61  ;;  %vm3217_vm9 = vcmp.eq.f32.partialorder %v1578_v5, 8.507059e+37  ;;  %v955_v23 = vand.u32 2147483647, %v3054_v63 }
 0x18a   : > { %v2061_v28 = vmul.f32 -1.442695, %v3150_v8  ;;  %v2305_v31 = vpop.eup %2304  ;;  %2312 = vrcp.f32 %v3165_v24  ;;  %4416 = vst [vmem:[#allocation15_spill] sm:$0xff] %v3212_v41  ;;  %v2132_v14 = vmul.f32 -1.442695, %v3183_v6  ;;  %v1567_v51 = vsel %vm3158_vm3, %v1566_v34, %v1562_v32 }
 0x18b   : > { %v3200_v17 = vadd.f32 1.0, %v2305_v31  ;;  %v3202_v22 = vpop.eup %2306  ;;  %v957_v42 = vand.u32 2147483648, %v3054_v63  ;;  %v939_v61 = vsel %vm3232_vm10, %v3080_v53, %v935_v30  ;;  %v1573_v40 = vadd.f32 %v3103_v2, %v1572_v38 }
 0x18c   : > { %2314 = vpow2.f32 %v2061_v28  ;;  %v3209_v54 = vpop.eup %2308  ;;  %v962_v28 = vmul.f32 %v3202_v22, %v3125_v59  ;;  %v950_v31 = vadd.f32 %v3111_v47, %v949_v62  ;;  %v1581_v32 = vor.u32 1.1754944e-38, %v1580_v36 }
 0x18d   : > { %v1452_v19 = vpop.f32.mrf.mxu2  ;;  %v2311_v3 = vpop.eup %2310  ;;  %2316 = vrcp.f32 %v3200_v17  ;;  %v1585_v26 = vmul.f32 %v3209_v54, %v3134_v0  ;;  %vm951_vm13 = vweird.f32 %v3054_v63  ;;  %vm3265_vm15 = vcmp.eq.f32.partialorder %v955_v23, 8.507059e+37 }
 0x18e   : > { %2318 = vpow2.f32 %v2131_v58  ;;  %v3250_v5 = vadd.f32 1.0, %v2311_v3  ;;  %v3253_v10 = vadd.f32 %v1452_v19, %v2974_v27  ;;  %v3256_v58 = vmul.f32 %v1567_v51, %v2997_v57  ;;  %vm3279_vm0 = vmor %vm951_vm13, %vm952_vm12 }
 0x18f   : > { %v3173_v39 = vpop.f32.mrf.mxu0  ;;  %2320 = vpow2.f32 %v2132_v14  ;;  %v958_v27 = vor.u32 1.1754944e-38, %v957_v42  ;;  %v1595_v19 = vand.u32 2147483648, %v3134_v0  ;;  %v963_v62 = vsub.f32 1.0, %v962_v28 }
 0x190   : > { %v3245_v34 = vpop.eup %2312  ;;  %4421 = vst [vmem:[#allocation16_spill] sm:$0xff] %v3256_v58  ;;  %v944_v63 = vsel %vm3194_vm7, %v943_v33, %v939_v61  ;;  %v1577_v60 = vsel %vm3261_vm14, %v3103_v2, %v1573_v40  ;;  %v954_v33 = vsel %vm3279_vm0, %v3111_v47, %v950_v31  ;;  %v1586_v46 = vsub.f32 1.0, %v1585_v26 }
 0x191   : > { %v977_v3 = vmul.f32 %v3245_v34, %v3165_v24  ;;  %2322 = vrcp.f32 %v3250_v5  ;;  %v2133_v2 = vmul.f32 -1.442695, %v3253_v10  ;;  %v972_v45 = vand.u32 2147483648, %v3125_v59 }
 0x192   : > { %v2315_v53 = vpop.eup %2314  ;;  %v3300_v61 = vmul.f32 %v944_v63, %v3002_v25  ;;  %v1582_v47 = vsel %vm3217_vm9, %v1581_v32, %v1577_v60  ;;  %v3304_v40 = vor.u32 1.1754944e-38, %v1595_v19  ;;  %v964_v31 = vmul.f32 %v3202_v22, %v963_v62 }
 0x193   : > { %v3270_v57 = vpop.eup %2316  ;;  %v3285_v23 = vadd.f32 1.0, %v2315_v53  ;;  %v959_v53 = vsel %vm3265_vm15, %v958_v27, %v954_v33  ;;  %v978_v30 = vsub.f32 1.0, %v977_v3  ;;  %v3313_v51 = vadd.f32 %v3173_v39, %v2966_v21 }
 0x194   : > { %v2319_v14 = vpop.eup %2318  ;;  %v992_v42 = vmul.f32 %v3270_v57, %v3200_v17  ;;  %4428 = vst [vmem:[#allocation17_spill] sm:$0xff] %v3300_v61  ;;  %v1587_v35 = vmul.f32 %v3209_v54, %v1586_v46  ;;  %vm966_vm1 = vweird.f32 %v3125_v59  ;;  %v970_v32 = vand.u32 2147483647, %v3125_v59 }
 0x195   : > { %v3224_v20 = vpop.f32.mrf.mxu2  ;;  %2324 = vrcp.f32 %v3285_v23  ;;  %v2321_v26 = vpop.eup %2320  ;;  %v3309_v36 = vadd.f32 1.0, %v2319_v14  ;;  %4429 = vst [vmem:[#allocation18_spill] sm:$0xff] %v3313_v51  ;;  %v3321_v19 = vmul.f32 %v1582_v47, %v3008_v48  ;;  %vm967_vm2 = vweird.f32 %v3202_v22 }
 0x196   : > { %2326 = vpow2.f32 %v2133_v2  ;;  %v3324_v38 = vor.u32 1.1754944e-38, %v972_v45  ;;  %v993_v27 = vsub.f32 1.0, %v992_v42  ;;  %v3329_v21 = vmul.f32 %v959_v53, %v3010_v7  ;;  %vm3360_vm4 = vmor %vm966_vm1, %vm967_vm2 }
 0x197   : > { %v819_v49 = vpop.f32.mrf.mxu0  ;;  %4430 = vst [vmem:[#allocation19_spill] sm:$0xff] %v3321_v19  ;;  %v3326_v62 = vpop.eup %2322  ;;  %v3332_v39 = vadd.f32 %v3202_v22, %v964_v31  ;;  %v3335_v60 = vadd.f32 1.0, %v2321_v26  ;;  %v979_v48 = vmul.f32 %v3245_v34, %v978_v30  ;;  %2328 = vrcp.f32 %v3309_v36 }
 0x198   : > { %4431 = vst [vmem:[#allocation20_spill] sm:$0xff] %v3329_v21  ;;  %v2062_v14 = vmul.f32 -1.442695, %v3313_v51  ;;  %v3343_v33 = vadd.f32 %v819_v49, %v2952_v15  ;;  %v3346_v7 = vadd.f32 %v3209_v54, %v1587_v35  ;;  %v3353_v45 = vadd.f32 %v3224_v20, %v2938_v12 }
 0x199   : > { %vm1590_vm3 = vweird.f32 %v3209_v54  ;;  %vm981_vm5 = vweird.f32 %v3165_v24  ;;  %v985_v49 = vand.u32 2147483647, %v3165_v24  ;;  %v987_v42 = vand.u32 2147483648, %v3165_v24 }
 0x19a   : > { %4432 = vst [vmem:[#allocation21_spill] sm:$0xff] %v3343_v33  ;;  %v994_v47 = vmul.f32 %v3270_v57, %v993_v27  ;;  %v969_v59 = vsel %vm3360_vm4, %v3202_v22, %v3332_v39  ;;  %vm3374_vm6 = vcmp.eq.f32.partialorder %v970_v32, 8.507059e+37  ;;  %v1600_v26 = vmul.f32 %v3326_v62, %v3250_v5 }
 0x19b   : > { %v3337_v3 = vpop.eup %2324  ;;  %4433 = vst [vmem:[#allocation22_spill] sm:$0xff] %v3353_v45  ;;  %2330 = vrcp.f32 %v3335_v60  ;;  %vm1589_vm7 = vweird.f32 %v3134_v0  ;;  %v980_v30 = vadd.f32 %v3245_v34, %v979_v48  ;;  %vm982_vm8 = vweird.f32 %v3245_v34 }
 0x19c   : > { %v1007_v2 = vmul.f32 %v3337_v3, %v3285_v23  ;;  %v2327_v20 = vpop.eup %2326  ;;  %2332 = vpow2.f32 %v2062_v14  ;;  %v2063_v35 = vmul.f32 -1.442695, %v3343_v33  ;;  %vm1012_vm9 = vweird.f32 %v3337_v3  ;;  %vm3398_vm11 = vmor %vm981_vm5, %vm982_vm8 }
 0x19d   : > { %v3297_v28 = vpop.f32.mrf.mxu2  ;;  %v1017_v32 = vand.u32 2147483648, %v3285_v23  ;;  %v2134_v27 = vmul.f32 -1.442695, %v3353_v45  ;;  %v3389_v39 = vpop.eup %2328  ;;  %vm997_vm10 = vweird.f32 %v3270_v57  ;;  %v1015_v48 = vand.u32 2147483647, %v3285_v23  ;;  %vm3456_vm8 = vmor %vm1589_vm7, %vm1590_vm3 }
 0x19e   : > { %v1008_v53 = vsub.f32 1.0, %v1007_v2  ;;  %v995_v2 = vadd.f32 %v3270_v57, %v994_v47  ;;  %v3394_v15 = vadd.f32 1.0, %v2327_v20  ;;  %v1601_v63 = vsub.f32 1.0, %v1600_v26 }
 0x19f   : > { %v3315_v25 = vpop.f32.mrf.mxu0  ;;  %v1002_v46 = vand.u32 2147483648, %v3200_v17  ;;  %vm1011_vm12 = vweird.f32 %v3285_v23  ;;  %vm996_vm13 = vweird.f32 %v3200_v17  ;;  %v1000_v47 = vand.u32 2147483647, %v3200_v17 }
 0x1a0   : > { %v1009_v22 = vmul.f32 %v3337_v3, %v1008_v53  ;;  %vm3409_vm14 = vmor %vm1011_vm12, %vm1012_vm9  ;;  %2334 = vpow2.f32 %v2063_v35  ;;  %v3415_v24 = vadd.f32 %v3297_v28, %v2948_v37  ;;  %v1615_v23 = vmul.f32 %v3389_v39, %v3309_v36 }
 0x1a1   : > { %v3417_v26 = vpop.eup %2330  ;;  %vm3423_vm15 = vmor %vm996_vm13, %vm997_vm10  ;;  %v1018_v35 = vor.u32 1.1754944e-38, %v1017_v32  ;;  %2336 = vpow2.f32 %v2134_v27  ;;  %v984_v37 = vsel %vm3398_vm11, %v3245_v34, %v980_v30  ;;  %vm1016_vm0 = vcmp.eq.f32.partialorder %v1015_v48, 8.507059e+37 }
 0x1a2   : > { %v1010_v45 = vadd.f32 %v3337_v3, %v1009_v22  ;;  %4442 = vst [vmem:[#allocation23_spill] sm:$0xff] %v3415_v24  ;;  %v2333_v51 = vpop.eup %2332  ;;  %v999_v28 = vsel %vm3423_vm15, %v3270_v57, %v995_v2  ;;  %2338 = vrcp.f32 %v3394_v15  ;;  %v4445_v58 = vand.u32 2147483647, %v3134_v0 }
 0x1a3   : > { %vm1604_vm2 = vweird.f32 %v3250_v5  ;;  %v3446_v34 = vadd.f32 %v3315_v25, %v2936_v11  ;;  %v974_v57 = vsel %vm3374_vm6, %v3324_v38, %v969_v59  ;;  %vm986_vm4 = vcmp.eq.f32.partialorder %v985_v49, 8.507059e+37 }
 0x1a4   : > { %v1014_v22 = vsel %vm3409_vm14, %v3337_v3, %v1010_v45  ;;  %vm3439_vm1 = vcmp.eq.f32.partialorder %v4445_v58, 8.507059e+37  ;;  %v988_v3 = vor.u32 1.1754944e-38, %v987_v42  ;;  %v1003_v45 = vor.u32 1.1754944e-38, %v1002_v46 }
 0x1a5   : > { %v3368_v12 = vpop.f32.mrf.mxu2  ;;  %v1019_v32 = vsel %vm1016_vm0, %v1018_v35, %v1014_v22  ;;  %4448 = vst [vmem:[#allocation24_spill] sm:$0xff] %v3446_v34  ;;  %vm1001_vm5 = vcmp.eq.f32.partialorder %v1000_v47, 8.507059e+37  ;;  %v2135_v58 = vmul.f32 -1.442695, %v3415_v24  ;;  %v1602_v46 = vmul.f32 %v3326_v62, %v1601_v63 }
 0x1a6   : > { %v989_v11 = vsel %vm986_vm4, %v988_v3, %v984_v37  ;;  %v1616_v25 = vsub.f32 1.0, %v1615_v23  ;;  %v1004_v30 = vsel %vm1001_vm5, %v1003_v45, %v999_v28  ;;  %v2335_v27 = vpop.eup %2334  ;;  %v1592_v38 = vsel %vm3456_vm8, %v3209_v54, %v3346_v7  ;;  %v4502_v37 = vld [vmem:[#allocation11_spill] sm:$0xff] }
 0x1a7   : > { %v824_v14 = vpop.f32.mrf.mxu0  ;;  %v1630_v49 = vmul.f32 %v3417_v26, %v3335_v60  ;;  %v3468_v0 = vmul.f32 %v1019_v32, %v3150_v8  ;;  %v3470_v59 = vadd.f32 1.0, %v2333_v51  ;;  %v2337_v31 = vpop.eup %2336  ;;  %vm1605_vm3 = vweird.f32 %v3326_v62 }
 0x1a8   : > { %v4452_v63 = vand.u32 2147483648, %v3250_v5  ;;  %v2064_v48 = vmul.f32 -1.442695, %v3446_v34  ;;  %v3478_v53 = vadd.f32 %v3368_v12, %v2940_v13  ;;  %v3480_v54 = vpop.eup %2338  ;;  %v3483_v7 = vmul.f32 %v974_v57, %v3026_v43  ;;  %vm3522_vm7 = vmor %vm1604_vm2, %vm1605_vm3 }
 0x1a9   : > { %4451 = vst [vmem:[#allocation25_spill] sm:$0xff] %v3468_v0  ;;  %v3486_v8 = vmul.f32 %v989_v11, %v3043_v29  ;;  %v3489_v51 = vmul.f32 %v1004_v30, %v3078_v50  ;;  %2340 = vpow2.f32 %v2135_v58  ;;  %v1603_v23 = vadd.f32 %v3326_v62, %v1602_v46 }
 0x1aa   : > { %v1611_v2 = vor.u32 1.1754944e-38, %v4452_v63  ;;  %4453 = vst [vmem:[#allocation26_spill] sm:$0xff] %v3478_v53  ;;  %v4457_v17 = vand.u32 2147483647, %v3250_v5  ;;  %v1617_v12 = vmul.f32 %v3389_v39, %v1616_v25  ;;  %v3499_v43 = vadd.f32 1.0, %v2335_v27 }
 0x1ab   : > { %4454 = vst [vmem:[#allocation27_spill] sm:$0xff] %v3483_v7  ;;  %v3502_v29 = vadd.f32 %v824_v14, %v2954_v16  ;;  %v1631_v22 = vsub.f32 1.0, %v1630_v49  ;;  %2342 = vrcp.f32 %v3470_v59  ;;  %v3505_v50 = vadd.f32 1.0, %v2337_v31 }
 0x1ac   : > { %4455 = vst [vmem:[#allocation28_spill] sm:$0xff] %v3486_v8  ;;  %vm3494_vm6 = vcmp.eq.f32.partialorder %v4457_v17, 8.507059e+37  ;;  %v1645_v28 = vmul.f32 %v3480_v54, %v3394_v15  ;;  %2344 = vpow2.f32 %v2064_v48  ;;  %v2136_v3 = vmul.f32 -1.442695, %v3478_v53  ;;  %v4504_v53 = vld [vmem:[#allocation10_spill] sm:$0xff] }
 0x1ad   : > { %v1462_v33 = vpop.f32.mrf.mxu2  ;;  %4456 = vst [vmem:[#allocation29_spill] sm:$0xff] %v3489_v51  ;;  %v1597_v16 = vsel %vm3439_vm1, %v3304_v40, %v1592_v38  ;;  %v1623_v32 = vand.u32 2147483647, %v3309_v36  ;;  %v1607_v40 = vsel %vm3522_vm7, %v3326_v62, %v1603_v23  ;;  %v1625_v20 = vand.u32 2147483648, %v3309_v36 }
 0x1ae   : > { %4460 = vst [vmem:[#allocation30_spill] sm:$0xff] %v3502_v29  ;;  %2346 = vrcp.f32 %v3499_v43  ;;  %v2065_v5 = vmul.f32 -1.442695, %v3502_v29  ;;  %v1618_v42 = vadd.f32 %v3389_v39, %v1617_v12  ;;  %vm1620_vm9 = vweird.f32 %v3389_v39 }
 0x1af   : > { %v827_v47 = vpop.f32.mrf.mxu0  ;;  %v2341_v58 = vpop.eup %2340  ;;  %2348 = vrcp.f32 %v3505_v50  ;;  %v1632_v46 = vmul.f32 %v3417_v26, %v1631_v22  ;;  %v1646_v11 = vsub.f32 1.0, %v1645_v28  ;;  %v3549_v30 = vmul.f32 %v1597_v16, %v3029_v44  ;;  %v4483_v16 = vld [vmem:[#allocation12_spill] sm:$0xff] }
 0x1b0   : > { %v3513_v45 = vadd.f32 %v827_v47, %v2918_v52  ;;  %2350 = vpow2.f32 %v2136_v3  ;;  %vm1619_vm10 = vweird.f32 %v3309_v36  ;;  %vm3552_vm11 = vcmp.eq.f32.partialorder %v1623_v32, 8.507059e+37 }
 0x1b1   : > { %v3546_v25 = vpop.eup %2342  ;;  %4467 = vst [vmem:[#allocation35_spill] sm:$0xff] %v3549_v30  ;;  %vm3557_vm12 = vmor %vm1619_vm10, %vm1620_vm9  ;;  %v1626_v49 = vor.u32 1.1754944e-38, %v1625_v20  ;;  %v1638_v31 = vand.u32 2147483647, %v3335_v60  ;;  %v3562_v63 = vadd.f32 1.0, %v2341_v58  ;;  %2352 = vpow2.f32 %v2065_v5 }
 0x1b2   : > { %4461 = vst [vmem:[#allocation31_spill] sm:$0xff] %v3513_v45  ;;  %v2066_v62 = vmul.f32 -1.442695, %v3513_v45  ;;  %v1612_v44 = vsel %vm3494_vm6, %v1611_v2, %v1607_v40  ;;  %v1622_v36 = vsel %vm3557_vm12, %v3389_v39, %v1618_v42  ;;  %vm1635_vm13 = vweird.f32 %v3417_v26 }
 0x1b3   : > { %4466 = vst [vmem:[#allocation34_spill] sm:$0xff] %v3546_v25  ;;  %v1633_v17 = vadd.f32 %v3417_v26, %v1632_v46  ;;  %v1647_v12 = vmul.f32 %v3480_v54, %v1646_v11  ;;  %v1022_v22 = vmul.f32 %v3546_v25, %v3470_v59  ;;  %vm1634_vm14 = vweird.f32 %v3335_v60 }
 0x1b4   : > { %2354 = vpow2.f32 %v2066_v62  ;;  %v1640_v39 = vand.u32 2147483648, %v3335_v60  ;;  %v3586_v3 = vmul.f32 %v1612_v44, %v3100_v1  ;;  %vm3588_vm15 = vcmp.eq.f32.partialorder %v1638_v31, 8.507059e+37  ;;  %vm3598_vm0 = vmor %vm1634_vm14, %vm1635_vm13 }
 0x1b5   : > { %v1465_v35 = vpop.f32.mrf.mxu2  ;;  %v1653_v14 = vand.u32 2147483647, %v3394_v15  ;;  %v1627_v32 = vsel %vm3552_vm11, %v1626_v49, %v1622_v36  ;;  %v1655_v1 = vand.u32 2147483648, %v3394_v15  ;;  %v1637_v5 = vsel %vm3598_vm0, %v3417_v26, %v1633_v17 }
 0x1b6   : > { %v3528_v57 = vadd.f32 %v1465_v35, %v2916_v4  ;;  %v3542_v4 = vadd.f32 %v1462_v33, %v2930_v9  ;;  %v2345_v33 = vpop.eup %2344  ;;  %4473 = vst [vmem:[#allocation37_spill] sm:$0xff] %v3586_v3  ;;  %v1648_v58 = vadd.f32 %v3480_v54, %v1647_v12  ;;  %vm1650_vm1 = vweird.f32 %v3480_v54 }
 0x1b7   : > { %v829_v47 = vpop.f32.mrf.mxu0  ;;  %v3571_v23 = vpop.eup %2346  ;;  %v3583_v35 = vadd.f32 1.0, %v2345_v33  ;;  %v1023_v42 = vsub.f32 1.0, %v1022_v22  ;;  %v1641_v46 = vor.u32 1.1754944e-38, %v1640_v39  ;;  %vm1649_vm2 = vweird.f32 %v3394_v15 }
 0x1b8   : > { %4464 = vst [vmem:[#allocation32_spill] sm:$0xff] %v3528_v57  ;;  %v2138_v9 = vmul.f32 -1.442695, %v3528_v57  ;;  %v2137_v48 = vmul.f32 -1.442695, %v3542_v4  ;;  %v3579_v13 = vpop.eup %2348  ;;  %v1037_v40 = vmul.f32 %v3571_v23, %v3499_v43  ;;  %vm3619_vm4 = vcmp.eq.f32.partialorder %v1653_v14, 8.507059e+37  ;;  %vm3626_vm5 = vmor %vm1649_vm2, %vm1650_vm1 }
 0x1b9   : > { %4465 = vst [vmem:[#allocation33_spill] sm:$0xff] %v3542_v4  ;;  %v2351_v28 = vpop.eup %2350  ;;  %v1660_v11 = vmul.f32 %v3579_v13, %v3505_v50  ;;  %v1032_v33 = vand.u32 2147483648, %v3470_v59  ;;  %v1642_v49 = vsel %vm3588_vm15, %v1641_v46, %v1637_v5  ;;  %v1656_v44 = vor.u32 1.1754944e-38, %v1655_v1 }
 0x1ba   : > { %4472 = vst [vmem:[#allocation36_spill] sm:$0xff] %v3571_v23  ;;  %2356 = vpow2.f32 %v2138_v9  ;;  %v2353_v20 = vpop.eup %2352  ;;  %v3613_v62 = vadd.f32 1.0, %v2351_v28  ;;  %v3616_v9 = vmul.f32 %v1627_v32, %v3169_v56  ;;  %v1038_v36 = vsub.f32 1.0, %v1037_v40 }
 0x1bb   : > { %2358 = vrcp.f32 %v3562_v63  ;;  %v2355_v27 = vpop.eup %2354  ;;  %v3630_v56 = vadd.f32 1.0, %v2353_v20  ;;  %v1652_v15 = vsel %vm3626_vm5, %v3480_v54, %v1648_v58  ;;  %v1024_v17 = vmul.f32 %v3546_v25, %v1023_v42 }
 0x1bc   : > { %2360 = vpow2.f32 %v2137_v48  ;;  %4478 = vst [vmem:[#allocation38_spill] sm:$0xff] %v3616_v9  ;;  %vm1026_vm8 = vweird.f32 %v3470_v59  ;;  %v1661_v39 = vsub.f32 1.0, %v1660_v11  ;;  %v3641_v28 = vadd.f32 1.0, %v2355_v27 }
 0x1bd   : > { %v3577_v2 = vpop.f32.mrf.mxu2  ;;  %2362 = vrcp.f32 %v3583_v35  ;;  %v3644_v14 = vadd.f32 %v829_v47, %v4483_v16  ;;  %v3647_v60 = vmul.f32 %v1642_v49, %v3183_v6  ;;  %v3649_v54 = vor.u32 1.1754944e-38, %v1032_v33  ;;  %v4488_v49 = vld [vmem:[#allocation13_spill] sm:$0xff] }
 0x1be   : > { %2364 = vrcp.f32 %v3613_v62  ;;  %vm1027_vm3 = vweird.f32 %v3546_v25  ;;  %v1039_v47 = vmul.f32 %v3571_v23, %v1038_v36  ;;  %v1657_v6 = vsel %vm3619_vm4, %v1656_v44, %v1652_v15 }
 0x1bf   : > { %v832_v32 = vpop.f32.mrf.mxu0  ;;  %4484 = vst [vmem:[#allocation12_spill] sm:$0xff] %v3647_v60  ;;  %2366 = vrcp.f32 %v3630_v56  ;;  %v3663_v42 = vadd.f32 %v3546_v25, %v1024_v17  ;;  %v1662_v27 = vmul.f32 %v3579_v13, %v1661_v39  ;;  %v1047_v33 = vand.u32 2147483648, %v3499_v43  ;;  %vm3687_vm7 = vmor %vm1026_vm8, %vm1027_vm3  ;;  %v4503_v17 = vld [vmem:[#allocation8_spill] sm:$0xff] }
 0x1c0   : > { %v2357_v38 = vpop.eup %2356  ;;  %4485 = vst [vmem:[#allocation39_spill] sm:$0xff] %v3649_v54  ;;  %2368 = vrcp.f32 %v3641_v28  ;;  %vm1041_vm6 = vweird.f32 %v3499_v43  ;;  %v3679_v31 = vadd.f32 %v3577_v2, %v4488_v49  ;;  %v4490_v36 = vmov 0 }
 0x1c1   : > { %v3632_v48 = vpop.eup %2358  ;;  %v3652_v40 = vadd.f32 1.0, %v2357_v38  ;;  %4487 = vst [vmem:[#allocation41_spill] sm:$0xff] %v3663_v42  ;;  %v2067_v38 = vmul.f32 -1.442695, %v3644_v14  ;;  %v4491_v36 = vsel %vm3687_vm7, 4294967295, %v4490_v36  ;;  %v3692_v15 = vadd.f32 %v3571_v23, %v1039_v47 }
 0x1c2   : > { %v2361_v22 = vpop.eup %2360  ;;  %v1675_v46 = vmul.f32 %v3632_v48, %v3562_v63  ;;  %4489 = vst [vmem:[#allocation13_spill] sm:$0xff] %v3679_v31  ;;  %vm1042_vm9 = vweird.f32 %v3571_v23  ;;  %v1062_v2 = vand.u32 2147483648, %v3583_v35  ;;  %v3708_v47 = vadd.f32 %v3579_v13, %v1662_v27 }
 0x1c3   : > { %v3654_v5 = vpop.eup %2362  ;;  %v3667_v11 = vadd.f32 1.0, %v2361_v22  ;;  %2370 = vrcp.f32 %v3652_v40  ;;  %4492 = vst [vmem:[#allocation42_spill] sm:$0xff] %v4491_v36  ;;  %v3698_v22 = vmul.f32 %v1657_v6, %v3253_v10  ;;  %v3710_v52 = vor.u32 1.1754944e-38, %v1047_v33  ;;  %vm3715_vm10 = vmor %vm1041_vm6, %vm1042_vm9 }
 0x1c4   : > { %4486 = vst [vmem:[#allocation40_spill] sm:$0xff] %v3654_v5  ;;  %v1052_v26 = vmul.f32 %v3654_v5, %v3583_v35  ;;  %v3681_v44 = vpop.eup %2364  ;;  %v1676_v16 = vsub.f32 1.0, %v1675_v46  ;;  %v4497_v10 = vmov 0  ;;  %v2139_v27 = vmul.f32 -1.442695, %v3679_v31 }
 0x1c5   : > { %v1470_v20 = vpop.f32.mrf.mxu2  ;;  %4493 = vst [vmem:[#allocation43_spill] sm:$0xff] %v3692_v15  ;;  %2372 = vrcp.f32 %v3667_v11  ;;  %v3705_v49 = vpop.eup %2366  ;;  %v4498_v10 = vsel %vm3715_vm10, 4294967295, %v4497_v10  ;;  %v1690_v1 = vmul.f32 %v3681_v44, %v3613_v62  ;;  %v3730_v39 = vor.u32 1.1754944e-38, %v1062_v2 }
 0x1c6   : > { %4494 = vst [vmem:[#allocation44_spill] sm:$0xff] %v3698_v22  ;;  %2374 = vpow2.f32 %v2067_v38  ;;  %v1053_v46 = vsub.f32 1.0, %v1052_v26  ;;  %v3723_v58 = vpop.eup %2368  ;;  %v1677_v12 = vmul.f32 %v3632_v48, %v1676_v16  ;;  %vm1056_vm11 = vweird.f32 %v3583_v35 }
 0x1c7   : > { %4495 = vst [vmem:[#allocation45_spill] sm:$0xff] %v3708_v47  ;;  %v834_v6 = vpop.f32.mrf.mxu0  ;;  %v1067_v7 = vmul.f32 %v3705_v49, %v3630_v56  ;;  %vm1057_vm12 = vweird.f32 %v3654_v5  ;;  %v1077_v2 = vand.u32 2147483648, %v3630_v56  ;;  %2376 = vpow2.f32 %v2139_v27 }
 0x1c8   : > { %4496 = vst [vmem:[#allocation46_spill] sm:$0xff] %v3710_v52  ;;  %v3744_v38 = vadd.f32 %v832_v32, %v4502_v37  ;;  %v1054_v16 = vmul.f32 %v3654_v5, %v1053_v46  ;;  %v1691_v0 = vsub.f32 1.0, %v1690_v1  ;;  %v3750_v24 = vadd.f32 %v1470_v20, %v4503_v17  ;;  %v4505_v32 = vld [vmem:[#allocation9_spill] sm:$0xff]  ;;  %vm3791_vm14 = vmor %vm1056_vm11, %vm1057_vm12 }
 0x1c9   : > { %4499 = vst [vmem:[#allocation47_spill] sm:$0xff] %v4498_v10  ;;  %v3733_v26 = vpop.eup %2370  ;;  %v3753_v54 = vadd.f32 %v834_v6, %v4504_v53  ;;  %v1082_v42 = vmul.f32 %v3723_v58, %v3641_v28  ;;  %v3764_v1 = vadd.f32 %v3632_v48, %v1677_v12  ;;  %v1068_v20 = vsub.f32 1.0, %v1067_v7  ;;  %v4621_v55 = vld [vmem:[#allocation41_spill] sm:$0xff] }
 0x1ca   : > { %4500 = vst [vmem:[#allocation48_spill] sm:$0xff] %v3730_v39  ;;  %v1720_v27 = vmul.f32 %v3733_v26, %v3652_v40  ;;  %v2068_v37 = vmul.f32 -1.442695, %v3744_v38  ;;  %v2140_v53 = vmul.f32 -1.442695, %v3750_v24  ;;  %v3769_v6 = vor.u32 1.1754944e-38, %v1077_v2 }
 0x1cb   : > { %4501 = vst [vmem:[#allocation49_spill] sm:$0xff] %v3733_v26  ;;  %v3746_v51 = vpop.eup %2372  ;;  %v2069_v36 = vmul.f32 -1.442695, %v3753_v54  ;;  %v3775_v4 = vadd.f32 %v3654_v5, %v1054_v16  ;;  %vm1071_vm13 = vweird.f32 %v3630_v56  ;;  %v1092_v16 = vand.u32 2147483648, %v3641_v28 }
 0x1cc   : > { %v2375_v33 = vpop.eup %2374  ;;  %4506 = vst [vmem:[#allocation11_spill] sm:$0xff] %v3764_v1  ;;  %v1705_v46 = vmul.f32 %v3746_v51, %v3667_v11  ;;  %2378 = vpow2.f32 %v2068_v37  ;;  %v1721_v2 = vsub.f32 1.0, %v1720_v27  ;;  %v1069_v37 = vmul.f32 %v3705_v49, %v1068_v20  ;;  %v4611_v31 = vld [vmem:[#allocation43_spill] sm:$0xff] }
 0x1cd   : > { %v1472_v8 = vpop.f32.mrf.mxu2  ;;  %v3766_v17 = vadd.f32 1.0, %v2375_v33  ;;  %4507 = vst [vmem:[#allocation8_spill] sm:$0xff] %v3775_v4  ;;  %v2377_v7 = vpop.eup %2376  ;;  %v1083_v33 = vsub.f32 1.0, %v1082_v42  ;;  %vm1072_vm15 = vweird.f32 %v3705_v49  ;;  %vm1086_vm0 = vweird.f32 %v3641_v28 }
 0x1ce   : > { %v3761_v25 = vadd.f32 %v1472_v8, %v4505_v32  ;;  %v1692_v8 = vmul.f32 %v3681_v44, %v1691_v0  ;;  %v3785_v52 = vadd.f32 1.0, %v2377_v7  ;;  %v4508_v0 = vmov 0  ;;  %vm3847_vm5 = vmor %vm1071_vm13, %vm1072_vm15 }
 0x1cf   : > { %2380 = vrcp.f32 %v3766_v17  ;;  %v4509_v0 = vsel %vm3791_vm14, 4294967295, %v4508_v0  ;;  %v1706_v42 = vsub.f32 1.0, %v1705_v46  ;;  %v1084_v34 = vmul.f32 %v3723_v58, %v1083_v33 }
 0x1d0   : > { %2382 = vpow2.f32 %v2140_v53  ;;  %v2141_v32 = vmul.f32 -1.442695, %v3761_v25  ;;  %4510 = vst [vmem:[#allocation10_spill] sm:$0xff] %v4509_v0  ;;  %v3802_v20 = vadd.f32 %v3681_v44, %v1692_v8  ;;  %v1722_v46 = vmul.f32 %v3733_v26, %v1721_v2 }
 0x1d1   : > { %2384 = vpow2.f32 %v2069_v36  ;;  %vm1724_vm1 = vweird.f32 %v3652_v40  ;;  %v3812_v12 = vadd.f32 %v3705_v49, %v1069_v37  ;;  %v3814_v27 = vor.u32 1.1754944e-38, %v1092_v16 }
 0x1d2   : > { %4511 = vst [vmem:[#allocation9_spill] sm:$0xff] %v3802_v20  ;;  %2386 = vrcp.f32 %v3785_v52  ;;  %v2379_v7 = vpop.eup %2378  ;;  %v1707_v33 = vmul.f32 %v3746_v51, %v1706_v42  ;;  %v1730_v2 = vand.u32 2147483648, %v3652_v40  ;;  %vm1087_vm2 = vweird.f32 %v3723_v58 }
 0x1d3   : > { %2388 = vpow2.f32 %v2141_v32  ;;  %v3816_v8 = vadd.f32 1.0, %v2379_v7  ;;  %vm1725_vm4 = vweird.f32 %v3733_v26  ;;  %v3832_v7 = vadd.f32 %v3723_v58, %v1084_v34  ;;  %vm3864_vm8 = vmor %vm1086_vm0, %vm1087_vm2 }
 0x1d4   : > { %v3835_v42 = vadd.f32 %v3733_v26, %v1722_v46  ;;  %v1107_v46 = vand.u32 2147483648, %v3766_v17  ;;  %v3868_v34 = vor.u32 1.1754944e-38, %v1730_v2  ;;  %v3873_v3 = vadd.f32 %v3746_v51, %v1707_v33  ;;  %vm3879_vm3 = vmor %vm1724_vm1, %vm1725_vm4 }
 0x1d5   : > { %v3809_v36 = vpop.eup %2380  ;;  %2390 = vrcp.f32 %v3816_v8  ;;  %v4518_v23 = vmov 0  ;;  %v1745_v9 = vand.u32 2147483648, %v3785_v52  ;;  %v1105_v60 = vand.u32 2147483647, %v3766_v17 }
 0x1d6   : > { %v2383_v15 = vpop.eup %2382  ;;  %v1097_v32 = vmul.f32 %v3809_v36, %v3766_v17  ;;  %4512 = vst [vmem:[#allocation50_spill] sm:$0xff] %v3835_v42  ;;  %v4519_v23 = vsel %vm3879_vm3, 4294967295, %v4518_v23  ;;  %v1120_v22 = vand.u32 2147483647, %v3816_v8  ;;  %v1122_v33 = vand.u32 2147483648, %v3816_v8 }
 0x1d7   : > { %v3829_v37 = vadd.f32 1.0, %v2383_v15  ;;  %v2385_v16 = vpop.eup %2384  ;;  %4517 = vst [vmem:[#allocation51_spill] sm:$0xff] %v3868_v34  ;;  %vm1116_vm12 = vweird.f32 %v3816_v8  ;;  %vm3932_vm4 = vcmp.eq.f32.partialorder %v1105_v60, 8.507059e+37  ;;  %vm4542_vm1 = vweird.f32 %v3766_v17  ;;  %v4587_v17 = vld [vmem:[#allocation13_spill] sm:$0xff] }
 0x1d8   : > { %v3841_v61 = vpop.eup %2386  ;;  %v3854_v53 = vadd.f32 1.0, %v2385_v16  ;;  %v1098_v41 = vsub.f32 1.0, %v1097_v32  ;;  %4520 = vst [vmem:[#allocation52_spill] sm:$0xff] %v4519_v23  ;;  %v1743_v32 = vand.u32 2147483647, %v3785_v52  ;;  %vm3917_vm15 = vcmp.eq.f32.partialorder %v1120_v22, 8.507059e+37 }
 0x1d9   : > { %2392 = vrcp.f32 %v3829_v37  ;;  %v2389_v21 = vpop.eup %2388  ;;  %v1735_v16 = vmul.f32 %v3841_v61, %v3785_v52  ;;  %v1123_v0 = vor.u32 1.1754944e-38, %v1122_v33  ;;  %v1760_v42 = vand.u32 2147483648, %v3829_v37 }
 0x1da   : > { %2394 = vrcp.f32 %v3854_v53  ;;  %v3885_v2 = vadd.f32 1.0, %v2389_v21  ;;  %v3900_v21 = vor.u32 1.1754944e-38, %v1107_v46  ;;  %v1099_v57 = vmul.f32 %v3809_v36, %v1098_v41 }
 0x1db   : > { %v3897_v10 = vpop.eup %2390  ;;  %v1736_v47 = vsub.f32 1.0, %v1735_v16  ;;  %v3912_v46 = vor.u32 1.1754944e-38, %v1745_v9  ;;  %v1135_v16 = vand.u32 2147483647, %v3854_v53  ;;  %vm3956_vm6 = vcmp.eq.f32.partialorder %v1743_v32, 8.507059e+37 }
 0x1dc   : > { %2396 = vrcp.f32 %v3885_v2  ;;  %v1112_v29 = vmul.f32 %v3897_v10, %v3816_v8  ;;  %v1100_v22 = vadd.f32 %v3809_v36, %v1099_v57  ;;  %vm1117_vm0 = vweird.f32 %v3897_v10 }
 0x1dd   : > { %v1737_v9 = vmul.f32 %v3841_v61, %v1736_v47  ;;  %vm3943_vm2 = vcmp.eq.f32.partialorder %v1135_v16, 8.507059e+37  ;;  %v1137_v57 = vand.u32 2147483648, %v3854_v53  ;;  %vm3969_vm9 = vmor %vm1116_vm12, %vm1117_vm0  ;;  %v4538_v8 = vand.u32 2147483647, %v3652_v40 }
 0x1de   : > { %v1113_v41 = vsub.f32 1.0, %v1112_v29  ;;  %v1758_v29 = vand.u32 2147483647, %v3829_v37  ;;  %v4539_v23 = vmov 0  ;;  %vm4541_vm0 = vweird.f32 %v3809_v36 }
 0x1df   : > { %v3909_v1 = vpop.eup %2392  ;;  %v1738_v26 = vadd.f32 %v3841_v61, %v1737_v9  ;;  %v4535_v9 = vand.u32 2147483647, %v3630_v56  ;;  %vm3987_vm12 = vcmp.eq.f32.partialorder %v4538_v8, 8.507059e+37  ;;  %vm3995_vm14 = vmor %vm4542_vm1, %vm4541_vm0  ;;  %vm4545_vm1 = vweird.f32 %v3841_v61 }
 0x1e0   : > { %v1750_v4 = vmul.f32 %v3909_v1, %v3829_v37  ;;  %v3924_v5 = vpop.eup %2394  ;;  %v1114_v45 = vmul.f32 %v3897_v10, %v1113_v41  ;;  %v4527_v41 = vand.u32 2147483647, %v3641_v28  ;;  %v4540_v23 = vsel %vm3987_vm12, 4294967295, %v4539_v23 }
 0x1e1   : > { %v1127_v20 = vmul.f32 %v3924_v5, %v3854_v53  ;;  %vm3981_vm10 = vcmp.eq.f32.partialorder %v4535_v9, 8.507059e+37  ;;  %v1104_v8 = vsel %vm3995_vm14, %v3809_v36, %v1100_v22  ;;  %vm4546_vm0 = vweird.f32 %v3785_v52 }
 0x1e2   : > { %v3940_v47 = vpop.eup %2396  ;;  %v1751_v60 = vsub.f32 1.0, %v1750_v4  ;;  %vm3952_vm13 = vcmp.eq.f32.partialorder %v4527_v41, 8.507059e+37  ;;  %v1115_v16 = vadd.f32 %v3897_v10, %v1114_v45  ;;  %v4534_v45 = vld [vmem:[#allocation16_spill] sm:$0xff]  ;;  %v4536_v41 = vmov 0  ;;  %vm4012_vm12 = vmor %vm4546_vm0, %vm4545_vm1 }
 0x1e3   : > { %v1128_v34 = vsub.f32 1.0, %v1127_v20  ;;  %v1765_v4 = vmul.f32 %v3940_v47, %v3885_v2  ;;  %v1811_v20 = vpack.c.bf16 %v4534_v45, %v3177_v18  ;;  %v4537_v41 = vsel %vm3981_vm10, 4294967295, %v4536_v41 }
 0x1e4   : > { %v1752_v32 = vmul.f32 %v3909_v1, %v1751_v60  ;;  %v1119_v56 = vsel %vm3969_vm9, %v3897_v10, %v1115_v16  ;;  %v4549_v16 = vand.u32 2147483647, %v3583_v35  ;;  %v4550_v36 = vmov 0 }
 0x1e5   : > { %v1129_v9 = vmul.f32 %v3924_v5, %v1128_v34  ;;  %v1766_v40 = vsub.f32 1.0, %v1765_v4  ;;  %v1775_v34 = vand.u32 2147483648, %v3885_v2  ;;  %vm4552_vm14 = vweird.f32 %v3909_v1 }
 0x1e6   : > { %v1753_v10 = vadd.f32 %v3909_v1, %v1752_v32  ;;  %vm4022_vm11 = vcmp.eq.f32.partialorder %v4549_v16, 8.507059e+37  ;;  %vm4553_vm1 = vweird.f32 %v3829_v37  ;;  %vm1770_vm7 = vweird.f32 %v3940_v47  ;;  %v4594_v16 = vld [vmem:[#allocation40_spill] sm:$0xff] }
 0x1e7   : > { %v4551_v36 = vsel %vm4022_vm11, 4294967295, %v4550_v36  ;;  %v1130_v52 = vadd.f32 %v3924_v5, %v1129_v9  ;;  %vm4031_vm0 = vmor %vm4553_vm1, %vm4552_vm14  ;;  %v1767_v4 = vmul.f32 %v3940_v47, %v1766_v40  ;;  %v1773_v35 = vand.u32 2147483647, %v3885_v2  ;;  %v4623_v40 = vld [vmem:[#allocation39_spill] sm:$0xff] }
 0x1e8   : > { %vm1664_vm9 = vweird.f32 %v3505_v50  ;;  %v1124_v28 = vsel %vm3917_vm15, %v1123_v0, %v1119_v56  ;;  %vm4556_vm11 = vweird.f32 %v3924_v5  ;;  %vm4557_vm3 = vweird.f32 %v3854_v53 }
 0x1e9   : > { %vm1133_vm10 = vmor %vm4557_vm3, %vm4556_vm11  ;;  %v1138_v37 = vor.u32 1.1754944e-38, %v1137_v57  ;;  %v1757_v32 = vsel %vm4031_vm0, %v3909_v1, %v1753_v10  ;;  %v1761_v60 = vor.u32 1.1754944e-38, %v1760_v42  ;;  %v4558_v9 = vand.u32 2147483647, %v3499_v43 }
 0x1ea   : > { %v1742_v39 = vsel %vm4012_vm12, %v3841_v61, %v1738_v26  ;;  %v1134_v0 = vsel %vm1133_vm10, %v3924_v5, %v1130_v52  ;;  %vm1759_vm15 = vcmp.eq.f32.partialorder %v1758_v29, 8.507059e+37  ;;  %v1768_v53 = vadd.f32 %v3940_v47, %v1767_v4  ;;  %v4595_v52 = vld [vmem:[#allocation8_spill] sm:$0xff] }
 0x1eb   : > { %vm4050_vm14 = vcmp.eq.f32.partialorder %v4558_v9, 8.507059e+37  ;;  %v1109_v1 = vsel %vm3932_vm4, %v3900_v21, %v1104_v8  ;;  %v1139_v43 = vsel %vm3943_vm2, %v1138_v37, %v1134_v0  ;;  %v1762_v42 = vsel %vm1759_vm15, %v1761_v60, %v1757_v32  ;;  %v4604_v9 = vld [vmem:[#allocation11_spill] sm:$0xff] }
 0x1ec   : > { %vm4561_vm3 = vweird.f32 %v3885_v2  ;;  %v1776_v57 = vor.u32 1.1754944e-38, %v1775_v34  ;;  %v4562_v61 = vand.u32 2147483647, %v3470_v59  ;;  %vm4565_vm12 = vweird.f32 %v3746_v51  ;;  %v4631_v34 = vld [vmem:[#allocation25_spill] sm:$0xff] }
 0x1ed   : > { %vm1771_vm11 = vmor %vm4561_vm3, %vm1770_vm7  ;;  %vm4566_vm4 = vweird.f32 %v3667_v11  ;;  %v1155_v26 = vmul.f32 %v1124_v28, %v3744_v38  ;;  %v1156_v2 = vmul.f32 %v1139_v43, %v3753_v54  ;;  %vm1774_vm7 = vcmp.eq.f32.partialorder %v1773_v35, 8.507059e+37  ;;  %v4607_v43 = vld [vmem:[#allocation45_spill] sm:$0xff] }
 0x1ee   : > { %vm4070_vm10 = vcmp.eq.f32.partialorder %v4562_v61, 8.507059e+37  ;;  %vm4078_vm1 = vmor %vm4566_vm4, %vm4565_vm12  ;;  %v1772_v21 = vsel %vm1771_vm11, %v3940_v47, %v1768_v53  ;;  %v4569_v29 = vsel %vm3864_vm8, %v3723_v58, %v3832_v7  ;;  %v1747_v54 = vsel %vm3956_vm6, %v3912_v46, %v1742_v39  ;;  %v4580_v58 = vld [vmem:[#allocation49_spill] sm:$0xff]  ;;  %v4583_v46 = vld [vmem:[#allocation51_spill] sm:$0xff] }
 0x1ef   : > { %v1712_v59 = vsel %vm4078_vm1, %v3746_v51, %v3873_v3  ;;  %v1094_v33 = vsel %vm3952_vm13, %v3814_v27, %v4569_v29  ;;  %v1777_v38 = vsel %vm1774_vm7, %v1776_v57, %v1772_v21  ;;  %v1154_v47 = vmul.f32 %v1109_v1, %v3644_v14  ;;  %v4578_v14 = vld [vmem:[#allocation52_spill] sm:$0xff]  ;;  %v4581_v27 = vld [vmem:[#allocation50_spill] sm:$0xff]  ;;  %v4608_v57 = vld [vmem:[#allocation47_spill] sm:$0xff] }
 0x1f0   : > { %v1180_v56 = vpack.c.bf16 %v1156_v2, %v1155_v26  ;;  %v1793_v8 = vmul.f32 %v1762_v42, %v3750_v24  ;;  %v1794_v51 = vmul.f32 %v1777_v38, %v3761_v25  ;;  %vm4570_vm2 = vweird.f32 %v3681_v44  ;;  %v4605_v39 = vld [vmem:[#allocation30_spill] sm:$0xff]  ;;  %v4606_v53 = vld [vmem:[#allocation32_spill] sm:$0xff] }
 0x1f1   : > { %vm4571_vm8 = vweird.f32 %v3613_v62  ;;  %v4574_v19 = vsel %vm3847_vm5, %v3705_v49, %v3812_v12  ;;  %vm4575_vm6 = vnez %v4537_v41  ;;  %v4576_v24 = vand.u32 2147483647, %v3667_v11  ;;  %v4585_v49 = vld [vmem:[#allocation9_spill] sm:$0xff]  ;;  %v4586_v12 = vld [vmem:[#allocation31_spill] sm:$0xff]  ;;  %v4610_v61 = vld [vmem:[#allocation36_spill] sm:$0xff] }
 0x1f2   : > { %vm4107_vm0 = vmor %vm4571_vm8, %vm4570_vm2  ;;  %v1079_v30 = vsel %vm4575_vm6, %v3769_v6, %v4574_v19  ;;  %v4577_v25 = vand.u32 2147483648, %v3667_v11  ;;  %vm4579_vm15 = vnez %v4578_v14  ;;  %vm4584_vm3 = vnez %v4540_v23  ;;  %1205 = vmatpush.bf16.msra.mxu1 %v1180_v56  ;;  %v4592_v23 = vld [vmem:[#allocation10_spill] sm:$0xff]  ;;  %v4626_v14 = vld [vmem:[#allocation21_spill] sm:$0xff] }
 0x1f3   : > { %vm1714_vm13 = vcmp.eq.f32.partialorder %v4576_v24, 8.507059e+37  ;;  %v4582_v7 = vsel %vm4579_vm15, %v4580_v58, %v4581_v27  ;;  %v1697_v6 = vsel %vm4107_vm0, %v3681_v44, %v4585_v49  ;;  %v1153_v41 = vmul.f32 %v1094_v33, %v4586_v12  ;;  %v4597_v44 = vld [vmem:[#allocation48_spill] sm:$0xff]  ;;  %v4613_v2 = vld [vmem:[#allocation46_spill] sm:$0xff]  ;;  %v4629_v12 = vld [vmem:[#allocation23_spill] sm:$0xff] }
 0x1f4   : > { %v1716_v3 = vor.u32 1.1754944e-38, %v4577_v25  ;;  %v1732_v15 = vsel %vm4584_vm3, %v4583_v46, %v4582_v7  ;;  %v1792_v10 = vmul.f32 %v1747_v54, %v4587_v17  ;;  %v1818_v11 = vpack.c.bf16 %v1794_v51, %v1793_v8  ;;  %v4616_v54 = vld [vmem:[#allocation24_spill] sm:$0xff]  ;;  %v4618_v8 = vld [vmem:[#allocation42_spill] sm:$0xff] }
 0x1f5   : > { %vm4588_vm5 = vweird.f32 %v3632_v48  ;;  %vm4589_vm11 = vweird.f32 %v3562_v63  ;;  %vm4593_vm4 = vnez %v4592_v23  ;;  %vm4598_vm1 = vnez %v4551_v36  ;;  %v4620_v51 = vld [vmem:[#allocation34_spill] sm:$0xff]  ;;  %v4632_v23 = vld [vmem:[#allocation29_spill] sm:$0xff] }
 0x1f6   : > { %vm4141_vm12 = vmor %vm4589_vm11, %vm4588_vm5  ;;  %v4596_v22 = vsel %vm4593_vm4, %v4594_v16, %v4595_v52  ;;  %v4599_v35 = vand.u32 2147483647, %v3613_v62  ;;  %v4600_v28 = vand.u32 2147483648, %v3613_v62  ;;  %v1717_v32 = vsel %vm1714_vm13, %v1716_v3, %v1712_v59  ;;  %1843 = vmatpush.bf16.msra.mxu3 %v1818_v11  ;;  %v4627_v27 = vld [vmem:[#allocation26_spill] sm:$0xff]  ;;  %v4634_v52 = vld [vmem:[#allocation44_spill] sm:$0xff] }
 0x1f7   : > { %v1064_v4 = vsel %vm4598_vm1, %v4597_v44, %v4596_v22  ;;  %vm4601_vm2 = vweird.f32 %v3579_v13  ;;  %v1682_v36 = vsel %vm4141_vm12, %v3632_v48, %v4604_v9  ;;  %v1152_v0 = vmul.f32 %v1079_v30, %v4605_v39  ;;  %v4628_v49 = vld [vmem:[#allocation18_spill] sm:$0xff]  ;;  %v4635_v22 = vld [vmem:[#allocation12_spill] sm:$0xff] }
 0x1f8   : > { %vm1699_vm7 = vcmp.eq.f32.partialorder %v4599_v35, 8.507059e+37  ;;  %v1701_v37 = vor.u32 1.1754944e-38, %v4600_v28  ;;  %vm4161_vm8 = vmor %vm1664_vm9, %vm4601_vm2  ;;  %v1791_v1 = vmul.f32 %v1732_v15, %v4606_v53  ;;  %v1179_v62 = vpack.c.bf16 %v1154_v47, %v1153_v41  ;;  %v4617_v47 = vld [vmem:[#allocation33_spill] sm:$0xff]  ;;  %v4630_v17 = vld [vmem:[#allocation22_spill] sm:$0xff] }
 0x1f9   : > { %v1667_v42 = vsel %vm4161_vm8, %v3579_v13, %v4607_v43  ;;  %vm4609_vm9 = vnez %v4608_v57  ;;  %v4614_v21 = vand.u32 2147483648, %v3562_v63  ;;  %v4615_v33 = vand.u32 2147483647, %v3562_v63  ;;  %v4638_v35 = vld [vmem:[#allocation27_spill] sm:$0xff]  ;;  %v4643_v9 = vld [vmem:[#allocation20_spill] sm:$0xff] }
 0x1fa   : > { %v4612_v26 = vsel %vm4609_vm9, %v4610_v61, %v4611_v31  ;;  %v1702_v29 = vsel %vm1699_vm7, %v1701_v37, %v1697_v6  ;;  %v1151_v38 = vmul.f32 %v1064_v4, %v4616_v54  ;;  %v1790_v13 = vmul.f32 %v1717_v32, %v4617_v47  ;;  %1206 = vmatpush.bf16.msra.mxu1 %v1179_v62  ;;  %v4637_v4 = vld [vmem:[#allocation28_spill] sm:$0xff]  ;;  %v4640_v37 = vld [vmem:[#allocation38_spill] sm:$0xff]  ;;  %v4641_v32 = vld [vmem:[#allocation37_spill] sm:$0xff] }
 0x1fb   : > { %v1049_v48 = vsel %vm4050_vm14, %v4613_v2, %v4612_v26  ;;  %v1686_v59 = vor.u32 1.1754944e-38, %v4614_v21  ;;  %vm1684_vm0 = vcmp.eq.f32.partialorder %v4615_v33, 8.507059e+37  ;;  %v1817_v56 = vpack.c.bf16 %v1792_v10, %v1791_v1  ;;  %v2171_v53 = vld [vmem:[%s4340_s5 + $0x4] sm:$0xf0]  ;;  %v4646_v1 = vld [vmem:[#allocation35_spill] sm:$0xff]  ;;  %v4650_v26 = vld [vmem:[#allocation14_spill] sm:$0xff] }
 0x1fc   : > { %vm4619_vm6 = vnez %v4618_v8  ;;  %v4624_v24 = vand.u32 2147483648, %v3505_v50  ;;  %v4625_v3 = vand.u32 2147483647, %v3505_v50  ;;  %v1150_v58 = vmul.f32 %v1049_v48, %v4626_v14  ;;  %v4647_v62 = vld [vmem:[#allocation19_spill] sm:$0xff]  ;;  %v2183_v57 = vld [vmem:[%s4340_s5 + $0x8] sm:$0xf0] }
 0x1fd   : > { %v4622_v19 = vsel %vm4619_vm6, %v4620_v51, %v4621_v55  ;;  %v1687_v63 = vsel %vm1684_vm0, %v1686_v59, %v1682_v36  ;;  %v1789_v7 = vmul.f32 %v1702_v29, %v4627_v27  ;;  %v1178_v46 = vpack.c.bf16 %v1152_v0, %v1151_v38  ;;  %1844 = vmatpush.bf16.msra.mxu3 %v1817_v56  ;;  %v4644_v36 = vld [vmem:[#allocation17_spill] sm:$0xff]  ;;  %v2072_v0 = vld [vmem:[%s4340_s5] sm:$0xf]  ;;  %v4649_v31 = vld [vmem:[#allocation15_spill] sm:$0xff]  ;;  %v571_v27 = vpop.permute.xlu1 %570 }
 0x1fe   : > { %v1034_v30 = vsel %vm4070_vm10, %v4623_v40, %v4622_v19  ;;  %v1671_v25 = vor.u32 1.1754944e-38, %v4624_v24  ;;  %vm1669_vm14 = vcmp.eq.f32.partialorder %v4625_v3, 8.507059e+37  ;;  %v1788_v41 = vmul.f32 %v1687_v63, %v4629_v12  ;;  %v2076_v21 = vld [vmem:[%s4340_s5 + $0x10] sm:$0xf]  ;;  %v2172_v59 = vld [vmem:[%s4340_s5 + $0x14] sm:$0xf0] }
 0x1ff   : > { %v1149_v6 = vmul.f32 %v1034_v30, %v4628_v49  ;;  %1207 = vmatpush.bf16.msra.mxu1 %v1178_v46  ;;  %v1816_v5 = vpack.c.bf16 %v1790_v13, %v1789_v7  ;;  %v4633_v16 = vpack.c.bf16 %v4631_v34, %v4632_v23  ;;  %v4636_v44 = vpack.c.bf16 %v4634_v52, %v4635_v22  ;;  %v2148_v29 = vld [vmem:[%s4340_s5 + $0x14] sm:$0xf]  ;;  %v2184_v33 = vld [vmem:[%s4340_s5 + $0x18] sm:$0xf0]  ;;  %v2173_v54 = vld [vmem:[%s4340_s5 + $0x24] sm:$0xf0] }
 0x200   : > { %v1672_v15 = vsel %vm1669_vm14, %v1671_v25, %v1667_v42  ;;  %v4639_v28 = vpack.c.bf16 %v4637_v4, %v4638_v35  ;;  %v4642_v60 = vpack.c.bf16 %v4640_v37, %v4641_v32  ;;  %v4645_v39 = vpack.c.bf16 %v4643_v9, %v4644_v36  ;;  %v2144_v42 = vld [vmem:[%s4340_s5 + $0x4] sm:$0xf]  ;;  %v2185_v47 = vld [vmem:[%s4340_s5 + $0x28] sm:$0xf0]  ;;  %v2084_v8 = vld [vmem:[%s4340_s5 + $0x30] sm:$0xf]  ;;  %v566_v25 = vpop.permute.xlu0 %565 }
 0x201   : > { %v1787_v10 = vmul.f32 %v1672_v15, %v4630_v17  ;;  %v1177_v11 = vpack.c.bf16 %v1150_v58, %v1149_v6  ;;  %1845 = vmatpush.bf16.msra.mxu3 %v1816_v5  ;;  %v4648_v43 = vpack.c.bf16 %v4646_v1, %v4647_v62  ;;  %v2073_v61 = vor.u32 %v2171_v53, %v2072_v0  ;;  %v2152_v38 = vld [vmem:[%s4340_s5 + $0x24] sm:$0xf]  ;;  %v2174_v51 = vld [vmem:[%s4340_s5 + $0x34] sm:$0xf0]  ;;  %v2156_v55 = vld [vmem:[%s4340_s5 + $0x34] sm:$0xf]  ;;  %v576_v6 = vpop.permute.xlu2 %575 }
 0x202   : > { %v4651_v2 = vpack.c.bf16 %v4649_v31, %v4650_v26  ;;  %v2145_v48 = vor.u32 %v2183_v57, %v2144_v42  ;;  %v2077_v18 = vor.u32 %v2172_v59, %v2076_v21  ;;  %v2149_v45 = vor.u32 %v2184_v33, %v2148_v29  ;;  %v2186_v19 = vld [vmem:[%s4340_s5 + $0x38] sm:$0xf0] }
 0x203   : > { %1208 = vmatpush.bf16.msra.mxu1 %v1177_v11  ;;  %v1815_v50 = vpack.c.bf16 %v1788_v41, %v1787_v10  ;;  %v2153_v56 = vor.u32 %v2185_v47, %v2152_v38  ;;  %v2085_v40 = vor.u32 %v2174_v51, %v2084_v8  ;;  %v2157_v30 = vor.u32 %v2186_v19, %v2156_v55 }
 0x205   : > { %1846 = vmatpush.bf16.msra.mxu3 %v1815_v50 }
 0x207   : > { %1209 = vmatpush.bf16.msra.mxu1 %v4633_v16  ;;  %v586_v16 = vpop.permute.xlu1 %585 }
 0x208   : > { %v581_v10 = vpop.permute.xlu0 %580 }
 0x209   : > { %1847 = vmatpush.bf16.msra.mxu3 %v4636_v44  ;;  %v591_v35 = vpop.permute.xlu2 %590 }
 0x20b   : > { %1210 = vmatpush.bf16.msra.mxu1 %v4639_v28 }
 0x20d   : > { %1848 = vmatpush.bf16.msra.mxu3 %v4642_v60 }
 0x20f   : > { %1211 = vmatpush.bf16.msra.mxu1 %v4645_v39  ;;  %v601_v1 = vpop.permute.xlu1 %600 }
 0x210   : > { %v596_v9 = vpop.permute.xlu0 %595 }
 0x211   : > { %1849 = vmatpush.bf16.msra.mxu3 %v4648_v43 }
 0x213   : > { %1212 = vmatpush.bf16.msra.mxu1 %v4651_v2 }
 0x215   : > { %1850 = vmatpush.bf16.msra.mxu3 %v1811_v20  ;;  %v2080_v20 = vld [vmem:[%s4340_s5 + $0x20] sm:$0xf] }
 0x216   : > { %1213 = vmatmul.bf16.vlgmr.msra.gmra.mxu1 %v2073_v61  ;;  %v2081_v13 = vor.u32 %v2173_v54, %v2080_v20 }
 0x218   : > { %1851 = vmatmul.bf16.vlgmr.msra.gmra.mxu3 %v2145_v48 }
 0x226   : > { %1218 = vmatmul.bf16.gmra.mxu1 %v2077_v18 }
 0x228   : > { %1856 = vmatmul.bf16.gmra.mxu3 %v2149_v45 }
 0x236   : > { %1223 = vmatmul.bf16.gmra.mxu1 %v2081_v13 }
 0x238   : > { %1861 = vmatmul.bf16.gmra.mxu3 %v2153_v56 }
 0x246   : > { %1228 = vmatmul.bf16.gmra.mxu1 %v2085_v40 }
 0x248   : > { %1866 = vmatmul.bf16.gmra.mxu3 %v2157_v30 }
 0x293   : > { %v1214_v24 = vpop.f32.mrf.mxu1 }
 0x294   : > { %v1234_v63 = vadd.f32 %v1214_v24, %v566_v25 }
 0x29b   : > { %v1216_v3 = vpop.f32.mrf.mxu1  ;;  %v1852_v14 = vpop.f32.mrf.mxu3 }
 0x29c   : > { %v1872_v58 = vadd.f32 %v1852_v14, %v1234_v63  ;;  %v1235_v7 = vadd.f32 %v1216_v3, %v571_v27 }
 0x29e   : > { %1896 = vst [vmem:[%s4279_s19] sm:$0xff] %v1872_v58 }
 0x2a3   : > { %v1219_v46 = vpop.f32.mrf.mxu1  ;;  %v1854_v15 = vpop.f32.mrf.mxu3 }
 0x2a4   : > { %v1873_v49 = vadd.f32 %v1854_v15, %v1235_v7  ;;  %v1236_v12 = vadd.f32 %v1219_v46, %v576_v6 }
 0x2a6   : > { %1897 = vst [vmem:[%s4279_s19 + $0x8] sm:$0xff] %v1873_v49 }
 0x2ab   : > { %v1221_v41 = vpop.f32.mrf.mxu1  ;;  %v1857_v5 = vpop.f32.mrf.mxu3 }
 0x2ac   : > { %v1874_v17 = vadd.f32 %v1857_v5, %v1236_v12  ;;  %v1237_v11 = vadd.f32 %v1221_v41, %v581_v10 }
 0x2ae   : > { %1898 = vst [vmem:[%s4279_s19 + $0x10] sm:$0xff] %v1874_v17 }
 0x2b3   : > { %v1224_v50 = vpop.f32.mrf.mxu1  ;;  %v1859_v34 = vpop.f32.mrf.mxu3 }
 0x2b4   : > { %v1875_v23 = vadd.f32 %v1859_v34, %v1237_v11  ;;  %v1238_v52 = vadd.f32 %v1224_v50, %v586_v16 }
 0x2b6   : > { %1899 = vst [vmem:[%s4279_s19 + $0x18] sm:$0xff] %v1875_v23 }
 0x2bb   : > { %v1226_v22 = vpop.f32.mrf.mxu1  ;;  %v1862_v44 = vpop.f32.mrf.mxu3 }
 0x2bc   : > { %v1876_v4 = vadd.f32 %v1862_v44, %v1238_v52  ;;  %v1239_v28 = vadd.f32 %v1226_v22, %v591_v35 }
 0x2be   : > { %1900 = vst [vmem:[%s4279_s19 + $0x20] sm:$0xff] %v1876_v4 }
 0x2c3   : > { %v1864_v37 = vpop.f32.mrf.mxu3  ;;  %v1229_v60 = vpop.f32.mrf.mxu1 }
 0x2c4   : > { %v1877_v32 = vadd.f32 %v1864_v37, %v1239_v28  ;;  %v1240_v36 = vadd.f32 %v1229_v60, %v596_v9 }
 0x2c6   : > { %1901 = vst [vmem:[%s4279_s19 + $0x28] sm:$0xff] %v1877_v32 }
 0x2cb   : > { %v1867_v39 = vpop.f32.mrf.mxu3  ;;  %v1231_v53 = vpop.f32.mrf.mxu1 }
 0x2cc   : > { %v1878_v0 = vadd.f32 %v1867_v39, %v1240_v36  ;;  %v1241_v62 = vadd.f32 %v1231_v53, %v601_v1 }
 0x2ce   : > { %1902 = vst [vmem:[%s4279_s19 + $0x30] sm:$0xff] %v1878_v0 }
 0x2d3   : > { %v1869_v43 = vpop.f32.mrf.mxu3 }
 0x2d4   : > { %v1879_v42 = vadd.f32 %v1869_v43, %v1241_v62 }
 0x2d6   : > { %1903 = vst [vmem:[%s4279_s19 + $0x38] sm:$0xff] %v1879_v42 }
 0x2d7   : > { %2425 = shalt.err (!%p2422_p7)
}
 0x2d8   : > { %s2496_s19 = smov 128   ;;  %s2497_s13 = smov 256  }
 0x2d9   : > { %s2498_s27 = smov 8  }
 0x2da   : > { %2187 = dma.vmem_to_hbm [thread:$0]  (%p2599_p8), %s1919_s17, 1024, %s1921_s18, %s1905_s28, %s2496_s19, %s2497_s13, %s2498_s27  }
 0x2db PF: > { %p2193_p10 = scmp.ge.s32.totalorder %s2492_s8, 2  ;;  %s1935_s21 = sand.u32 1, %s2464_s24  }
 0x2dc   : > { %s1936_s12 = scalar_lea.sflag [#allocation5], %s1935_s21 }
 0x2dd   : > { %p2190_p11 = pnand %p2193_p10, %p2603_p9 }
 0x2df   : > { %p2191_p12 = pneg %p2190_p11 }
 0x2e1   : > { %2459 = dma.done.wait (%p2191_p12), %s1936_s12, 1024  }
 0x2e2   : > { %2461 = vsyncadd (%p2191_p12), %s1936_s12, 4294966272  ;;  %s20_s8 = sadd.s32 1, %s2492_s8   ;;  %s4653_s15 = sld [smem:[#allocation7_spill]] }
 0x2e3   : > { %p17_p13 = scmp.ge.s32.totalorder %s20_s8, 6   ;;  %s4654_s24 = smov %s2468_s25 }
 0x2e4   : > { %s4655_s25 = smov %s2472_s26  ;;  %s4656_s26 = smov %s2611_s20 }
 0x2e5   : > { %s4657_s27 = smov %s2484_s29  ;;  %s4658_s28 = smov %s2488_s30 }
 0x2e6   : > { %s4659_s29 = smov %s4662_s11  ;;  %19 = sbr.rel (!%p17_p13) target bundleno = 5 (0x5), region = 126 }
 0x2e8   : > { %s4660_s30 = smov %s4653_s15 }
 0x2eb   :  { %1942 = vsyncpa [#allocation5], 1 }
 0x2ec   :  { %1944 = vsyncpa [#allocation5 + $0x1], 1 }

// kernel: tpu_custom_call.1
= control target key start
LH: loop header
LB: loop body
LE: loop exit
PB: predicated region body
PF: predicated region fallthrough
CT: control target
= control target key end

     0   :  { %12 = vsyncpa [#allocation5], 0  ;;  %s4335_s0 = inlined_call_operand.vmem [shape: f32[2,64,200], index: 0, kind: input, shape index: {}]   ;;  %s4336_s1 = inlined_call_operand.vmem [shape: f32[64,1], index: 1, kind: input, shape index: {}]   ;;  %s4337_s2 = inlined_call_operand.vmem [shape: f32[64,1], index: 2, kind: input, shape index: {}]   ;;  %s4338_s3 = inlined_call_operand.vmem [shape: bf16[256,64], index: 3, kind: input, shape index: {}]   ;;  %s4339_s4 = inlined_call_operand.vmem [shape: f32[256,1], index: 4, kind: input, shape index: {}]   ;;  %s4340_s5 = inlined_call_operand.vmem [shape: bf16[64,256], index: 5, kind: input, shape index: {}]   ;;  %s4341_s6 = inlined_call_operand.vmem [shape: f32[64,1], index: 6, kind: input, shape index: {}]   ;;  %s4342_s7 = inlined_call_operand.hbm [shape: f32[2,64,200], index: 7, kind: output, shape index: {}]  }
   0x1   :  { %14 = vsyncpa [#allocation5 + $0x1], 0  ;;  %s2539_s24 = smov 0   ;;  %s2541_s25 = smov 0  }
   0x2   :  { %s2543_s26 = smov 0   ;;  %s2545_s27 = smov 0  }
   0x3   :  { %s2547_s28 = smov 0   ;;  %s2549_s29 = smov 0  }
   0x4   :  { %s2551_s30 = smov 0   ;;  %s2553_s8 = smov 0  }
   0x5 LB: > { %s2004_s9 = sadd.s32 4294967295, %s2492_s8   ;;  %s2005_s10 = sadd.s32 4294967294, %s2492_s8   ;;  %s2492_s8 = sphi %s2553_s8, %s20_s8   ;;  %s2488_s30 = sphi %s2551_s30, %s4660_s30   ;;  %s2484_s29 = sphi %s2549_s29, %s4659_s29   ;;  %s2480_s28 = sphi %s2547_s28, %s4658_s28   ;;  %s2476_s27 = sphi %s2545_s27, %s4657_s27   ;;  %s2472_s26 = sphi %s2543_s26, %s4656_s26   ;;  %s2468_s25 = sphi %s2541_s25, %s4655_s25   ;;  %s2464_s24 = sphi %s2539_s24, %s4654_s24  }
   0x6   : > { %s29_s11 = sadd.s32 1, %s2484_s29  ;;  %s32_s12 = sadd.s32 1, %s2488_s30 }
   0x7   : > { %p30_p0 = scmp.ge.s32.totalorder %s29_s11, 2  ;;  %p48_p1 = scmp.ne.s32.totalorder %s2472_s26, %s2468_s25 }
   0x8   : > { %p49_p2 = scmp.eq.s32.totalorder %s2492_s8, 0  ;;  %p206_p5 = scmp.eq.s32.totalorder %s2004_s9, 3 }
   0x9   : > { %s4662_s11 = smov (%p30_p0, %s29_s11), 0  ;;  %s4664_s12 = smov (!%p30_p0, %s32_s12), %s2488_s30 }
   0xa   : > { %s37_s13 = ssub.s32 %s2484_s29, %s4662_s11  ;;  %p2591_p3 = por %p49_p2, %p48_p1 }
   0xb   : > { %p34_p4 = scmp.ge.s32.totalorder %s4664_s12, 2  ;;  %p211_p6 = scmp.ne.s32.totalorder %s2468_s25, %s2464_s24 }
   0xc   : > { %p212_p7 = scmp.eq.s32.totalorder %s2005_s10, 3  ;;  %p2599_p8 = por %p206_p5, %p48_p1 }
   0xd   : > { %s4666_s12 = smov (%p34_p4, %s4664_s12), 0  ;;  %s41_s19 = sadd.s32 1, %s2472_s26 }
   0xe   : > { %4388 = sst [smem:[#allocation7_spill]] %s4666_s12  ;;  %p2603_p9 = por %p212_p7, %p211_p6 }
   0xf   : > { %s36_s17 = ssub.s32 %s2488_s30, %s4666_s12  ;;  %p2007_p11 = scmp.ge.s32.totalorder %s2492_s8, 4 }
  0x10   : > { %s38_s18 = sor.u32 %s37_s13, %s36_s17 }
  0x11   : > { %p39_p10 = scmp.eq.s32.totalorder %s38_s18, 0  ;;  %246 = sbr.rel (%p2007_p11) target bundleno = 36 (0x24), region = 40 }
  0x13   : > { %s2611_s20 = scalar_select %p39_p10, %s2472_s26, %s41_s19  }
  0x16   : > { %249 = sbr.rel (!%p2591_p3) target bundleno = 36 (0x24), region = 44  ;;  %s251_s21 = sand.u32 (%p2591_p3), 1, %s2472_s26  }
  0x17   : > { %s2009_s22 = sshll.u32 (%p2591_p3), %s2488_s30, 4  ;;  %s2008_s23 = sshll.u32 (%p2591_p3), %s251_s21, 6 }
  0x18   : > { %s255_s9 = sadd.s32 (%p2591_p3), %s2484_s29, %s2009_s22  ;;  %s253_s18 = scalar_lea.vmem (%p2591_p3), [#allocation3], %s2008_s23 }
  0x19   : > { %s2010_s10 = sshll.u32 (%p2591_p3), %s255_s9, 3 }
  0x1a   : > { %s257_s17 = scalar_lea.vmem (%p2591_p3), %s4335_s0, %s2010_s10 }
  0x1b   : > { %v300_v0 = vld [vmem:[%s257_s17] sm:$0xff]  ;;  %v302_v1 = vld [vmem:[%s257_s17 + $0x10] sm:$0xff] }
  0x1c   : > { %v304_v2 = vld [vmem:[%s257_s17 + $0x20] sm:$0xff]  ;;  %301 = vst [vmem:[%s253_s18] sm:$0xff] %v300_v0  ;;  %v306_v3 = vld [vmem:[%s257_s17 + $0x30] sm:$0xff] }
  0x1d   : > { %303 = vst [vmem:[%s253_s18 + $0x8] sm:$0xff] %v302_v1  ;;  %v308_v4 = vld [vmem:[%s257_s17 + $0x40] sm:$0xff]  ;;  %v310_v5 = vld [vmem:[%s257_s17 + $0x50] sm:$0xff] }
  0x1e   : > { %305 = vst [vmem:[%s253_s18 + $0x10] sm:$0xff] %v304_v2  ;;  %v312_v6 = vld [vmem:[%s257_s17 + $0x60] sm:$0xff]  ;;  %v314_v7 = vld [vmem:[%s257_s17 + $0x70] sm:$0xff] }
  0x1f   : > { %307 = vst [vmem:[%s253_s18 + $0x18] sm:$0xff] %v306_v3 }
  0x20   : > { %309 = vst [vmem:[%s253_s18 + $0x20] sm:$0xff] %v308_v4 }
  0x21   : > { %311 = vst [vmem:[%s253_s18 + $0x28] sm:$0xff] %v310_v5 }
  0x22   : > { %313 = vst [vmem:[%s253_s18 + $0x30] sm:$0xff] %v312_v6 }
  0x23   : > { %315 = vst [vmem:[%s253_s18 + $0x38] sm:$0xff] %v314_v7 }
  0x24 PF: > { %p2011_p12 = scmp.ge.s32.totalorder %s2492_s8, 1  ;;  %p320_p13 = scmp.lt.s32.totalorder %s2492_s8, 5 }
  0x26   : > { %p321_p0 = pnand %p2011_p12, %p320_p13 }
  0x28   : > { %324 = sbr.rel (%p321_p0) target bundleno = 731 (0x2db), region = 82 }
  0x2d   : > { %v501_v8 = vld [vmem:[%s4337_s2 + $0x30] sm:$0xff]  ;;  %v443_v10 = vld [vmem:[%s4336_s1 + $0x20] sm:$0xff]  ;;  %v2494_v11 = vmov 0   ;;  %v502_v12 = vld [vmem:[%s4337_s2 + $0x38] sm:$0xff]  ;;  %s4386_s10 = sand.u32 1, %s2468_s25   ;;  %v2495_v54 = vmov 64.0  }
  0x2e   : > { %v445_v9 = vld [vmem:[%s4336_s1 + $0x30] sm:$0xff]  ;;  %2265 = vset.pattern.permute.xlu2 %v2494_v11  ;;  %2264 = vset.pattern.permute.xlu1 %v2494_v11  ;;  %v446_v13 = vld [vmem:[%s4336_s1 + $0x38] sm:$0xff]  ;;  %v444_v14 = vld [vmem:[%s4336_s1 + $0x28] sm:$0xff]  ;;  %s2663_s21 = sshll.u32 %s4386_s10, 6  ;;  %2266 = vrcp.f32 %v2495_v54  ;;  %vm763_vm4 = vcmask 523264  }
  0x2f   : > { %2263 = vset.pattern.permute.xlu0 %v2494_v11  ;;  %535 = vperm.xlu1 %2264, %v501_v8   ;;  %v500_v15 = vld [vmem:[%s4337_s2 + $0x28] sm:$0xff]  ;;  %v499_v16 = vld [vmem:[%s4337_s2 + $0x20] sm:$0xff]  ;;  %v441_v17 = vld [vmem:[%s4336_s1 + $0x10] sm:$0xff]  ;;  %s2669_s9 = scalar_lea.vmem [#allocation3], %s2663_s21  ;;  %s4279_s19 = scalar_lea.vmem [#allocation4], %s2663_s21 }
  0x30   : > { %479 = vperm.xlu0 %2263, %v445_v9   ;;  %469 = vperm.xlu2 %2265, %v443_v10   ;;  %v497_v18 = vld [vmem:[%s4337_s2 + $0x10] sm:$0xff]  ;;  %v442_v19 = vld [vmem:[%s4336_s1 + $0x18] sm:$0xff]  ;;  %v440_v21 = vld [vmem:[%s4336_s1 + $0x8] sm:$0xff]  ;;  %s2159_s21 = sshll.u32 %s2480_s28, 4  ;;  %s1918_s17 = sshll.u32 %s4279_s19, 4  ;;  %s1919_s17 = int_to_ptr.vmem [resolvable:$true] %s1918_s17 }
  0x31   : > { %v498_v20 = vld [vmem:[%s4337_s2 + $0x18] sm:$0xff]  ;;  %v2672_v22 = vld [vmem:[%s2669_s9] sm:$0xff]  ;;  %v2675_v23 = vld [vmem:[%s2669_s9 + $0x8] sm:$0xff]  ;;  %s1915_s22 = sadd.s32 %s2476_s27, %s2159_s21  ;;  %s4652_s27 = sand.u32 1, %s2468_s25  }
  0x32   : > { %v495_v24 = vld [vmem:[%s4337_s2] sm:$0xff]  ;;  %v367_v26 = vadd.f32 %v2675_v23, %v2672_v22  ;;  %v388_v27 = vmul.f32 %v2672_v22, %v2672_v22  ;;  %v389_v28 = vmul.f32 %v2675_v23, %v2675_v23  ;;  %v2690_v29 = vld [vmem:[%s2669_s9 + $0x10] sm:$0xff]  ;;  %v2696_v33 = vld [vmem:[%s2669_s9 + $0x18] sm:$0xff]  ;;  %s2160_s23 = sshll.u32 %s1915_s22, 3  ;;  %s1905_s28 = scalar_lea.sflag [#allocation5], %s4652_s27 }
  0x33   : > { %v439_v25 = vld [vmem:[%s4336_s1] sm:$0xff]  ;;  %v390_v31 = vmul.f32 %v2690_v29, %v2690_v29  ;;  %v391_v35 = vmul.f32 %v2696_v33, %v2696_v33  ;;  %v1280_v41 = vld [vmem:[%s4339_s4 + $0xf0] sm:$0xff]  ;;  %v2711_v42 = vld [vmem:[%s2669_s9 + $0x28] sm:$0xff]  ;;  %s1917_s13 = scalar_lea.hbm %s4342_s7, %s2160_s23  ;;  %s2418_s23 = scalar_lea.hbm %s4342_s7, 256 }
  0x34   : > { %v368_v30 = vadd.f32 %v367_v26, %v2690_v29  ;;  %v396_v32 = vadd.f32 %v389_v28, %v388_v27  ;;  %v2702_v37 = vld [vmem:[%s2669_s9 + $0x20] sm:$0xff]  ;;  %v1281_v43 = vld [vmem:[%s4339_s4 + $0xf8] sm:$0xff]  ;;  %v496_v44 = vld [vmem:[%s4337_s2 + $0x8] sm:$0xff]  ;;  %v393_v46 = vmul.f32 %v2711_v42, %v2711_v42  ;;  %v2267_v62 = vpop.eup %2266  ;;  %s1920_s18 = sshll.u32 %s1917_s13, 4  ;;  %s1921_s18 = int_to_ptr.hbm [resolvable:$true] %s1920_s18 }
  0x35   : > { %v392_v39 = vmul.f32 %v2702_v37, %v2702_v37  ;;  %v2723_v48 = vld [vmem:[%s2669_s9 + $0x30] sm:$0xff]  ;;  %v2729_v52 = vld [vmem:[%s2669_s9 + $0x38] sm:$0xff]  ;;  %v1278_v58 = vld [vmem:[%s4339_s4 + $0xe0] sm:$0xff]  ;;  %v381_v1 = vmul.f32 64.0, %v2267_v62  ;;  %vm385_vm0 = vweird.f32 %v2267_v62  ;;  %s2412_s12 = sshra.s32 %s1921_s18, 4  ;;  %s2413_s12 = int_to_ptr.hbm [resolvable:$true] %s2412_s12 }
  0x36   : > { %v369_v34 = vadd.f32 %v368_v30, %v2696_v33  ;;  %v397_v36 = vadd.f32 %v396_v32, %v390_v31  ;;  %v394_v50 = vmul.f32 %v2723_v48, %v2723_v48  ;;  %v395_v55 = vmul.f32 %v2729_v52, %v2729_v52  ;;  %v642_v57 = vld [vmem:[%s4339_s4 + $0x78] sm:$0xff]  ;;  %v641_v59 = vld [vmem:[%s4339_s4 + $0x70] sm:$0xff]  ;;  %v639_v2 = vld [vmem:[%s4339_s4 + $0x60] sm:$0xff]  ;;  %s2414_s14 = scalar_lea.hbm %s2413_s12, 64  ;;  %p2419_p4 = scmp.lt.s32.totalorder %s2413_s12, %s4342_s7 }
  0x37   : > { %540 = vperm.xlu1 %2264, %v502_v12   ;;  %v640_v3 = vld [vmem:[%s4339_s4 + $0x68] sm:$0xff]  ;;  %v382_v7 = vsub.f32 1.0, %v381_v1  ;;  %v1277_v11 = vld [vmem:[%s4339_s4 + $0xd8] sm:$0xff]  ;;  %v637_v12 = vld [vmem:[%s4339_s4 + $0x50] sm:$0xff]  ;;  %p2415_p1 = scmp.ne.s32.totalorder %s2413_s12, %s2414_s14  ;;  %p2420_p5 = scmp.lt.s32.totalorder %s2418_s23, %s2414_s14 }
  0x38   : > { %484 = vperm.xlu0 %2263, %v446_v13   ;;  %474 = vperm.xlu2 %2265, %v444_v14   ;;  %v370_v38 = vadd.f32 %v369_v34, %v2702_v37  ;;  %v398_v40 = vadd.f32 %v397_v36, %v391_v35  ;;  %v1279_v4 = vld [vmem:[%s4339_s4 + $0xe8] sm:$0xff]  ;;  %v1276_v13 = vld [vmem:[%s4339_s4 + $0xd0] sm:$0xff]  ;;  %v635_v32 = vld [vmem:[%s4339_s4 + $0x40] sm:$0xff] }
  0x39   : > { %v383_v10 = vmul.f32 %v2267_v62, %v382_v7  ;;  %v636_v30 = vld [vmem:[%s4339_s4 + $0x48] sm:$0xff]  ;;  %v1272_v31 = vld [vmem:[%s4339_s4 + $0xb0] sm:$0xff]  ;;  %v630_v54 = vld [vmem:[%s4339_s4 + $0x18] sm:$0xff]  ;;  %p2416_p2 = pnand %p2415_p1, %p2599_p8  ;;  %p2421_p6 = por %p2420_p5, %p2419_p4 }
  0x3a   : > { %v371_v45 = vadd.f32 %v370_v38, %v2711_v42  ;;  %v399_v47 = vadd.f32 %v398_v40, %v392_v39  ;;  %v633_v36 = vld [vmem:[%s4339_s4 + $0x30] sm:$0xff]  ;;  %v634_v38 = vld [vmem:[%s4339_s4 + $0x38] sm:$0xff] }
  0x3b   : > { %v1273_v39 = vld [vmem:[%s4339_s4 + $0xb8] sm:$0xff]  ;;  %p2417_p3 = pneg %p2416_p2 }
  0x3c   : > { %v372_v49 = vadd.f32 %v371_v45, %v2723_v48  ;;  %v400_v51 = vadd.f32 %v399_v47, %v393_v46  ;;  %v1268_v47 = vld [vmem:[%s4339_s4 + $0x90] sm:$0xff] }
  0x3d   : > { %p2422_p7 = pnand %p2421_p6, %p2417_p3 }
  0x3e   : > { %v373_v53 = vadd.f32 %v372_v49, %v2729_v52  ;;  %v401_v56 = vadd.f32 %v400_v51, %v394_v50  ;;  %v1269_v49 = vld [vmem:[%s4339_s4 + $0x98] sm:$0xff]  ;;  %v632_v50 = vld [vmem:[%s4339_s4 + $0x28] sm:$0xff] }
  0x3f   : > { %530 = vperm.xlu1 %2264, %v500_v15  }
  0x40   : > { %525 = vperm.xlu0 %2263, %v499_v16   ;;  %459 = vperm.xlu2 %2265, %v441_v17   ;;  %v374_v60 = vrot.slane %v373_v53, 4  ;;  %v402_v61 = vadd.f32 %v401_v56, %v395_v55  ;;  %v384_v16 = vadd.f32 %v2267_v62, %v383_v10  ;;  %v1266_v55 = vld [vmem:[%s4339_s4 + $0x80] sm:$0xff]  ;;  %v629_v56 = vld [vmem:[%s4339_s4 + $0x10] sm:$0xff] }
  0x42   : > { %v375_v63 = vadd.f32 %v374_v60, %v373_v53  ;;  %v403_v0 = vrot.slane %v402_v61, 4 }
  0x44   : > { %v376_v5 = vrot.slane %v375_v63, 2  ;;  %v404_v6 = vadd.f32 %v403_v0, %v402_v61  ;;  %v627_v0 = vld [vmem:[%s4339_s4] sm:$0xff] }
  0x46   : > { %v377_v8 = vadd.f32 %v376_v5, %v375_v63  ;;  %v405_v9 = vrot.slane %v404_v6, 2 }
  0x47   : > { %515 = vperm.xlu1 %2264, %v497_v18  }
  0x48   : > { %464 = vperm.xlu0 %2263, %v442_v19   ;;  %520 = vperm.xlu2 %2265, %v498_v20   ;;  %v378_v14 = vrot.slane %v377_v8, 1  ;;  %v406_v15 = vadd.f32 %v405_v9, %v404_v6  ;;  %v386_v19 = vsel %vm385_vm0, %v2267_v62, %v384_v16  ;;  %v1274_v20 = vld [vmem:[%s4339_s4 + $0xc0] sm:$0xff] }
  0x4a   : > { %v379_v17 = vadd.f32 %v378_v14, %v377_v8  ;;  %v407_v18 = vrot.slane %v406_v15, 1 }
  0x4c   : > { %v408_v26 = vadd.f32 %v407_v18, %v406_v15 }
  0x4e   : > { %v409_v27 = vmul.f32 %v408_v26, %v386_v19 }
  0x4f   : > { %454 = vperm.xlu1 %2264, %v440_v21   ;;  %v1275_v21 = vld [vmem:[%s4339_s4 + $0xc8] sm:$0xff] }
  0x50   : > { %505 = vperm.xlu2 %2265, %v495_v24   ;;  %449 = vperm.xlu0 %2263, %v439_v25   ;;  %v638_v24 = vld [vmem:[%s4339_s4 + $0x58] sm:$0xff]  ;;  %v2770_v25 = vmul.f32 %v386_v19, %v379_v17 }
  0x52   : > { %v410_v28 = vmul.f32 %v2770_v25, %v2770_v25  ;;  %v418_v60 = vsub.f32 %v2723_v48, %v2770_v25  ;;  %v419_v63 = vsub.f32 %v2729_v52, %v2770_v25  ;;  %v1267_v48 = vld [vmem:[%s4339_s4 + $0x88] sm:$0xff]  ;;  %v417_v52 = vsub.f32 %v2711_v42, %v2770_v25  ;;  %v557_v42 = vld [vmem:[%s4341_s6 + $0x10] sm:$0xff] }
  0x53   : > { %v416_v5 = vsub.f32 %v2702_v37, %v2770_v25  ;;  %v555_v37 = vld [vmem:[%s4341_s6] sm:$0xff] }
  0x54   : > { %v411_v34 = vsub.f32 %v409_v27, %v410_v28  ;;  %v415_v27 = vsub.f32 %v2696_v33, %v2770_v25 }
  0x56   : > { %v420_v35 = vadd.f32 1e-05, %v411_v34 }
  0x57   : > { %1354 = vperm.xlu1 %2264, %v1280_v41   ;;  %v1271_v41 = vld [vmem:[%s4339_s4 + $0xa8] sm:$0xff] }
  0x58   : > { %1359 = vperm.xlu2 %2265, %v1281_v43   ;;  %510 = vperm.xlu0 %2263, %v496_v44   ;;  %2268 = vrsqrt.f32 %v420_v35  ;;  %v631_v43 = vld [vmem:[%s4339_s4 + $0x20] sm:$0xff]  ;;  %vm427_vm1 = vweird.f32 %v420_v35 }
  0x59   : > { %v1270_v44 = vld [vmem:[%s4339_s4 + $0xa0] sm:$0xff] }
  0x5e   : > { %v2269_v40 = vpop.eup %2268 }
  0x5f   : > { %720 = vperm.xlu1 %2264, %v642_v57   ;;  %v422_v45 = vmul.f32 %v2269_v40, %v420_v35  ;;  %vm428_vm2 = vweird.f32 %v2269_v40 }
  0x60   : > { %1344 = vperm.xlu2 %2265, %v1278_v58   ;;  %715 = vperm.xlu0 %2263, %v641_v59   ;;  %vm429_vm3 = vmor %vm427_vm1, %vm428_vm2 }
  0x61   : > { %v423_v46 = vmul.f32 %v2269_v40, %v422_v45 }
  0x63   : > { %v424_v51 = vmul.f32 0.5, %v423_v46  ;;  %v412_v46 = vsub.f32 %v2672_v22, %v2770_v25 }
  0x65   : > { %v425_v53 = vsub.f32 1.5, %v424_v51 }
  0x67   : > { %705 = vperm.xlu1 %2264, %v639_v2   ;;  %v426_v58 = vmul.f32 %v2269_v40, %v425_v53  ;;  %v628_v2 = vld [vmem:[%s4339_s4 + $0x8] sm:$0xff] }
  0x68   : > { %710 = vperm.xlu2 %2265, %v640_v3   ;;  %1349 = vperm.xlu0 %2263, %v1279_v4  }
  0x69   : > { %v2821_v61 = vsel %vm429_vm3, %v2269_v40, %v426_v58 }
  0x6a   : > { %v437_v1 = vmul.f32 %v2821_v61, %v418_v60  ;;  %v438_v3 = vmul.f32 %v2821_v61, %v419_v63  ;;  %v436_v10 = vmul.f32 %v2821_v61, %v417_v52  ;;  %v2163_v60 = vld [vmem:[%s4338_s3] sm:$0xff]  ;;  %v2177_v63 = vld [vmem:[%s4338_s3 + $0x50] sm:$0xff] }
  0x6f   : > { %1339 = vperm.xlu1 %2264, %v1277_v11   ;;  %v556_v11 = vld [vmem:[%s4341_s6 + $0x8] sm:$0xff] }
  0x70   : > { %695 = vperm.xlu2 %2265, %v637_v12   ;;  %1334 = vperm.xlu0 %2263, %v1276_v13   ;;  %v435_v12 = vmul.f32 %v2821_v61, %v416_v5 }
  0x77   : > { %1324 = vperm.xlu1 %2264, %v1274_v20  }
  0x78   : > { %1329 = vperm.xlu2 %2265, %v1275_v21   ;;  %700 = vperm.xlu0 %2263, %v638_v24   ;;  %v414_v24 = vsub.f32 %v2690_v29, %v2770_v25  ;;  %v434_v29 = vmul.f32 %v2821_v61, %v415_v27 }
  0x7a   : > { %v433_v34 = vmul.f32 %v2821_v61, %v414_v24 }
  0x7f   : > { %690 = vperm.xlu1 %2264, %v636_v30   ;;  %v560_v30 = vld [vmem:[%s4341_s6 + $0x28] sm:$0xff] }
  0x80   : > { %1314 = vperm.xlu2 %2265, %v1272_v31   ;;  %685 = vperm.xlu0 %2263, %v635_v32   ;;  %v559_v31 = vld [vmem:[%s4341_s6 + $0x20] sm:$0xff]  ;;  %v558_v32 = vld [vmem:[%s4341_s6 + $0x18] sm:$0xff] }
  0x87   : > { %675 = vperm.xlu1 %2264, %v633_v36  }
  0x88   : > { %680 = vperm.xlu2 %2265, %v634_v38   ;;  %1319 = vperm.xlu0 %2263, %v1273_v39  }
  0x8a   : > { %v470_v57 = vpop.permute.xlu2 %469 }
  0x8b   : > { %v491_v17 = vmul.f32 %v470_v57, %v435_v12 }
  0x8f   : > { %1309 = vperm.xlu1 %2264, %v1271_v41  }
  0x90   : > { %665 = vperm.xlu2 %2265, %v631_v43   ;;  %1304 = vperm.xlu0 %2263, %v1270_v44   ;;  %v562_v43 = vld [vmem:[%s4341_s6 + $0x38] sm:$0xff]  ;;  %v561_v44 = vld [vmem:[%s4341_s6 + $0x30] sm:$0xff] }
  0x92   : > { %v475_v4 = vpop.permute.xlu2 %474 }
  0x93   : > { %v492_v16 = vmul.f32 %v475_v4, %v436_v10 }
  0x97   : > { %1294 = vperm.xlu1 %2264, %v1268_v47   ;;  %v413_v47 = vsub.f32 %v2675_v23, %v2770_v25  ;;  %v2175_v23 = vld [vmem:[%s4338_s3 + $0x40] sm:$0xff]  ;;  %v2164_v25 = vld [vmem:[%s4338_s3 + $0x8] sm:$0xff] }
  0x98   : > { %1299 = vperm.xlu2 %2265, %v1269_v49   ;;  %670 = vperm.xlu0 %2263, %v632_v50   ;;  %v431_v50 = vmul.f32 %v2821_v61, %v412_v46 }
  0x99   : > { %v432_v51 = vmul.f32 %v2821_v61, %v413_v47  ;;  %v2176_v61 = vld [vmem:[%s4338_s3 + $0x48] sm:$0xff] }
  0x9a   : > { %v460_v19 = vpop.permute.xlu2 %459 }
  0x9b   : > { %v489_v36 = vmul.f32 %v460_v19, %v433_v34  ;;  %v2169_v19 = vld [vmem:[%s4338_s3 + $0x30] sm:$0xff] }
  0x9f   : > { %660 = vperm.xlu1 %2264, %v630_v54  }
  0xa0   : > { %1284 = vperm.xlu2 %2265, %v1266_v55   ;;  %655 = vperm.xlu0 %2263, %v629_v56  }
  0xa1   : > { %v536_v59 = vpop.permute.xlu1 %535 }
  0xa2   : > { %v480_v62 = vpop.permute.xlu0 %479  ;;  %v521_v39 = vpop.permute.xlu2 %520 }
  0xa3   : > { %v493_v6 = vmul.f32 %v480_v62, %v437_v1  ;;  %v2165_v62 = vld [vmem:[%s4338_s3 + $0x10] sm:$0xff] }
  0xa5   : > { %v549_v13 = vadd.f32 %v536_v59, %v493_v6 }
  0xa7   : > { %645 = vperm.xlu1 %2264, %v627_v0  }
  0xa8   : > { %650 = vperm.xlu2 %2265, %v628_v2   ;;  %1289 = vperm.xlu0 %2263, %v1267_v48   ;;  %v2166_v48 = vld [vmem:[%s4338_s3 + $0x18] sm:$0xff] }
  0xa9   : > { %v541_v7 = vpop.permute.xlu1 %540 }
  0xaa   : > { %v485_v8 = vpop.permute.xlu0 %484  ;;  %v506_v56 = vpop.permute.xlu2 %505 }
  0xab   : > { %v494_v9 = vmul.f32 %v485_v8, %v438_v3  ;;  %v2178_v3 = vld [vmem:[%s4338_s3 + $0x58] sm:$0xff]  ;;  %v2179_v8 = vld [vmem:[%s4338_s3 + $0x60] sm:$0xff] }
  0xad   : > { %v550_v14 = vadd.f32 %v541_v7, %v494_v9  ;;  %v2167_v7 = vld [vmem:[%s4338_s3 + $0x20] sm:$0xff] }
  0xaf   : > { %570 = vperm.xlu1 %2264, %v556_v11   ;;  %v554_v15 = vpack.c.bf16 %v550_v14, %v549_v13  ;;  %v2168_v14 = vld [vmem:[%s4338_s3 + $0x28] sm:$0xff] }
  0xb0   : > { %575 = vperm.xlu2 %2265, %v557_v42   ;;  %565 = vperm.xlu0 %2263, %v555_v37   ;;  %v2180_v42 = vld [vmem:[%s4338_s3 + $0x68] sm:$0xff] }
  0xb1   : > { %792 = vmatpush.bf16.msra.mxu0 %v554_v15  ;;  %1430 = vmatpush.bf16.msra.mxu2 %v554_v15  ;;  %v531_v18 = vpop.permute.xlu1 %530 }
  0xb2   : > { %v548_v20 = vadd.f32 %v531_v18, %v492_v16  ;;  %v526_v21 = vpop.permute.xlu0 %525  ;;  %v2904_v1 = vpop.permute.xlu2 %1359 }
  0xb3   : > { %v547_v26 = vadd.f32 %v526_v21, %v491_v17  ;;  %4392 = vst [vmem:[#allocation9_spill] sm:$0xff] %v2904_v1 }
  0xb5   : > { %v553_v28 = vpack.c.bf16 %v548_v20, %v547_v26  ;;  %v2181_v20 = vld [vmem:[%s4338_s3 + $0x70] sm:$0xff] }
  0xb7   : > { %793 = vmatpush.bf16.msra.mxu0 %v553_v28  ;;  %1431 = vmatpush.bf16.msra.mxu2 %v553_v28  ;;  %v2170_v28 = vld [vmem:[%s4338_s3 + $0x38] sm:$0xff] }
  0xb8   : > { %590 = vperm.xlu2 %2265, %v560_v30   ;;  %585 = vperm.xlu1 %2264, %v559_v31   ;;  %v2182_v30 = vld [vmem:[%s4338_s3 + $0x78] sm:$0xff] }
  0xb9   : > { %580 = vperm.xlu0 %2263, %v558_v32   ;;  %v516_v33 = vpop.permute.xlu1 %515 }
  0xba   : > { %v465_v35 = vpop.permute.xlu0 %464  ;;  %v545_v40 = vadd.f32 %v516_v33, %v489_v36  ;;  %v2916_v4 = vpop.permute.xlu2 %1344 }
  0xbb   : > { %v490_v38 = vmul.f32 %v465_v35, %v434_v29 }
  0xbd   : > { %v546_v41 = vadd.f32 %v521_v39, %v490_v38 }
  0xbf   : > { %v552_v45 = vpack.c.bf16 %v546_v41, %v545_v40 }
  0xc0   : > { %600 = vperm.xlu1 %2264, %v562_v43  }
  0xc1   : > { %595 = vperm.xlu0 %2263, %v561_v44   ;;  %794 = vmatpush.bf16.msra.mxu0 %v552_v45  ;;  %v455_v53 = vpop.permute.xlu1 %454 }
  0xc2   : > { %1432 = vmatpush.bf16.msra.mxu2 %v552_v45  ;;  %v450_v49 = vpop.permute.xlu0 %449  ;;  %v488_v55 = vmul.f32 %v455_v53, %v432_v51  ;;  %v2922_v6 = vpop.permute.xlu2 %710 }
  0xc3   : > { %v487_v54 = vmul.f32 %v450_v49, %v431_v50  ;;  %4395 = vst [vmem:[#allocation12_spill] sm:$0xff] %v2922_v6 }
  0xc5   : > { %v543_v58 = vadd.f32 %v506_v56, %v487_v54 }
  0xc9   : > { %v2900_v0 = vpop.permute.xlu1 %1354 }
  0xca   : > { %v511_v57 = vpop.permute.xlu0 %510  ;;  %4391 = vst [vmem:[#allocation8_spill] sm:$0xff] %v2900_v0  ;;  %v2936_v11 = vpop.permute.xlu2 %695 }
  0xcb   : > { %v544_v59 = vadd.f32 %v511_v57, %v488_v55 }
  0xcd   : > { %v551_v22 = vpack.c.bf16 %v544_v59, %v543_v58 }
  0xcf   : > { %795 = vmatpush.bf16.msra.mxu0 %v551_v22  ;;  %1433 = vmatpush.bf16.msra.mxu2 %v551_v22 }
  0xd1   : > { %v2906_v2 = vpop.permute.xlu1 %720 }
  0xd2   : > { %2046 = vmatmul.msk.bf16.vlgmr.msra.gmra.mxu0 %vm763_vm4, %v2163_v60  ;;  %2118 = vmatmul.msk.bf16.vlgmr.msra.gmra.mxu2 %vm763_vm4, %v2175_v23  ;;  %4393 = vst [vmem:[#allocation10_spill] sm:$0xff] %v2906_v2  ;;  %v2920_v5 = vpop.permute.xlu0 %715  ;;  %v2948_v37 = vpop.permute.xlu2 %1329 }
  0xd3   : > { %4394 = vst [vmem:[#allocation11_spill] sm:$0xff] %v2920_v5 }
  0xd9   : > { %v2918_v52 = vpop.permute.xlu1 %705 }
  0xda   : > { %v2934_v10 = vpop.permute.xlu0 %1349  ;;  %v2956_v17 = vpop.permute.xlu2 %1314 }
  0xdb   : > { %4396 = vst [vmem:[#allocation13_spill] sm:$0xff] %v2934_v10 }
  0xe1   : > { %v2930_v9 = vpop.permute.xlu1 %1339 }
  0xe2   : > { %2047 = vmatmul.msk.bf16.gmra.mxu0 %vm763_vm4, %v2164_v25  ;;  %2119 = vmatmul.msk.bf16.gmra.mxu2 %vm763_vm4, %v2176_v61  ;;  %v2940_v13 = vpop.permute.xlu0 %1334  ;;  %v2970_v24 = vpop.permute.xlu2 %680 }
  0xe9   : > { %v2938_v12 = vpop.permute.xlu1 %1324 }
  0xea   : > { %v2954_v16 = vpop.permute.xlu0 %700  ;;  %v666_v31 = vpop.permute.xlu2 %665 }
  0xf1   : > { %v2952_v15 = vpop.permute.xlu1 %690 }
  0xf2   : > { %2048 = vmatmul.msk.bf16.gmra.mxu0 %vm763_vm4, %v2165_v62  ;;  %2120 = vmatmul.msk.bf16.gmra.mxu2 %vm763_vm4, %v2177_v63  ;;  %v2966_v21 = vpop.permute.xlu0 %685  ;;  %v1300_v29 = vpop.permute.xlu2 %1299 }
  0xf9   : > { %v2958_v18 = vpop.permute.xlu1 %675 }
  0xfa   : > { %v2974_v27 = vpop.permute.xlu0 %1319  ;;  %v1285_v38 = vpop.permute.xlu2 %1284 }
 0x101   : > { %v2972_v26 = vpop.permute.xlu1 %1309 }
 0x102   : > { %2049 = vmatmul.msk.bf16.gmra.mxu0 %vm763_vm4, %v2166_v48  ;;  %2121 = vmatmul.msk.bf16.gmra.mxu2 %vm763_vm4, %v2178_v3  ;;  %v2984_v34 = vpop.permute.xlu0 %1304  ;;  %v651_v49 = vpop.permute.xlu2 %650 }
 0x109   : > { %v1295_v32 = vpop.permute.xlu1 %1294 }
 0x10a   : > { %v2986_v35 = vpop.permute.xlu0 %670 }
 0x111   : > { %v661_v33 = vpop.permute.xlu1 %660 }
 0x112   : > { %2050 = vmatmul.msk.bf16.gmra.mxu0 %vm763_vm4, %v2167_v7  ;;  %2122 = vmatmul.msk.bf16.gmra.mxu2 %vm763_vm4, %v2179_v8  ;;  %v656_v44 = vpop.permute.xlu0 %655 }
 0x119   : > { %v646_v39 = vpop.permute.xlu1 %645 }
 0x11a   : > { %v1290_v54 = vpop.permute.xlu0 %1289 }
 0x122   : > { %2051 = vmatmul.msk.bf16.gmra.mxu0 %vm763_vm4, %v2168_v14  ;;  %2123 = vmatmul.msk.bf16.gmra.mxu2 %vm763_vm4, %v2180_v42 }
 0x132   : > { %2052 = vmatmul.msk.bf16.gmra.mxu0 %vm763_vm4, %v2169_v19  ;;  %2124 = vmatmul.msk.bf16.gmra.mxu2 %vm763_vm4, %v2181_v20 }
 0x142   : > { %2053 = vmatmul.msk.bf16.gmra.mxu0 %vm763_vm4, %v2170_v28  ;;  %2125 = vmatmul.msk.bf16.gmra.mxu2 %vm763_vm4, %v2182_v30 }
 0x14f   : > { %v797_v36 = vpop.f32.mrf.mxu0 }
 0x150   : > { %v2988_v41 = vadd.f32 %v797_v36, %v646_v39 }
 0x152   : > { %v2054_v45 = vmul.f32 -1.442695, %v2988_v41 }
 0x154   : > { %2270 = vpow2.f32 %v2054_v45 }
 0x155   : > { %v1435_v40 = vpop.f32.mrf.mxu2 }
 0x156   : > { %v2991_v46 = vadd.f32 %v1435_v40, %v1285_v38 }
 0x157   : > { %v799_v43 = vpop.f32.mrf.mxu0 }
 0x158   : > { %v2126_v50 = vmul.f32 -1.442695, %v2991_v46  ;;  %v2994_v51 = vadd.f32 %v799_v43, %v651_v49 }
 0x15a   : > { %2272 = vpow2.f32 %v2126_v50  ;;  %v2055_v55 = vmul.f32 -1.442695, %v2994_v51  ;;  %v2271_v56 = vpop.eup %2270 }
 0x15b   : > { %v2999_v59 = vadd.f32 1.0, %v2271_v56 }
 0x15c   : > { %2274 = vpow2.f32 %v2055_v55 }
 0x15d   : > { %v1437_v47 = vpop.f32.mrf.mxu2  ;;  %2276 = vrcp.f32 %v2999_v59  ;;  %vm906_vm5 = vweird.f32 %v2999_v59 }
 0x15e   : > { %v2997_v57 = vadd.f32 %v1437_v47, %v1290_v54 }
 0x15f   : > { %v802_v53 = vpop.f32.mrf.mxu0 }
 0x160   : > { %v2127_v60 = vmul.f32 -1.442695, %v2997_v57  ;;  %v2273_v23 = vpop.eup %2272  ;;  %v3002_v25 = vadd.f32 %v802_v53, %v656_v44 }
 0x161   : > { %v3005_v61 = vadd.f32 1.0, %v2273_v23 }
 0x162   : > { %2278 = vpow2.f32 %v2127_v60  ;;  %v2275_v62 = vpop.eup %2274  ;;  %v2056_v63 = vmul.f32 -1.442695, %v3002_v25 }
 0x163   : > { %2280 = vrcp.f32 %v3005_v61  ;;  %v3013_v14 = vadd.f32 1.0, %v2275_v62  ;;  %v3015_v42 = vpop.eup %2276  ;;  %v910_v62 = vand.u32 2147483647, %v2999_v59  ;;  %vm1544_vm9 = vweird.f32 %v3005_v61 }
 0x164   : > { %2282 = vpow2.f32 %v2056_v63  ;;  %v902_v30 = vmul.f32 %v3015_v42, %v2999_v59  ;;  %vm907_vm6 = vweird.f32 %v3015_v42 }
 0x165   : > { %v1440_v58 = vpop.f32.mrf.mxu2  ;;  %2284 = vrcp.f32 %v3013_v14  ;;  %vm3068_vm7 = vmor %vm906_vm5, %vm907_vm6  ;;  %vm3072_vm8 = vcmp.eq.f32.partialorder %v910_v62, 8.507059e+37  ;;  %vm921_vm12 = vweird.f32 %v3013_v14 }
 0x166   : > { %v3008_v48 = vadd.f32 %v1440_v58, %v1295_v32  ;;  %v903_v40 = vsub.f32 1.0, %v902_v30 }
 0x167   : > { %v804_v22 = vpop.f32.mrf.mxu0 }
 0x168   : > { %v3010_v7 = vadd.f32 %v804_v22, %v661_v33  ;;  %v2128_v19 = vmul.f32 -1.442695, %v3008_v48  ;;  %v2279_v20 = vpop.eup %2278  ;;  %v904_v54 = vmul.f32 %v3015_v42, %v903_v40 }
 0x169   : > { %v3022_v32 = vadd.f32 1.0, %v2279_v20  ;;  %v3024_v36 = vpop.eup %2280 }
 0x16a   : > { %v2057_v28 = vmul.f32 -1.442695, %v3010_v7  ;;  %2286 = vpow2.f32 %v2128_v19  ;;  %v2283_v38 = vpop.eup %2282  ;;  %v1540_v47 = vmul.f32 %v3024_v36, %v3005_v61  ;;  %v1548_v19 = vand.u32 2147483647, %v3005_v61 }
 0x16b   : > { %v3031_v45 = vpop.eup %2284  ;;  %v3035_v49 = vadd.f32 1.0, %v2283_v38  ;;  %v1550_v38 = vand.u32 2147483648, %v3005_v61  ;;  %vm1545_vm11 = vweird.f32 %v3024_v36  ;;  %vm1559_vm0 = vweird.f32 %v3022_v32 }
 0x16c   : > { %2288 = vpow2.f32 %v2057_v28  ;;  %v1541_v22 = vsub.f32 1.0, %v1540_v47  ;;  %vm3088_vm10 = vcmp.eq.f32.partialorder %v1548_v19, 8.507059e+37  ;;  %vm3117_vm14 = vmor %vm1544_vm9, %vm1545_vm11  ;;  %vm922_vm15 = vweird.f32 %v3031_v45 }
 0x16d   : > { %v1442_v3 = vpop.f32.mrf.mxu2  ;;  %2290 = vrcp.f32 %v3022_v32  ;;  %vm3141_vm1 = vmor %vm921_vm12, %vm922_vm15  ;;  %vm936_vm4 = vweird.f32 %v3035_v49 }
 0x16e   : > { %v3029_v44 = vadd.f32 %v1442_v3, %v1300_v29  ;;  %2292 = vrcp.f32 %v3035_v49  ;;  %v1542_v30 = vmul.f32 %v3024_v36, %v1541_v22 }
 0x16f   : > { %v807_v8 = vpop.f32.mrf.mxu0 }
 0x170   : > { %v3026_v43 = vadd.f32 %v807_v8, %v666_v31  ;;  %v2287_v50 = vpop.eup %2286  ;;  %v917_v31 = vmul.f32 %v3031_v45, %v3013_v14  ;;  %v2129_v56 = vmul.f32 -1.442695, %v3029_v44  ;;  %v905_v8 = vadd.f32 %v3015_v42, %v904_v54 }
 0x171   : > { %v3048_v60 = vadd.f32 1.0, %v2287_v50 }
 0x172   : > { %v2289_v53 = vpop.eup %2288  ;;  %v2058_v55 = vmul.f32 -1.442695, %v3026_v43  ;;  %v918_v20 = vsub.f32 1.0, %v917_v31  ;;  %v909_v54 = vsel %vm3068_vm7, %v3015_v42, %v905_v8  ;;  %v927_v31 = vand.u32 2147483648, %v3013_v14 }
 0x173   : > { %v3050_v23 = vpop.eup %2290  ;;  %v3054_v63 = vadd.f32 1.0, %v2289_v53  ;;  %v1551_v42 = vor.u32 1.1754944e-38, %v1550_v38 }
 0x174   : > { %2294 = vpow2.f32 %v2058_v55  ;;  %v3080_v53 = vpop.eup %2292  ;;  %v925_v55 = vand.u32 2147483647, %v3013_v14  ;;  %v928_v38 = vor.u32 1.1754944e-38, %v927_v31  ;;  %vm1560_vm2 = vweird.f32 %v3050_v23 }
 0x175   : > { %v1445_v33 = vpop.f32.mrf.mxu2  ;;  %2296 = vpow2.f32 %v2129_v56  ;;  %v932_v19 = vmul.f32 %v3080_v53, %v3035_v49  ;;  %vm3189_vm5 = vmor %vm1559_vm0, %vm1560_vm2  ;;  %vm937_vm6 = vweird.f32 %v3080_v53 }
 0x176   : > { %2298 = vrcp.f32 %v3048_v60  ;;  %v3100_v1 = vadd.f32 %v1445_v33, %v2984_v34  ;;  %vm3106_vm13 = vcmp.eq.f32.partialorder %v925_v55, 8.507059e+37 }
 0x177   : > { %v809_v39 = vpop.f32.mrf.mxu0  ;;  %2300 = vrcp.f32 %v3054_v63  ;;  %v933_v5 = vsub.f32 1.0, %v932_v19 }
 0x178   : > { %v3043_v29 = vadd.f32 %v809_v39, %v2986_v35  ;;  %v912_v35 = vand.u32 2147483648, %v2999_v59  ;;  %v1555_v39 = vmul.f32 %v3050_v23, %v3022_v32  ;;  %v2130_v6 = vmul.f32 -1.442695, %v3100_v1 }
 0x17a   : > { %v2059_v28 = vmul.f32 -1.442695, %v3043_v29  ;;  %v913_v59 = vor.u32 1.1754944e-38, %v912_v35  ;;  %v2295_v62 = vpop.eup %2294  ;;  %v1556_v8 = vsub.f32 1.0, %v1555_v39  ;;  %v1563_v39 = vand.u32 2147483647, %v3022_v32 }
 0x17b   : > { %v2297_v35 = vpop.eup %2296 }
 0x17c   : > { %2302 = vpow2.f32 %v2059_v28  ;;  %v914_v40 = vsel %vm3072_vm8, %v913_v59, %v909_v54  ;;  %v3103_v2 = vpop.eup %2298  ;;  %v1565_v54 = vand.u32 2147483648, %v3022_v32  ;;  %v3125_v59 = vadd.f32 1.0, %v2295_v62 }
 0x17d   : > { %v3045_v58 = vpop.f32.mrf.mxu2  ;;  %v3111_v47 = vpop.eup %2300  ;;  %v3128_v55 = vmul.f32 %v914_v40, %v2988_v41  ;;  %v1557_v31 = vmul.f32 %v3050_v23, %v1556_v8  ;;  %v3134_v0 = vadd.f32 1.0, %v2297_v35  ;;  %v1570_v10 = vmul.f32 %v3103_v2, %v3048_v60 }
 0x17e   : > { %v942_v62 = vand.u32 2147483648, %v3035_v49  ;;  %vm3158_vm3 = vcmp.eq.f32.partialorder %v1563_v39, 8.507059e+37  ;;  %v3169_v56 = vadd.f32 %v3045_v58, %v2972_v26  ;;  %v1566_v34 = vor.u32 1.1754944e-38, %v1565_v54 }
 0x17f   : > { %v812_v3 = vpop.f32.mrf.mxu0  ;;  %4407 = vst [vmem:[#allocation14_spill] sm:$0xff] %v3128_v55  ;;  %vm1574_vm8 = vweird.f32 %v3048_v60  ;;  %vm1575_vm11 = vweird.f32 %v3103_v2  ;;  %vm952_vm12 = vweird.f32 %v3111_v47 }
 0x180   : > { %v3078_v50 = vadd.f32 %v812_v3, %v2958_v18  ;;  %v919_v18 = vmul.f32 %v3031_v45, %v918_v20  ;;  %v1543_v3 = vadd.f32 %v3024_v36, %v1542_v30  ;;  %v2131_v58 = vmul.f32 -1.442695, %v3169_v56 }
 0x182   : > { %v2060_v20 = vmul.f32 -1.442695, %v3078_v50  ;;  %v920_v33 = vadd.f32 %v3031_v45, %v919_v18  ;;  %v1547_v61 = vsel %vm3117_vm14, %v3024_v36, %v1543_v3  ;;  %v2303_v18 = vpop.eup %2302  ;;  %v940_v36 = vand.u32 2147483647, %v3035_v49  ;;  %vm3261_vm14 = vmor %vm1574_vm8, %vm1575_vm11 }
 0x183   : > { %v947_v3 = vmul.f32 %v3111_v47, %v3054_v63  ;;  %v1552_v35 = vsel %vm3088_vm10, %v1551_v42, %v1547_v61  ;;  %v1571_v42 = vsub.f32 1.0, %v1570_v10  ;;  %vm3232_vm10 = vmor %vm936_vm4, %vm937_vm6 }
 0x184   : > { %2304 = vpow2.f32 %v2060_v20  ;;  %v924_v14 = vsel %vm3141_vm1, %v3031_v45, %v920_v33  ;;  %v1558_v20 = vadd.f32 %v3050_v23, %v1557_v31  ;;  %v934_v45 = vmul.f32 %v3080_v53, %v933_v5 }
 0x185   : > { %v1450_v22 = vpop.f32.mrf.mxu2  ;;  %2306 = vrcp.f32 %v3125_v59  ;;  %v943_v33 = vor.u32 1.1754944e-38, %v942_v62  ;;  %v948_v61 = vsub.f32 1.0, %v947_v3  ;;  %v929_v26 = vsel %vm3106_vm13, %v928_v38, %v924_v14 }
 0x186   : > { %2308 = vrcp.f32 %v3134_v0  ;;  %v1578_v5 = vand.u32 2147483647, %v3048_v60  ;;  %vm3194_vm7 = vcmp.eq.f32.partialorder %v940_v36, 8.507059e+37  ;;  %v1562_v32 = vsel %vm3189_vm5, %v3050_v23, %v1558_v20 }
 0x187   : > { %v814_v28 = vpop.f32.mrf.mxu0  ;;  %2310 = vpow2.f32 %v2130_v6  ;;  %v3183_v6 = vadd.f32 %v1450_v22, %v2956_v17  ;;  %v935_v30 = vadd.f32 %v3080_v53, %v934_v45  ;;  %v1572_v38 = vmul.f32 %v3103_v2, %v1571_v42 }
 0x188   : > { %v3150_v8 = vadd.f32 %v814_v28, %v2970_v24  ;;  %v3165_v24 = vadd.f32 1.0, %v2303_v18  ;;  %v3177_v18 = vmul.f32 %v1552_v35, %v2991_v46  ;;  %v3212_v41 = vmul.f32 %v929_v26, %v2994_v51 }
 0x189   : > { %v1580_v36 = vand.u32 2147483648, %v3048_v60  ;;  %v949_v62 = vmul.f32 %v3111_v47, %v948_v61  ;;  %vm3217_vm9 = vcmp.eq.f32.partialorder %v1578_v5, 8.507059e+37  ;;  %v955_v23 = vand.u32 2147483647, %v3054_v63 }
 0x18a   : > { %v2061_v28 = vmul.f32 -1.442695, %v3150_v8  ;;  %v2305_v31 = vpop.eup %2304  ;;  %2312 = vrcp.f32 %v3165_v24  ;;  %4416 = vst [vmem:[#allocation15_spill] sm:$0xff] %v3212_v41  ;;  %v2132_v14 = vmul.f32 -1.442695, %v3183_v6  ;;  %v1567_v51 = vsel %vm3158_vm3, %v1566_v34, %v1562_v32 }
 0x18b   : > { %v3200_v17 = vadd.f32 1.0, %v2305_v31  ;;  %v3202_v22 = vpop.eup %2306  ;;  %v957_v42 = vand.u32 2147483648, %v3054_v63  ;;  %v939_v61 = vsel %vm3232_vm10, %v3080_v53, %v935_v30  ;;  %v1573_v40 = vadd.f32 %v3103_v2, %v1572_v38 }
 0x18c   : > { %2314 = vpow2.f32 %v2061_v28  ;;  %v3209_v54 = vpop.eup %2308  ;;  %v962_v28 = vmul.f32 %v3202_v22, %v3125_v59  ;;  %v950_v31 = vadd.f32 %v3111_v47, %v949_v62  ;;  %v1581_v32 = vor.u32 1.1754944e-38, %v1580_v36 }
 0x18d   : > { %v1452_v19 = vpop.f32.mrf.mxu2  ;;  %v2311_v3 = vpop.eup %2310  ;;  %2316 = vrcp.f32 %v3200_v17  ;;  %v1585_v26 = vmul.f32 %v3209_v54, %v3134_v0  ;;  %vm951_vm13 = vweird.f32 %v3054_v63  ;;  %vm3265_vm15 = vcmp.eq.f32.partialorder %v955_v23, 8.507059e+37 }
 0x18e   : > { %2318 = vpow2.f32 %v2131_v58  ;;  %v3250_v5 = vadd.f32 1.0, %v2311_v3  ;;  %v3253_v10 = vadd.f32 %v1452_v19, %v2974_v27  ;;  %v3256_v58 = vmul.f32 %v1567_v51, %v2997_v57  ;;  %vm3279_vm0 = vmor %vm951_vm13, %vm952_vm12 }
 0x18f   : > { %v3173_v39 = vpop.f32.mrf.mxu0  ;;  %2320 = vpow2.f32 %v2132_v14  ;;  %v958_v27 = vor.u32 1.1754944e-38, %v957_v42  ;;  %v1595_v19 = vand.u32 2147483648, %v3134_v0  ;;  %v963_v62 = vsub.f32 1.0, %v962_v28 }
 0x190   : > { %v3245_v34 = vpop.eup %2312  ;;  %4421 = vst [vmem:[#allocation16_spill] sm:$0xff] %v3256_v58  ;;  %v944_v63 = vsel %vm3194_vm7, %v943_v33, %v939_v61  ;;  %v1577_v60 = vsel %vm3261_vm14, %v3103_v2, %v1573_v40  ;;  %v954_v33 = vsel %vm3279_vm0, %v3111_v47, %v950_v31  ;;  %v1586_v46 = vsub.f32 1.0, %v1585_v26 }
 0x191   : > { %v977_v3 = vmul.f32 %v3245_v34, %v3165_v24  ;;  %2322 = vrcp.f32 %v3250_v5  ;;  %v2133_v2 = vmul.f32 -1.442695, %v3253_v10  ;;  %v972_v45 = vand.u32 2147483648, %v3125_v59 }
 0x192   : > { %v2315_v53 = vpop.eup %2314  ;;  %v3300_v61 = vmul.f32 %v944_v63, %v3002_v25  ;;  %v1582_v47 = vsel %vm3217_vm9, %v1581_v32, %v1577_v60  ;;  %v3304_v40 = vor.u32 1.1754944e-38, %v1595_v19  ;;  %v964_v31 = vmul.f32 %v3202_v22, %v963_v62 }
 0x193   : > { %v3270_v57 = vpop.eup %2316  ;;  %v3285_v23 = vadd.f32 1.0, %v2315_v53  ;;  %v959_v53 = vsel %vm3265_vm15, %v958_v27, %v954_v33  ;;  %v978_v30 = vsub.f32 1.0, %v977_v3  ;;  %v3313_v51 = vadd.f32 %v3173_v39, %v2966_v21 }
 0x194   : > { %v2319_v14 = vpop.eup %2318  ;;  %v992_v42 = vmul.f32 %v3270_v57, %v3200_v17  ;;  %4428 = vst [vmem:[#allocation17_spill] sm:$0xff] %v3300_v61  ;;  %v1587_v35 = vmul.f32 %v3209_v54, %v1586_v46  ;;  %vm966_vm1 = vweird.f32 %v3125_v59  ;;  %v970_v32 = vand.u32 2147483647, %v3125_v59 }
 0x195   : > { %v3224_v20 = vpop.f32.mrf.mxu2  ;;  %2324 = vrcp.f32 %v3285_v23  ;;  %v2321_v26 = vpop.eup %2320  ;;  %v3309_v36 = vadd.f32 1.0, %v2319_v14  ;;  %4429 = vst [vmem:[#allocation18_spill] sm:$0xff] %v3313_v51  ;;  %v3321_v19 = vmul.f32 %v1582_v47, %v3008_v48  ;;  %vm967_vm2 = vweird.f32 %v3202_v22 }
 0x196   : > { %2326 = vpow2.f32 %v2133_v2  ;;  %v3324_v38 = vor.u32 1.1754944e-38, %v972_v45  ;;  %v993_v27 = vsub.f32 1.0, %v992_v42  ;;  %v3329_v21 = vmul.f32 %v959_v53, %v3010_v7  ;;  %vm3360_vm4 = vmor %vm966_vm1, %vm967_vm2 }
 0x197   : > { %v819_v49 = vpop.f32.mrf.mxu0  ;;  %4430 = vst [vmem:[#allocation19_spill] sm:$0xff] %v3321_v19  ;;  %v3326_v62 = vpop.eup %2322  ;;  %v3332_v39 = vadd.f32 %v3202_v22, %v964_v31  ;;  %v3335_v60 = vadd.f32 1.0, %v2321_v26  ;;  %v979_v48 = vmul.f32 %v3245_v34, %v978_v30  ;;  %2328 = vrcp.f32 %v3309_v36 }
 0x198   : > { %4431 = vst [vmem:[#allocation20_spill] sm:$0xff] %v3329_v21  ;;  %v2062_v14 = vmul.f32 -1.442695, %v3313_v51  ;;  %v3343_v33 = vadd.f32 %v819_v49, %v2952_v15  ;;  %v3346_v7 = vadd.f32 %v3209_v54, %v1587_v35  ;;  %v3353_v45 = vadd.f32 %v3224_v20, %v2938_v12 }
 0x199   : > { %vm1590_vm3 = vweird.f32 %v3209_v54  ;;  %vm981_vm5 = vweird.f32 %v3165_v24  ;;  %v985_v49 = vand.u32 2147483647, %v3165_v24  ;;  %v987_v42 = vand.u32 2147483648, %v3165_v24 }
 0x19a   : > { %4432 = vst [vmem:[#allocation21_spill] sm:$0xff] %v3343_v33  ;;  %v994_v47 = vmul.f32 %v3270_v57, %v993_v27  ;;  %v969_v59 = vsel %vm3360_vm4, %v3202_v22, %v3332_v39  ;;  %vm3374_vm6 = vcmp.eq.f32.partialorder %v970_v32, 8.507059e+37  ;;  %v1600_v26 = vmul.f32 %v3326_v62, %v3250_v5 }
 0x19b   : > { %v3337_v3 = vpop.eup %2324  ;;  %4433 = vst [vmem:[#allocation22_spill] sm:$0xff] %v3353_v45  ;;  %2330 = vrcp.f32 %v3335_v60  ;;  %vm1589_vm7 = vweird.f32 %v3134_v0  ;;  %v980_v30 = vadd.f32 %v3245_v34, %v979_v48  ;;  %vm982_vm8 = vweird.f32 %v3245_v34 }
 0x19c   : > { %v1007_v2 = vmul.f32 %v3337_v3, %v3285_v23  ;;  %v2327_v20 = vpop.eup %2326  ;;  %2332 = vpow2.f32 %v2062_v14  ;;  %v2063_v35 = vmul.f32 -1.442695, %v3343_v33  ;;  %vm1012_vm9 = vweird.f32 %v3337_v3  ;;  %vm3398_vm11 = vmor %vm981_vm5, %vm982_vm8 }
 0x19d   : > { %v3297_v28 = vpop.f32.mrf.mxu2  ;;  %v1017_v32 = vand.u32 2147483648, %v3285_v23  ;;  %v2134_v27 = vmul.f32 -1.442695, %v3353_v45  ;;  %v3389_v39 = vpop.eup %2328  ;;  %vm997_vm10 = vweird.f32 %v3270_v57  ;;  %v1015_v48 = vand.u32 2147483647, %v3285_v23  ;;  %vm3456_vm8 = vmor %vm1589_vm7, %vm1590_vm3 }
 0x19e   : > { %v1008_v53 = vsub.f32 1.0, %v1007_v2  ;;  %v995_v2 = vadd.f32 %v3270_v57, %v994_v47  ;;  %v3394_v15 = vadd.f32 1.0, %v2327_v20  ;;  %v1601_v63 = vsub.f32 1.0, %v1600_v26 }
 0x19f   : > { %v3315_v25 = vpop.f32.mrf.mxu0  ;;  %v1002_v46 = vand.u32 2147483648, %v3200_v17  ;;  %vm1011_vm12 = vweird.f32 %v3285_v23  ;;  %vm996_vm13 = vweird.f32 %v3200_v17  ;;  %v1000_v47 = vand.u32 2147483647, %v3200_v17 }
 0x1a0   : > { %v1009_v22 = vmul.f32 %v3337_v3, %v1008_v53  ;;  %vm3409_vm14 = vmor %vm1011_vm12, %vm1012_vm9  ;;  %2334 = vpow2.f32 %v2063_v35  ;;  %v3415_v24 = vadd.f32 %v3297_v28, %v2948_v37  ;;  %v1615_v23 = vmul.f32 %v3389_v39, %v3309_v36 }
 0x1a1   : > { %v3417_v26 = vpop.eup %2330  ;;  %vm3423_vm15 = vmor %vm996_vm13, %vm997_vm10  ;;  %v1018_v35 = vor.u32 1.1754944e-38, %v1017_v32  ;;  %2336 = vpow2.f32 %v2134_v27  ;;  %v984_v37 = vsel %vm3398_vm11, %v3245_v34, %v980_v30  ;;  %vm1016_vm0 = vcmp.eq.f32.partialorder %v1015_v48, 8.507059e+37 }
 0x1a2   : > { %v1010_v45 = vadd.f32 %v3337_v3, %v1009_v22  ;;  %4442 = vst [vmem:[#allocation23_spill] sm:$0xff] %v3415_v24  ;;  %v2333_v51 = vpop.eup %2332  ;;  %v999_v28 = vsel %vm3423_vm15, %v3270_v57, %v995_v2  ;;  %2338 = vrcp.f32 %v3394_v15  ;;  %v4445_v58 = vand.u32 2147483647, %v3134_v0 }
 0x1a3   : > { %vm1604_vm2 = vweird.f32 %v3250_v5  ;;  %v3446_v34 = vadd.f32 %v3315_v25, %v2936_v11  ;;  %v974_v57 = vsel %vm3374_vm6, %v3324_v38, %v969_v59  ;;  %vm986_vm4 = vcmp.eq.f32.partialorder %v985_v49, 8.507059e+37 }
 0x1a4   : > { %v1014_v22 = vsel %vm3409_vm14, %v3337_v3, %v1010_v45  ;;  %vm3439_vm1 = vcmp.eq.f32.partialorder %v4445_v58, 8.507059e+37  ;;  %v988_v3 = vor.u32 1.1754944e-38, %v987_v42  ;;  %v1003_v45 = vor.u32 1.1754944e-38, %v1002_v46 }
 0x1a5   : > { %v3368_v12 = vpop.f32.mrf.mxu2  ;;  %v1019_v32 = vsel %vm1016_vm0, %v1018_v35, %v1014_v22  ;;  %4448 = vst [vmem:[#allocation24_spill] sm:$0xff] %v3446_v34  ;;  %vm1001_vm5 = vcmp.eq.f32.partialorder %v1000_v47, 8.507059e+37  ;;  %v2135_v58 = vmul.f32 -1.442695, %v3415_v24  ;;  %v1602_v46 = vmul.f32 %v3326_v62, %v1601_v63 }
 0x1a6   : > { %v989_v11 = vsel %vm986_vm4, %v988_v3, %v984_v37  ;;  %v1616_v25 = vsub.f32 1.0, %v1615_v23  ;;  %v1004_v30 = vsel %vm1001_vm5, %v1003_v45, %v999_v28  ;;  %v2335_v27 = vpop.eup %2334  ;;  %v1592_v38 = vsel %vm3456_vm8, %v3209_v54, %v3346_v7  ;;  %v4502_v37 = vld [vmem:[#allocation11_spill] sm:$0xff] }
 0x1a7   : > { %v824_v14 = vpop.f32.mrf.mxu0  ;;  %v1630_v49 = vmul.f32 %v3417_v26, %v3335_v60  ;;  %v3468_v0 = vmul.f32 %v1019_v32, %v3150_v8  ;;  %v3470_v59 = vadd.f32 1.0, %v2333_v51  ;;  %v2337_v31 = vpop.eup %2336  ;;  %vm1605_vm3 = vweird.f32 %v3326_v62 }
 0x1a8   : > { %v4452_v63 = vand.u32 2147483648, %v3250_v5  ;;  %v2064_v48 = vmul.f32 -1.442695, %v3446_v34  ;;  %v3478_v53 = vadd.f32 %v3368_v12, %v2940_v13  ;;  %v3480_v54 = vpop.eup %2338  ;;  %v3483_v7 = vmul.f32 %v974_v57, %v3026_v43  ;;  %vm3522_vm7 = vmor %vm1604_vm2, %vm1605_vm3 }
 0x1a9   : > { %4451 = vst [vmem:[#allocation25_spill] sm:$0xff] %v3468_v0  ;;  %v3486_v8 = vmul.f32 %v989_v11, %v3043_v29  ;;  %v3489_v51 = vmul.f32 %v1004_v30, %v3078_v50  ;;  %2340 = vpow2.f32 %v2135_v58  ;;  %v1603_v23 = vadd.f32 %v3326_v62, %v1602_v46 }
 0x1aa   : > { %v1611_v2 = vor.u32 1.1754944e-38, %v4452_v63  ;;  %4453 = vst [vmem:[#allocation26_spill] sm:$0xff] %v3478_v53  ;;  %v4457_v17 = vand.u32 2147483647, %v3250_v5  ;;  %v1617_v12 = vmul.f32 %v3389_v39, %v1616_v25  ;;  %v3499_v43 = vadd.f32 1.0, %v2335_v27 }
 0x1ab   : > { %4454 = vst [vmem:[#allocation27_spill] sm:$0xff] %v3483_v7  ;;  %v3502_v29 = vadd.f32 %v824_v14, %v2954_v16  ;;  %v1631_v22 = vsub.f32 1.0, %v1630_v49  ;;  %2342 = vrcp.f32 %v3470_v59  ;;  %v3505_v50 = vadd.f32 1.0, %v2337_v31 }
 0x1ac   : > { %4455 = vst [vmem:[#allocation28_spill] sm:$0xff] %v3486_v8  ;;  %vm3494_vm6 = vcmp.eq.f32.partialorder %v4457_v17, 8.507059e+37  ;;  %v1645_v28 = vmul.f32 %v3480_v54, %v3394_v15  ;;  %2344 = vpow2.f32 %v2064_v48  ;;  %v2136_v3 = vmul.f32 -1.442695, %v3478_v53  ;;  %v4504_v53 = vld [vmem:[#allocation10_spill] sm:$0xff] }
 0x1ad   : > { %v1462_v33 = vpop.f32.mrf.mxu2  ;;  %4456 = vst [vmem:[#allocation29_spill] sm:$0xff] %v3489_v51  ;;  %v1597_v16 = vsel %vm3439_vm1, %v3304_v40, %v1592_v38  ;;  %v1623_v32 = vand.u32 2147483647, %v3309_v36  ;;  %v1607_v40 = vsel %vm3522_vm7, %v3326_v62, %v1603_v23  ;;  %v1625_v20 = vand.u32 2147483648, %v3309_v36 }
 0x1ae   : > { %4460 = vst [vmem:[#allocation30_spill] sm:$0xff] %v3502_v29  ;;  %2346 = vrcp.f32 %v3499_v43  ;;  %v2065_v5 = vmul.f32 -1.442695, %v3502_v29  ;;  %v1618_v42 = vadd.f32 %v3389_v39, %v1617_v12  ;;  %vm1620_vm9 = vweird.f32 %v3389_v39 }
 0x1af   : > { %v827_v47 = vpop.f32.mrf.mxu0  ;;  %v2341_v58 = vpop.eup %2340  ;;  %2348 = vrcp.f32 %v3505_v50  ;;  %v1632_v46 = vmul.f32 %v3417_v26, %v1631_v22  ;;  %v1646_v11 = vsub.f32 1.0, %v1645_v28  ;;  %v3549_v30 = vmul.f32 %v1597_v16, %v3029_v44  ;;  %v4483_v16 = vld [vmem:[#allocation12_spill] sm:$0xff] }
 0x1b0   : > { %v3513_v45 = vadd.f32 %v827_v47, %v2918_v52  ;;  %2350 = vpow2.f32 %v2136_v3  ;;  %vm1619_vm10 = vweird.f32 %v3309_v36  ;;  %vm3552_vm11 = vcmp.eq.f32.partialorder %v1623_v32, 8.507059e+37 }
 0x1b1   : > { %v3546_v25 = vpop.eup %2342  ;;  %4467 = vst [vmem:[#allocation35_spill] sm:$0xff] %v3549_v30  ;;  %vm3557_vm12 = vmor %vm1619_vm10, %vm1620_vm9  ;;  %v1626_v49 = vor.u32 1.1754944e-38, %v1625_v20  ;;  %v1638_v31 = vand.u32 2147483647, %v3335_v60  ;;  %v3562_v63 = vadd.f32 1.0, %v2341_v58  ;;  %2352 = vpow2.f32 %v2065_v5 }
 0x1b2   : > { %4461 = vst [vmem:[#allocation31_spill] sm:$0xff] %v3513_v45  ;;  %v2066_v62 = vmul.f32 -1.442695, %v3513_v45  ;;  %v1612_v44 = vsel %vm3494_vm6, %v1611_v2, %v1607_v40  ;;  %v1622_v36 = vsel %vm3557_vm12, %v3389_v39, %v1618_v42  ;;  %vm1635_vm13 = vweird.f32 %v3417_v26 }
 0x1b3   : > { %4466 = vst [vmem:[#allocation34_spill] sm:$0xff] %v3546_v25  ;;  %v1633_v17 = vadd.f32 %v3417_v26, %v1632_v46  ;;  %v1647_v12 = vmul.f32 %v3480_v54, %v1646_v11  ;;  %v1022_v22 = vmul.f32 %v3546_v25, %v3470_v59  ;;  %vm1634_vm14 = vweird.f32 %v3335_v60 }
 0x1b4   : > { %2354 = vpow2.f32 %v2066_v62  ;;  %v1640_v39 = vand.u32 2147483648, %v3335_v60  ;;  %v3586_v3 = vmul.f32 %v1612_v44, %v3100_v1  ;;  %vm3588_vm15 = vcmp.eq.f32.partialorder %v1638_v31, 8.507059e+37  ;;  %vm3598_vm0 = vmor %vm1634_vm14, %vm1635_vm13 }
 0x1b5   : > { %v1465_v35 = vpop.f32.mrf.mxu2  ;;  %v1653_v14 = vand.u32 2147483647, %v3394_v15  ;;  %v1627_v32 = vsel %vm3552_vm11, %v1626_v49, %v1622_v36  ;;  %v1655_v1 = vand.u32 2147483648, %v3394_v15  ;;  %v1637_v5 = vsel %vm3598_vm0, %v3417_v26, %v1633_v17 }
 0x1b6   : > { %v3528_v57 = vadd.f32 %v1465_v35, %v2916_v4  ;;  %v3542_v4 = vadd.f32 %v1462_v33, %v2930_v9  ;;  %v2345_v33 = vpop.eup %2344  ;;  %4473 = vst [vmem:[#allocation37_spill] sm:$0xff] %v3586_v3  ;;  %v1648_v58 = vadd.f32 %v3480_v54, %v1647_v12  ;;  %vm1650_vm1 = vweird.f32 %v3480_v54 }
 0x1b7   : > { %v829_v47 = vpop.f32.mrf.mxu0  ;;  %v3571_v23 = vpop.eup %2346  ;;  %v3583_v35 = vadd.f32 1.0, %v2345_v33  ;;  %v1023_v42 = vsub.f32 1.0, %v1022_v22  ;;  %v1641_v46 = vor.u32 1.1754944e-38, %v1640_v39  ;;  %vm1649_vm2 = vweird.f32 %v3394_v15 }
 0x1b8   : > { %4464 = vst [vmem:[#allocation32_spill] sm:$0xff] %v3528_v57  ;;  %v2138_v9 = vmul.f32 -1.442695, %v3528_v57  ;;  %v2137_v48 = vmul.f32 -1.442695, %v3542_v4  ;;  %v3579_v13 = vpop.eup %2348  ;;  %v1037_v40 = vmul.f32 %v3571_v23, %v3499_v43  ;;  %vm3619_vm4 = vcmp.eq.f32.partialorder %v1653_v14, 8.507059e+37  ;;  %vm3626_vm5 = vmor %vm1649_vm2, %vm1650_vm1 }
 0x1b9   : > { %4465 = vst [vmem:[#allocation33_spill] sm:$0xff] %v3542_v4  ;;  %v2351_v28 = vpop.eup %2350  ;;  %v1660_v11 = vmul.f32 %v3579_v13, %v3505_v50  ;;  %v1032_v33 = vand.u32 2147483648, %v3470_v59  ;;  %v1642_v49 = vsel %vm3588_vm15, %v1641_v46, %v1637_v5  ;;  %v1656_v44 = vor.u32 1.1754944e-38, %v1655_v1 }
 0x1ba   : > { %4472 = vst [vmem:[#allocation36_spill] sm:$0xff] %v3571_v23  ;;  %2356 = vpow2.f32 %v2138_v9  ;;  %v2353_v20 = vpop.eup %2352  ;;  %v3613_v62 = vadd.f32 1.0, %v2351_v28  ;;  %v3616_v9 = vmul.f32 %v1627_v32, %v3169_v56  ;;  %v1038_v36 = vsub.f32 1.0, %v1037_v40 }
 0x1bb   : > { %2358 = vrcp.f32 %v3562_v63  ;;  %v2355_v27 = vpop.eup %2354  ;;  %v3630_v56 = vadd.f32 1.0, %v2353_v20  ;;  %v1652_v15 = vsel %vm3626_vm5, %v3480_v54, %v1648_v58  ;;  %v1024_v17 = vmul.f32 %v3546_v25, %v1023_v42 }
 0x1bc   : > { %2360 = vpow2.f32 %v2137_v48  ;;  %4478 = vst [vmem:[#allocation38_spill] sm:$0xff] %v3616_v9  ;;  %vm1026_vm8 = vweird.f32 %v3470_v59  ;;  %v1661_v39 = vsub.f32 1.0, %v1660_v11  ;;  %v3641_v28 = vadd.f32 1.0, %v2355_v27 }
 0x1bd   : > { %v3577_v2 = vpop.f32.mrf.mxu2  ;;  %2362 = vrcp.f32 %v3583_v35  ;;  %v3644_v14 = vadd.f32 %v829_v47, %v4483_v16  ;;  %v3647_v60 = vmul.f32 %v1642_v49, %v3183_v6  ;;  %v3649_v54 = vor.u32 1.1754944e-38, %v1032_v33  ;;  %v4488_v49 = vld [vmem:[#allocation13_spill] sm:$0xff] }
 0x1be   : > { %2364 = vrcp.f32 %v3613_v62  ;;  %vm1027_vm3 = vweird.f32 %v3546_v25  ;;  %v1039_v47 = vmul.f32 %v3571_v23, %v1038_v36  ;;  %v1657_v6 = vsel %vm3619_vm4, %v1656_v44, %v1652_v15 }
 0x1bf   : > { %v832_v32 = vpop.f32.mrf.mxu0  ;;  %4484 = vst [vmem:[#allocation12_spill] sm:$0xff] %v3647_v60  ;;  %2366 = vrcp.f32 %v3630_v56  ;;  %v3663_v42 = vadd.f32 %v3546_v25, %v1024_v17  ;;  %v1662_v27 = vmul.f32 %v3579_v13, %v1661_v39  ;;  %v1047_v33 = vand.u32 2147483648, %v3499_v43  ;;  %vm3687_vm7 = vmor %vm1026_vm8, %vm1027_vm3  ;;  %v4503_v17 = vld [vmem:[#allocation8_spill] sm:$0xff] }
 0x1c0   : > { %v2357_v38 = vpop.eup %2356  ;;  %4485 = vst [vmem:[#allocation39_spill] sm:$0xff] %v3649_v54  ;;  %2368 = vrcp.f32 %v3641_v28  ;;  %vm1041_vm6 = vweird.f32 %v3499_v43  ;;  %v3679_v31 = vadd.f32 %v3577_v2, %v4488_v49  ;;  %v4490_v36 = vmov 0 }
 0x1c1   : > { %v3632_v48 = vpop.eup %2358  ;;  %v3652_v40 = vadd.f32 1.0, %v2357_v38  ;;  %4487 = vst [vmem:[#allocation41_spill] sm:$0xff] %v3663_v42  ;;  %v2067_v38 = vmul.f32 -1.442695, %v3644_v14  ;;  %v4491_v36 = vsel %vm3687_vm7, 4294967295, %v4490_v36  ;;  %v3692_v15 = vadd.f32 %v3571_v23, %v1039_v47 }
 0x1c2   : > { %v2361_v22 = vpop.eup %2360  ;;  %v1675_v46 = vmul.f32 %v3632_v48, %v3562_v63  ;;  %4489 = vst [vmem:[#allocation13_spill] sm:$0xff] %v3679_v31  ;;  %vm1042_vm9 = vweird.f32 %v3571_v23  ;;  %v1062_v2 = vand.u32 2147483648, %v3583_v35  ;;  %v3708_v47 = vadd.f32 %v3579_v13, %v1662_v27 }
 0x1c3   : > { %v3654_v5 = vpop.eup %2362  ;;  %v3667_v11 = vadd.f32 1.0, %v2361_v22  ;;  %2370 = vrcp.f32 %v3652_v40  ;;  %4492 = vst [vmem:[#allocation42_spill] sm:$0xff] %v4491_v36  ;;  %v3698_v22 = vmul.f32 %v1657_v6, %v3253_v10  ;;  %v3710_v52 = vor.u32 1.1754944e-38, %v1047_v33  ;;  %vm3715_vm10 = vmor %vm1041_vm6, %vm1042_vm9 }
 0x1c4   : > { %4486 = vst [vmem:[#allocation40_spill] sm:$0xff] %v3654_v5  ;;  %v1052_v26 = vmul.f32 %v3654_v5, %v3583_v35  ;;  %v3681_v44 = vpop.eup %2364  ;;  %v1676_v16 = vsub.f32 1.0, %v1675_v46  ;;  %v4497_v10 = vmov 0  ;;  %v2139_v27 = vmul.f32 -1.442695, %v3679_v31 }
 0x1c5   : > { %v1470_v20 = vpop.f32.mrf.mxu2  ;;  %4493 = vst [vmem:[#allocation43_spill] sm:$0xff] %v3692_v15  ;;  %2372 = vrcp.f32 %v3667_v11  ;;  %v3705_v49 = vpop.eup %2366  ;;  %v4498_v10 = vsel %vm3715_vm10, 4294967295, %v4497_v10  ;;  %v1690_v1 = vmul.f32 %v3681_v44, %v3613_v62  ;;  %v3730_v39 = vor.u32 1.1754944e-38, %v1062_v2 }
 0x1c6   : > { %4494 = vst [vmem:[#allocation44_spill] sm:$0xff] %v3698_v22  ;;  %2374 = vpow2.f32 %v2067_v38  ;;  %v1053_v46 = vsub.f32 1.0, %v1052_v26  ;;  %v3723_v58 = vpop.eup %2368  ;;  %v1677_v12 = vmul.f32 %v3632_v48, %v1676_v16  ;;  %vm1056_vm11 = vweird.f32 %v3583_v35 }
 0x1c7   : > { %4495 = vst [vmem:[#allocation45_spill] sm:$0xff] %v3708_v47  ;;  %v834_v6 = vpop.f32.mrf.mxu0  ;;  %v1067_v7 = vmul.f32 %v3705_v49, %v3630_v56  ;;  %vm1057_vm12 = vweird.f32 %v3654_v5  ;;  %v1077_v2 = vand.u32 2147483648, %v3630_v56  ;;  %2376 = vpow2.f32 %v2139_v27 }
 0x1c8   : > { %4496 = vst [vmem:[#allocation46_spill] sm:$0xff] %v3710_v52  ;;  %v3744_v38 = vadd.f32 %v832_v32, %v4502_v37  ;;  %v1054_v16 = vmul.f32 %v3654_v5, %v1053_v46  ;;  %v1691_v0 = vsub.f32 1.0, %v1690_v1  ;;  %v3750_v24 = vadd.f32 %v1470_v20, %v4503_v17  ;;  %v4505_v32 = vld [vmem:[#allocation9_spill] sm:$0xff]  ;;  %vm3791_vm14 = vmor %vm1056_vm11, %vm1057_vm12 }
 0x1c9   : > { %4499 = vst [vmem:[#allocation47_spill] sm:$0xff] %v4498_v10  ;;  %v3733_v26 = vpop.eup %2370  ;;  %v3753_v54 = vadd.f32 %v834_v6, %v4504_v53  ;;  %v1082_v42 = vmul.f32 %v3723_v58, %v3641_v28  ;;  %v3764_v1 = vadd.f32 %v3632_v48, %v1677_v12  ;;  %v1068_v20 = vsub.f32 1.0, %v1067_v7  ;;  %v4621_v55 = vld [vmem:[#allocation41_spill] sm:$0xff] }
 0x1ca   : > { %4500 = vst [vmem:[#allocation48_spill] sm:$0xff] %v3730_v39  ;;  %v1720_v27 = vmul.f32 %v3733_v26, %v3652_v40  ;;  %v2068_v37 = vmul.f32 -1.442695, %v3744_v38  ;;  %v2140_v53 = vmul.f32 -1.442695, %v3750_v24  ;;  %v3769_v6 = vor.u32 1.1754944e-38, %v1077_v2 }
 0x1cb   : > { %4501 = vst [vmem:[#allocation49_spill] sm:$0xff] %v3733_v26  ;;  %v3746_v51 = vpop.eup %2372  ;;  %v2069_v36 = vmul.f32 -1.442695, %v3753_v54  ;;  %v3775_v4 = vadd.f32 %v3654_v5, %v1054_v16  ;;  %vm1071_vm13 = vweird.f32 %v3630_v56  ;;  %v1092_v16 = vand.u32 2147483648, %v3641_v28 }
 0x1cc   : > { %v2375_v33 = vpop.eup %2374  ;;  %4506 = vst [vmem:[#allocation11_spill] sm:$0xff] %v3764_v1  ;;  %v1705_v46 = vmul.f32 %v3746_v51, %v3667_v11  ;;  %2378 = vpow2.f32 %v2068_v37  ;;  %v1721_v2 = vsub.f32 1.0, %v1720_v27  ;;  %v1069_v37 = vmul.f32 %v3705_v49, %v1068_v20  ;;  %v4611_v31 = vld [vmem:[#allocation43_spill] sm:$0xff] }
 0x1cd   : > { %v1472_v8 = vpop.f32.mrf.mxu2  ;;  %v3766_v17 = vadd.f32 1.0, %v2375_v33  ;;  %4507 = vst [vmem:[#allocation8_spill] sm:$0xff] %v3775_v4  ;;  %v2377_v7 = vpop.eup %2376  ;;  %v1083_v33 = vsub.f32 1.0, %v1082_v42  ;;  %vm1072_vm15 = vweird.f32 %v3705_v49  ;;  %vm1086_vm0 = vweird.f32 %v3641_v28 }
 0x1ce   : > { %v3761_v25 = vadd.f32 %v1472_v8, %v4505_v32  ;;  %v1692_v8 = vmul.f32 %v3681_v44, %v1691_v0  ;;  %v3785_v52 = vadd.f32 1.0, %v2377_v7  ;;  %v4508_v0 = vmov 0  ;;  %vm3847_vm5 = vmor %vm1071_vm13, %vm1072_vm15 }
 0x1cf   : > { %2380 = vrcp.f32 %v3766_v17  ;;  %v4509_v0 = vsel %vm3791_vm14, 4294967295, %v4508_v0  ;;  %v1706_v42 = vsub.f32 1.0, %v1705_v46  ;;  %v1084_v34 = vmul.f32 %v3723_v58, %v1083_v33 }
 0x1d0   : > { %2382 = vpow2.f32 %v2140_v53  ;;  %v2141_v32 = vmul.f32 -1.442695, %v3761_v25  ;;  %4510 = vst [vmem:[#allocation10_spill] sm:$0xff] %v4509_v0  ;;  %v3802_v20 = vadd.f32 %v3681_v44, %v1692_v8  ;;  %v1722_v46 = vmul.f32 %v3733_v26, %v1721_v2 }
 0x1d1   : > { %2384 = vpow2.f32 %v2069_v36  ;;  %vm1724_vm1 = vweird.f32 %v3652_v40  ;;  %v3812_v12 = vadd.f32 %v3705_v49, %v1069_v37  ;;  %v3814_v27 = vor.u32 1.1754944e-38, %v1092_v16 }
 0x1d2   : > { %4511 = vst [vmem:[#allocation9_spill] sm:$0xff] %v3802_v20  ;;  %2386 = vrcp.f32 %v3785_v52  ;;  %v2379_v7 = vpop.eup %2378  ;;  %v1707_v33 = vmul.f32 %v3746_v51, %v1706_v42  ;;  %v1730_v2 = vand.u32 2147483648, %v3652_v40  ;;  %vm1087_vm2 = vweird.f32 %v3723_v58 }
 0x1d3   : > { %2388 = vpow2.f32 %v2141_v32  ;;  %v3816_v8 = vadd.f32 1.0, %v2379_v7  ;;  %vm1725_vm4 = vweird.f32 %v3733_v26  ;;  %v3832_v7 = vadd.f32 %v3723_v58, %v1084_v34  ;;  %vm3864_vm8 = vmor %vm1086_vm0, %vm1087_vm2 }
 0x1d4   : > { %v3835_v42 = vadd.f32 %v3733_v26, %v1722_v46  ;;  %v1107_v46 = vand.u32 2147483648, %v3766_v17  ;;  %v3868_v34 = vor.u32 1.1754944e-38, %v1730_v2  ;;  %v3873_v3 = vadd.f32 %v3746_v51, %v1707_v33  ;;  %vm3879_vm3 = vmor %vm1724_vm1, %vm1725_vm4 }
 0x1d5   : > { %v3809_v36 = vpop.eup %2380  ;;  %2390 = vrcp.f32 %v3816_v8  ;;  %v4518_v23 = vmov 0  ;;  %v1745_v9 = vand.u32 2147483648, %v3785_v52  ;;  %v1105_v60 = vand.u32 2147483647, %v3766_v17 }
 0x1d6   : > { %v2383_v15 = vpop.eup %2382  ;;  %v1097_v32 = vmul.f32 %v3809_v36, %v3766_v17  ;;  %4512 = vst [vmem:[#allocation50_spill] sm:$0xff] %v3835_v42  ;;  %v4519_v23 = vsel %vm3879_vm3, 4294967295, %v4518_v23  ;;  %v1120_v22 = vand.u32 2147483647, %v3816_v8  ;;  %v1122_v33 = vand.u32 2147483648, %v3816_v8 }
 0x1d7   : > { %v3829_v37 = vadd.f32 1.0, %v2383_v15  ;;  %v2385_v16 = vpop.eup %2384  ;;  %4517 = vst [vmem:[#allocation51_spill] sm:$0xff] %v3868_v34  ;;  %vm1116_vm12 = vweird.f32 %v3816_v8  ;;  %vm3932_vm4 = vcmp.eq.f32.partialorder %v1105_v60, 8.507059e+37  ;;  %vm4542_vm1 = vweird.f32 %v3766_v17  ;;  %v4587_v17 = vld [vmem:[#allocation13_spill] sm:$0xff] }
 0x1d8   : > { %v3841_v61 = vpop.eup %2386  ;;  %v3854_v53 = vadd.f32 1.0, %v2385_v16  ;;  %v1098_v41 = vsub.f32 1.0, %v1097_v32  ;;  %4520 = vst [vmem:[#allocation52_spill] sm:$0xff] %v4519_v23  ;;  %v1743_v32 = vand.u32 2147483647, %v3785_v52  ;;  %vm3917_vm15 = vcmp.eq.f32.partialorder %v1120_v22, 8.507059e+37 }
 0x1d9   : > { %2392 = vrcp.f32 %v3829_v37  ;;  %v2389_v21 = vpop.eup %2388  ;;  %v1735_v16 = vmul.f32 %v3841_v61, %v3785_v52  ;;  %v1123_v0 = vor.u32 1.1754944e-38, %v1122_v33  ;;  %v1760_v42 = vand.u32 2147483648, %v3829_v37 }
 0x1da   : > { %2394 = vrcp.f32 %v3854_v53  ;;  %v3885_v2 = vadd.f32 1.0, %v2389_v21  ;;  %v3900_v21 = vor.u32 1.1754944e-38, %v1107_v46  ;;  %v1099_v57 = vmul.f32 %v3809_v36, %v1098_v41 }
 0x1db   : > { %v3897_v10 = vpop.eup %2390  ;;  %v1736_v47 = vsub.f32 1.0, %v1735_v16  ;;  %v3912_v46 = vor.u32 1.1754944e-38, %v1745_v9  ;;  %v1135_v16 = vand.u32 2147483647, %v3854_v53  ;;  %vm3956_vm6 = vcmp.eq.f32.partialorder %v1743_v32, 8.507059e+37 }
 0x1dc   : > { %2396 = vrcp.f32 %v3885_v2  ;;  %v1112_v29 = vmul.f32 %v3897_v10, %v3816_v8  ;;  %v1100_v22 = vadd.f32 %v3809_v36, %v1099_v57  ;;  %vm1117_vm0 = vweird.f32 %v3897_v10 }
 0x1dd   : > { %v1737_v9 = vmul.f32 %v3841_v61, %v1736_v47  ;;  %vm3943_vm2 = vcmp.eq.f32.partialorder %v1135_v16, 8.507059e+37  ;;  %v1137_v57 = vand.u32 2147483648, %v3854_v53  ;;  %vm3969_vm9 = vmor %vm1116_vm12, %vm1117_vm0  ;;  %v4538_v8 = vand.u32 2147483647, %v3652_v40 }
 0x1de   : > { %v1113_v41 = vsub.f32 1.0, %v1112_v29  ;;  %v1758_v29 = vand.u32 2147483647, %v3829_v37  ;;  %v4539_v23 = vmov 0  ;;  %vm4541_vm0 = vweird.f32 %v3809_v36 }
 0x1df   : > { %v3909_v1 = vpop.eup %2392  ;;  %v1738_v26 = vadd.f32 %v3841_v61, %v1737_v9  ;;  %v4535_v9 = vand.u32 2147483647, %v3630_v56  ;;  %vm3987_vm12 = vcmp.eq.f32.partialorder %v4538_v8, 8.507059e+37  ;;  %vm3995_vm14 = vmor %vm4542_vm1, %vm4541_vm0  ;;  %vm4545_vm1 = vweird.f32 %v3841_v61 }
 0x1e0   : > { %v1750_v4 = vmul.f32 %v3909_v1, %v3829_v37  ;;  %v3924_v5 = vpop.eup %2394  ;;  %v1114_v45 = vmul.f32 %v3897_v10, %v1113_v41  ;;  %v4527_v41 = vand.u32 2147483647, %v3641_v28  ;;  %v4540_v23 = vsel %vm3987_vm12, 4294967295, %v4539_v23 }
 0x1e1   : > { %v1127_v20 = vmul.f32 %v3924_v5, %v3854_v53  ;;  %vm3981_vm10 = vcmp.eq.f32.partialorder %v4535_v9, 8.507059e+37  ;;  %v1104_v8 = vsel %vm3995_vm14, %v3809_v36, %v1100_v22  ;;  %vm4546_vm0 = vweird.f32 %v3785_v52 }
 0x1e2   : > { %v3940_v47 = vpop.eup %2396  ;;  %v1751_v60 = vsub.f32 1.0, %v1750_v4  ;;  %vm3952_vm13 = vcmp.eq.f32.partialorder %v4527_v41, 8.507059e+37  ;;  %v1115_v16 = vadd.f32 %v3897_v10, %v1114_v45  ;;  %v4534_v45 = vld [vmem:[#allocation16_spill] sm:$0xff]  ;;  %v4536_v41 = vmov 0  ;;  %vm4012_vm12 = vmor %vm4546_vm0, %vm4545_vm1 }
 0x1e3   : > { %v1128_v34 = vsub.f32 1.0, %v1127_v20  ;;  %v1765_v4 = vmul.f32 %v3940_v47, %v3885_v2  ;;  %v1811_v20 = vpack.c.bf16 %v4534_v45, %v3177_v18  ;;  %v4537_v41 = vsel %vm3981_vm10, 4294967295, %v4536_v41 }
 0x1e4   : > { %v1752_v32 = vmul.f32 %v3909_v1, %v1751_v60  ;;  %v1119_v56 = vsel %vm3969_vm9, %v3897_v10, %v1115_v16  ;;  %v4549_v16 = vand.u32 2147483647, %v3583_v35  ;;  %v4550_v36 = vmov 0 }
 0x1e5   : > { %v1129_v9 = vmul.f32 %v3924_v5, %v1128_v34  ;;  %v1766_v40 = vsub.f32 1.0, %v1765_v4  ;;  %v1775_v34 = vand.u32 2147483648, %v3885_v2  ;;  %vm4552_vm14 = vweird.f32 %v3909_v1 }
 0x1e6   : > { %v1753_v10 = vadd.f32 %v3909_v1, %v1752_v32  ;;  %vm4022_vm11 = vcmp.eq.f32.partialorder %v4549_v16, 8.507059e+37  ;;  %vm4553_vm1 = vweird.f32 %v3829_v37  ;;  %vm1770_vm7 = vweird.f32 %v3940_v47  ;;  %v4594_v16 = vld [vmem:[#allocation40_spill] sm:$0xff] }
 0x1e7   : > { %v4551_v36 = vsel %vm4022_vm11, 4294967295, %v4550_v36  ;;  %v1130_v52 = vadd.f32 %v3924_v5, %v1129_v9  ;;  %vm4031_vm0 = vmor %vm4553_vm1, %vm4552_vm14  ;;  %v1767_v4 = vmul.f32 %v3940_v47, %v1766_v40  ;;  %v1773_v35 = vand.u32 2147483647, %v3885_v2  ;;  %v4623_v40 = vld [vmem:[#allocation39_spill] sm:$0xff] }
 0x1e8   : > { %vm1664_vm9 = vweird.f32 %v3505_v50  ;;  %v1124_v28 = vsel %vm3917_vm15, %v1123_v0, %v1119_v56  ;;  %vm4556_vm11 = vweird.f32 %v3924_v5  ;;  %vm4557_vm3 = vweird.f32 %v3854_v53 }
 0x1e9   : > { %vm1133_vm10 = vmor %vm4557_vm3, %vm4556_vm11  ;;  %v1138_v37 = vor.u32 1.1754944e-38, %v1137_v57  ;;  %v1757_v32 = vsel %vm4031_vm0, %v3909_v1, %v1753_v10  ;;  %v1761_v60 = vor.u32 1.1754944e-38, %v1760_v42  ;;  %v4558_v9 = vand.u32 2147483647, %v3499_v43 }
 0x1ea   : > { %v1742_v39 = vsel %vm4012_vm12, %v3841_v61, %v1738_v26  ;;  %v1134_v0 = vsel %vm1133_vm10, %v3924_v5, %v1130_v52  ;;  %vm1759_vm15 = vcmp.eq.f32.partialorder %v1758_v29, 8.507059e+37  ;;  %v1768_v53 = vadd.f32 %v3940_v47, %v1767_v4  ;;  %v4595_v52 = vld [vmem:[#allocation8_spill] sm:$0xff] }
 0x1eb   : > { %vm4050_vm14 = vcmp.eq.f32.partialorder %v4558_v9, 8.507059e+37  ;;  %v1109_v1 = vsel %vm3932_vm4, %v3900_v21, %v1104_v8  ;;  %v1139_v43 = vsel %vm3943_vm2, %v1138_v37, %v1134_v0  ;;  %v1762_v42 = vsel %vm1759_vm15, %v1761_v60, %v1757_v32  ;;  %v4604_v9 = vld [vmem:[#allocation11_spill] sm:$0xff] }
 0x1ec   : > { %vm4561_vm3 = vweird.f32 %v3885_v2  ;;  %v1776_v57 = vor.u32 1.1754944e-38, %v1775_v34  ;;  %v4562_v61 = vand.u32 2147483647, %v3470_v59  ;;  %vm4565_vm12 = vweird.f32 %v3746_v51  ;;  %v4631_v34 = vld [vmem:[#allocation25_spill] sm:$0xff] }
 0x1ed   : > { %vm1771_vm11 = vmor %vm4561_vm3, %vm1770_vm7  ;;  %vm4566_vm4 = vweird.f32 %v3667_v11  ;;  %v1155_v26 = vmul.f32 %v1124_v28, %v3744_v38  ;;  %v1156_v2 = vmul.f32 %v1139_v43, %v3753_v54  ;;  %vm1774_vm7 = vcmp.eq.f32.partialorder %v1773_v35, 8.507059e+37  ;;  %v4607_v43 = vld [vmem:[#allocation45_spill] sm:$0xff] }
 0x1ee   : > { %vm4070_vm10 = vcmp.eq.f32.partialorder %v4562_v61, 8.507059e+37  ;;  %vm4078_vm1 = vmor %vm4566_vm4, %vm4565_vm12  ;;  %v1772_v21 = vsel %vm1771_vm11, %v3940_v47, %v1768_v53  ;;  %v4569_v29 = vsel %vm3864_vm8, %v3723_v58, %v3832_v7  ;;  %v1747_v54 = vsel %vm3956_vm6, %v3912_v46, %v1742_v39  ;;  %v4580_v58 = vld [vmem:[#allocation49_spill] sm:$0xff]  ;;  %v4583_v46 = vld [vmem:[#allocation51_spill] sm:$0xff] }
 0x1ef   : > { %v1712_v59 = vsel %vm4078_vm1, %v3746_v51, %v3873_v3  ;;  %v1094_v33 = vsel %vm3952_vm13, %v3814_v27, %v4569_v29  ;;  %v1777_v38 = vsel %vm1774_vm7, %v1776_v57, %v1772_v21  ;;  %v1154_v47 = vmul.f32 %v1109_v1, %v3644_v14  ;;  %v4578_v14 = vld [vmem:[#allocation52_spill] sm:$0xff]  ;;  %v4581_v27 = vld [vmem:[#allocation50_spill] sm:$0xff]  ;;  %v4608_v57 = vld [vmem:[#allocation47_spill] sm:$0xff] }
 0x1f0   : > { %v1180_v56 = vpack.c.bf16 %v1156_v2, %v1155_v26  ;;  %v1793_v8 = vmul.f32 %v1762_v42, %v3750_v24  ;;  %v1794_v51 = vmul.f32 %v1777_v38, %v3761_v25  ;;  %vm4570_vm2 = vweird.f32 %v3681_v44  ;;  %v4605_v39 = vld [vmem:[#allocation30_spill] sm:$0xff]  ;;  %v4606_v53 = vld [vmem:[#allocation32_spill] sm:$0xff] }
 0x1f1   : > { %vm4571_vm8 = vweird.f32 %v3613_v62  ;;  %v4574_v19 = vsel %vm3847_vm5, %v3705_v49, %v3812_v12  ;;  %vm4575_vm6 = vnez %v4537_v41  ;;  %v4576_v24 = vand.u32 2147483647, %v3667_v11  ;;  %v4585_v49 = vld [vmem:[#allocation9_spill] sm:$0xff]  ;;  %v4586_v12 = vld [vmem:[#allocation31_spill] sm:$0xff]  ;;  %v4610_v61 = vld [vmem:[#allocation36_spill] sm:$0xff] }
 0x1f2   : > { %vm4107_vm0 = vmor %vm4571_vm8, %vm4570_vm2  ;;  %v1079_v30 = vsel %vm4575_vm6, %v3769_v6, %v4574_v19  ;;  %v4577_v25 = vand.u32 2147483648, %v3667_v11  ;;  %vm4579_vm15 = vnez %v4578_v14  ;;  %vm4584_vm3 = vnez %v4540_v23  ;;  %1205 = vmatpush.bf16.msra.mxu1 %v1180_v56  ;;  %v4592_v23 = vld [vmem:[#allocation10_spill] sm:$0xff]  ;;  %v4626_v14 = vld [vmem:[#allocation21_spill] sm:$0xff] }
 0x1f3   : > { %vm1714_vm13 = vcmp.eq.f32.partialorder %v4576_v24, 8.507059e+37  ;;  %v4582_v7 = vsel %vm4579_vm15, %v4580_v58, %v4581_v27  ;;  %v1697_v6 = vsel %vm4107_vm0, %v3681_v44, %v4585_v49  ;;  %v1153_v41 = vmul.f32 %v1094_v33, %v4586_v12  ;;  %v4597_v44 = vld [vmem:[#allocation48_spill] sm:$0xff]  ;;  %v4613_v2 = vld [vmem:[#allocation46_spill] sm:$0xff]  ;;  %v4629_v12 = vld [vmem:[#allocation23_spill] sm:$0xff] }
 0x1f4   : > { %v1716_v3 = vor.u32 1.1754944e-38, %v4577_v25  ;;  %v1732_v15 = vsel %vm4584_vm3, %v4583_v46, %v4582_v7  ;;  %v1792_v10 = vmul.f32 %v1747_v54, %v4587_v17  ;;  %v1818_v11 = vpack.c.bf16 %v1794_v51, %v1793_v8  ;;  %v4616_v54 = vld [vmem:[#allocation24_spill] sm:$0xff]  ;;  %v4618_v8 = vld [vmem:[#allocation42_spill] sm:$0xff] }
 0x1f5   : > { %vm4588_vm5 = vweird.f32 %v3632_v48  ;;  %vm4589_vm11 = vweird.f32 %v3562_v63  ;;  %vm4593_vm4 = vnez %v4592_v23  ;;  %vm4598_vm1 = vnez %v4551_v36  ;;  %v4620_v51 = vld [vmem:[#allocation34_spill] sm:$0xff]  ;;  %v4632_v23 = vld [vmem:[#allocation29_spill] sm:$0xff] }
 0x1f6   : > { %vm4141_vm12 = vmor %vm4589_vm11, %vm4588_vm5  ;;  %v4596_v22 = vsel %vm4593_vm4, %v4594_v16, %v4595_v52  ;;  %v4599_v35 = vand.u32 2147483647, %v3613_v62  ;;  %v4600_v28 = vand.u32 2147483648, %v3613_v62  ;;  %v1717_v32 = vsel %vm1714_vm13, %v1716_v3, %v1712_v59  ;;  %1843 = vmatpush.bf16.msra.mxu3 %v1818_v11  ;;  %v4627_v27 = vld [vmem:[#allocation26_spill] sm:$0xff]  ;;  %v4634_v52 = vld [vmem:[#allocation44_spill] sm:$0xff] }
 0x1f7   : > { %v1064_v4 = vsel %vm4598_vm1, %v4597_v44, %v4596_v22  ;;  %vm4601_vm2 = vweird.f32 %v3579_v13  ;;  %v1682_v36 = vsel %vm4141_vm12, %v3632_v48, %v4604_v9  ;;  %v1152_v0 = vmul.f32 %v1079_v30, %v4605_v39  ;;  %v4628_v49 = vld [vmem:[#allocation18_spill] sm:$0xff]  ;;  %v4635_v22 = vld [vmem:[#allocation12_spill] sm:$0xff] }
 0x1f8   : > { %vm1699_vm7 = vcmp.eq.f32.partialorder %v4599_v35, 8.507059e+37  ;;  %v1701_v37 = vor.u32 1.1754944e-38, %v4600_v28  ;;  %vm4161_vm8 = vmor %vm1664_vm9, %vm4601_vm2  ;;  %v1791_v1 = vmul.f32 %v1732_v15, %v4606_v53  ;;  %v1179_v62 = vpack.c.bf16 %v1154_v47, %v1153_v41  ;;  %v4617_v47 = vld [vmem:[#allocation33_spill] sm:$0xff]  ;;  %v4630_v17 = vld [vmem:[#allocation22_spill] sm:$0xff] }
 0x1f9   : > { %v1667_v42 = vsel %vm4161_vm8, %v3579_v13, %v4607_v43  ;;  %vm4609_vm9 = vnez %v4608_v57  ;;  %v4614_v21 = vand.u32 2147483648, %v3562_v63  ;;  %v4615_v33 = vand.u32 2147483647, %v3562_v63  ;;  %v4638_v35 = vld [vmem:[#allocation27_spill] sm:$0xff]  ;;  %v4643_v9 = vld [vmem:[#allocation20_spill] sm:$0xff] }
 0x1fa   : > { %v4612_v26 = vsel %vm4609_vm9, %v4610_v61, %v4611_v31  ;;  %v1702_v29 = vsel %vm1699_vm7, %v1701_v37, %v1697_v6  ;;  %v1151_v38 = vmul.f32 %v1064_v4, %v4616_v54  ;;  %v1790_v13 = vmul.f32 %v1717_v32, %v4617_v47  ;;  %1206 = vmatpush.bf16.msra.mxu1 %v1179_v62  ;;  %v4637_v4 = vld [vmem:[#allocation28_spill] sm:$0xff]  ;;  %v4640_v37 = vld [vmem:[#allocation38_spill] sm:$0xff]  ;;  %v4641_v32 = vld [vmem:[#allocation37_spill] sm:$0xff] }
 0x1fb   : > { %v1049_v48 = vsel %vm4050_vm14, %v4613_v2, %v4612_v26  ;;  %v1686_v59 = vor.u32 1.1754944e-38, %v4614_v21  ;;  %vm1684_vm0 = vcmp.eq.f32.partialorder %v4615_v33, 8.507059e+37  ;;  %v1817_v56 = vpack.c.bf16 %v1792_v10, %v1791_v1  ;;  %v2171_v53 = vld [vmem:[%s4340_s5 + $0x4] sm:$0xf0]  ;;  %v4646_v1 = vld [vmem:[#allocation35_spill] sm:$0xff]  ;;  %v4650_v26 = vld [vmem:[#allocation14_spill] sm:$0xff] }
 0x1fc   : > { %vm4619_vm6 = vnez %v4618_v8  ;;  %v4624_v24 = vand.u32 2147483648, %v3505_v50  ;;  %v4625_v3 = vand.u32 2147483647, %v3505_v50  ;;  %v1150_v58 = vmul.f32 %v1049_v48, %v4626_v14  ;;  %v4647_v62 = vld [vmem:[#allocation19_spill] sm:$0xff]  ;;  %v2183_v57 = vld [vmem:[%s4340_s5 + $0x8] sm:$0xf0] }
 0x1fd   : > { %v4622_v19 = vsel %vm4619_vm6, %v4620_v51, %v4621_v55  ;;  %v1687_v63 = vsel %vm1684_vm0, %v1686_v59, %v1682_v36  ;;  %v1789_v7 = vmul.f32 %v1702_v29, %v4627_v27  ;;  %v1178_v46 = vpack.c.bf16 %v1152_v0, %v1151_v38  ;;  %1844 = vmatpush.bf16.msra.mxu3 %v1817_v56  ;;  %v4644_v36 = vld [vmem:[#allocation17_spill] sm:$0xff]  ;;  %v2072_v0 = vld [vmem:[%s4340_s5] sm:$0xf]  ;;  %v4649_v31 = vld [vmem:[#allocation15_spill] sm:$0xff]  ;;  %v571_v27 = vpop.permute.xlu1 %570 }
 0x1fe   : > { %v1034_v30 = vsel %vm4070_vm10, %v4623_v40, %v4622_v19  ;;  %v1671_v25 = vor.u32 1.1754944e-38, %v4624_v24  ;;  %vm1669_vm14 = vcmp.eq.f32.partialorder %v4625_v3, 8.507059e+37  ;;  %v1788_v41 = vmul.f32 %v1687_v63, %v4629_v12  ;;  %v2076_v21 = vld [vmem:[%s4340_s5 + $0x10] sm:$0xf]  ;;  %v2172_v59 = vld [vmem:[%s4340_s5 + $0x14] sm:$0xf0] }
 0x1ff   : > { %v1149_v6 = vmul.f32 %v1034_v30, %v4628_v49  ;;  %1207 = vmatpush.bf16.msra.mxu1 %v1178_v46  ;;  %v1816_v5 = vpack.c.bf16 %v1790_v13, %v1789_v7  ;;  %v4633_v16 = vpack.c.bf16 %v4631_v34, %v4632_v23  ;;  %v4636_v44 = vpack.c.bf16 %v4634_v52, %v4635_v22  ;;  %v2148_v29 = vld [vmem:[%s4340_s5 + $0x14] sm:$0xf]  ;;  %v2184_v33 = vld [vmem:[%s4340_s5 + $0x18] sm:$0xf0]  ;;  %v2173_v54 = vld [vmem:[%s4340_s5 + $0x24] sm:$0xf0] }
 0x200   : > { %v1672_v15 = vsel %vm1669_vm14, %v1671_v25, %v1667_v42  ;;  %v4639_v28 = vpack.c.bf16 %v4637_v4, %v4638_v35  ;;  %v4642_v60 = vpack.c.bf16 %v4640_v37, %v4641_v32  ;;  %v4645_v39 = vpack.c.bf16 %v4643_v9, %v4644_v36  ;;  %v2144_v42 = vld [vmem:[%s4340_s5 + $0x4] sm:$0xf]  ;;  %v2185_v47 = vld [vmem:[%s4340_s5 + $0x28] sm:$0xf0]  ;;  %v2084_v8 = vld [vmem:[%s4340_s5 + $0x30] sm:$0xf]  ;;  %v566_v25 = vpop.permute.xlu0 %565 }
 0x201   : > { %v1787_v10 = vmul.f32 %v1672_v15, %v4630_v17  ;;  %v1177_v11 = vpack.c.bf16 %v1150_v58, %v1149_v6  ;;  %1845 = vmatpush.bf16.msra.mxu3 %v1816_v5  ;;  %v4648_v43 = vpack.c.bf16 %v4646_v1, %v4647_v62  ;;  %v2073_v61 = vor.u32 %v2171_v53, %v2072_v0  ;;  %v2152_v38 = vld [vmem:[%s4340_s5 + $0x24] sm:$0xf]  ;;  %v2174_v51 = vld [vmem:[%s4340_s5 + $0x34] sm:$0xf0]  ;;  %v2156_v55 = vld [vmem:[%s4340_s5 + $0x34] sm:$0xf]  ;;  %v576_v6 = vpop.permute.xlu2 %575 }
 0x202   : > { %v4651_v2 = vpack.c.bf16 %v4649_v31, %v4650_v26  ;;  %v2145_v48 = vor.u32 %v2183_v57, %v2144_v42  ;;  %v2077_v18 = vor.u32 %v2172_v59, %v2076_v21  ;;  %v2149_v45 = vor.u32 %v2184_v33, %v2148_v29  ;;  %v2186_v19 = vld [vmem:[%s4340_s5 + $0x38] sm:$0xf0] }
 0x203   : > { %1208 = vmatpush.bf16.msra.mxu1 %v1177_v11  ;;  %v1815_v50 = vpack.c.bf16 %v1788_v41, %v1787_v10  ;;  %v2153_v56 = vor.u32 %v2185_v47, %v2152_v38  ;;  %v2085_v40 = vor.u32 %v2174_v51, %v2084_v8  ;;  %v2157_v30 = vor.u32 %v2186_v19, %v2156_v55 }
 0x205   : > { %1846 = vmatpush.bf16.msra.mxu3 %v1815_v50 }
 0x207   : > { %1209 = vmatpush.bf16.msra.mxu1 %v4633_v16  ;;  %v586_v16 = vpop.permute.xlu1 %585 }
 0x208   : > { %v581_v10 = vpop.permute.xlu0 %580 }
 0x209   : > { %1847 = vmatpush.bf16.msra.mxu3 %v4636_v44  ;;  %v591_v35 = vpop.permute.xlu2 %590 }
 0x20b   : > { %1210 = vmatpush.bf16.msra.mxu1 %v4639_v28 }
 0x20d   : > { %1848 = vmatpush.bf16.msra.mxu3 %v4642_v60 }
 0x20f   : > { %1211 = vmatpush.bf16.msra.mxu1 %v4645_v39  ;;  %v601_v1 = vpop.permute.xlu1 %600 }
 0x210   : > { %v596_v9 = vpop.permute.xlu0 %595 }
 0x211   : > { %1849 = vmatpush.bf16.msra.mxu3 %v4648_v43 }
 0x213   : > { %1212 = vmatpush.bf16.msra.mxu1 %v4651_v2 }
 0x215   : > { %1850 = vmatpush.bf16.msra.mxu3 %v1811_v20  ;;  %v2080_v20 = vld [vmem:[%s4340_s5 + $0x20] sm:$0xf] }
 0x216   : > { %1213 = vmatmul.bf16.vlgmr.msra.gmra.mxu1 %v2073_v61  ;;  %v2081_v13 = vor.u32 %v2173_v54, %v2080_v20 }
 0x218   : > { %1851 = vmatmul.bf16.vlgmr.msra.gmra.mxu3 %v2145_v48 }
 0x226   : > { %1218 = vmatmul.bf16.gmra.mxu1 %v2077_v18 }
 0x228   : > { %1856 = vmatmul.bf16.gmra.mxu3 %v2149_v45 }
 0x236   : > { %1223 = vmatmul.bf16.gmra.mxu1 %v2081_v13 }
 0x238   : > { %1861 = vmatmul.bf16.gmra.mxu3 %v2153_v56 }
 0x246   : > { %1228 = vmatmul.bf16.gmra.mxu1 %v2085_v40 }
 0x248   : > { %1866 = vmatmul.bf16.gmra.mxu3 %v2157_v30 }
 0x293   : > { %v1214_v24 = vpop.f32.mrf.mxu1 }
 0x294   : > { %v1234_v63 = vadd.f32 %v1214_v24, %v566_v25 }
 0x29b   : > { %v1216_v3 = vpop.f32.mrf.mxu1  ;;  %v1852_v14 = vpop.f32.mrf.mxu3 }
 0x29c   : > { %v1872_v58 = vadd.f32 %v1852_v14, %v1234_v63  ;;  %v1235_v7 = vadd.f32 %v1216_v3, %v571_v27 }
 0x29e   : > { %1896 = vst [vmem:[%s4279_s19] sm:$0xff] %v1872_v58 }
 0x2a3   : > { %v1219_v46 = vpop.f32.mrf.mxu1  ;;  %v1854_v15 = vpop.f32.mrf.mxu3 }
 0x2a4   : > { %v1873_v49 = vadd.f32 %v1854_v15, %v1235_v7  ;;  %v1236_v12 = vadd.f32 %v1219_v46, %v576_v6 }
 0x2a6   : > { %1897 = vst [vmem:[%s4279_s19 + $0x8] sm:$0xff] %v1873_v49 }
 0x2ab   : > { %v1221_v41 = vpop.f32.mrf.mxu1  ;;  %v1857_v5 = vpop.f32.mrf.mxu3 }
 0x2ac   : > { %v1874_v17 = vadd.f32 %v1857_v5, %v1236_v12  ;;  %v1237_v11 = vadd.f32 %v1221_v41, %v581_v10 }
 0x2ae   : > { %1898 = vst [vmem:[%s4279_s19 + $0x10] sm:$0xff] %v1874_v17 }
 0x2b3   : > { %v1224_v50 = vpop.f32.mrf.mxu1  ;;  %v1859_v34 = vpop.f32.mrf.mxu3 }
 0x2b4   : > { %v1875_v23 = vadd.f32 %v1859_v34, %v1237_v11  ;;  %v1238_v52 = vadd.f32 %v1224_v50, %v586_v16 }
 0x2b6   : > { %1899 = vst [vmem:[%s4279_s19 + $0x18] sm:$0xff] %v1875_v23 }
 0x2bb   : > { %v1226_v22 = vpop.f32.mrf.mxu1  ;;  %v1862_v44 = vpop.f32.mrf.mxu3 }
 0x2bc   : > { %v1876_v4 = vadd.f32 %v1862_v44, %v1238_v52  ;;  %v1239_v28 = vadd.f32 %v1226_v22, %v591_v35 }
 0x2be   : > { %1900 = vst [vmem:[%s4279_s19 + $0x20] sm:$0xff] %v1876_v4 }
 0x2c3   : > { %v1864_v37 = vpop.f32.mrf.mxu3  ;;  %v1229_v60 = vpop.f32.mrf.mxu1 }
 0x2c4   : > { %v1877_v32 = vadd.f32 %v1864_v37, %v1239_v28  ;;  %v1240_v36 = vadd.f32 %v1229_v60, %v596_v9 }
 0x2c6   : > { %1901 = vst [vmem:[%s4279_s19 + $0x28] sm:$0xff] %v1877_v32 }
 0x2cb   : > { %v1867_v39 = vpop.f32.mrf.mxu3  ;;  %v1231_v53 = vpop.f32.mrf.mxu1 }
 0x2cc   : > { %v1878_v0 = vadd.f32 %v1867_v39, %v1240_v36  ;;  %v1241_v62 = vadd.f32 %v1231_v53, %v601_v1 }
 0x2ce   : > { %1902 = vst [vmem:[%s4279_s19 + $0x30] sm:$0xff] %v1878_v0 }
 0x2d3   : > { %v1869_v43 = vpop.f32.mrf.mxu3 }
 0x2d4   : > { %v1879_v42 = vadd.f32 %v1869_v43, %v1241_v62 }
 0x2d6   : > { %1903 = vst [vmem:[%s4279_s19 + $0x38] sm:$0xff] %v1879_v42 }
 0x2d7   : > { %2425 = shalt.err (!%p2422_p7)
}
 0x2d8   : > { %s2496_s19 = smov 128   ;;  %s2497_s13 = smov 256  }
 0x2d9   : > { %s2498_s27 = smov 8  }
 0x2da   : > { %2187 = dma.vmem_to_hbm [thread:$0]  (%p2599_p8), %s1919_s17, 1024, %s1921_s18, %s1905_s28, %s2496_s19, %s2497_s13, %s2498_s27  }
 0x2db PF: > { %p2193_p10 = scmp.ge.s32.totalorder %s2492_s8, 2  ;;  %s1935_s21 = sand.u32 1, %s2464_s24  }
 0x2dc   : > { %s1936_s12 = scalar_lea.sflag [#allocation5], %s1935_s21 }
 0x2dd   : > { %p2190_p11 = pnand %p2193_p10, %p2603_p9 }
 0x2df   : > { %p2191_p12 = pneg %p2190_p11 }
 0x2e1   : > { %2459 = dma.done.wait (%p2191_p12), %s1936_s12, 1024  }
 0x2e2   : > { %2461 = vsyncadd (%p2191_p12), %s1936_s12, 4294966272  ;;  %s20_s8 = sadd.s32 1, %s2492_s8   ;;  %s4653_s15 = sld [smem:[#allocation7_spill]] }
 0x2e3   : > { %p17_p13 = scmp.ge.s32.totalorder %s20_s8, 6   ;;  %s4654_s24 = smov %s2468_s25 }
 0x2e4   : > { %s4655_s25 = smov %s2472_s26  ;;  %s4656_s26 = smov %s2611_s20 }
 0x2e5   : > { %s4657_s27 = smov %s2484_s29  ;;  %s4658_s28 = smov %s2488_s30 }
 0x2e6   : > { %s4659_s29 = smov %s4662_s11  ;;  %19 = sbr.rel (!%p17_p13) target bundleno = 5 (0x5), region = 126 }
 0x2e8   : > { %s4660_s30 = smov %s4653_s15 }
 0x2eb   :  { %1942 = vsyncpa [#allocation5], 1 }
 0x2ec   :  { %1944 = vsyncpa [#allocation5 + $0x1], 1 }

</bundles_post_ra>
